<compile_context>
chip_gen: v7x
topology: tpu7x:2x2x1
jax: 0.10.0
libtpu: 0.0.40
codegen_flags: <defaults>
</compile_context>

<pallas_src>
import math

import jax
import jax.numpy as jnp
from jax.experimental import pallas as pl
from jax.experimental.pallas import tpu as pltpu


# --------------------------------------------------------------------------
# Kernel factory
# --------------------------------------------------------------------------
def make_decoder_layer_kernel(heads, d_model, batch_block, tgt_len, src_len):
    D = d_model
    dk = D // heads
    Bb = batch_block
    T = tgt_len
    S = src_len

    def layer_norm(v, g, b):
        mu = jnp.mean(v, axis=-1, keepdims=True)
        var = jnp.mean((v - mu) ** 2, axis=-1, keepdims=True)
        return (v - mu) * jax.lax.rsqrt(var + 1e-6) * g + b

    def split_heads(x2, seq):
        # [Bb*seq, D] -> [H*Bb, seq, dk] (head-major batch; lane slices only,
        # no transposes, no activation broadcast)
        x3 = x2.reshape(Bb, seq, D)
        return jnp.concatenate(
            [x3[:, :, h * dk:(h + 1) * dk] for h in range(heads)], axis=0)

    def merge_heads(x, seq):
        # [H*Bb, seq, dk] -> [Bb*seq, D] (heads back onto the lane dim)
        x3 = jnp.concatenate(
            [x[h * Bb:(h + 1) * Bb] for h in range(heads)], axis=-1)
        return x3.reshape(Bb * seq, D)

    def attn_core(q2, k2, v2, bias3, Tq, Tk):
        # q2: [Bb*Tq, D] f32 (q-scale already folded into W_q)
        # k2/v2: [Bb*Tk, D] f32 ; bias3: [Bb, Tq|1, Tk] additive mask
        q = split_heads(q2, Tq).astype(jnp.bfloat16)   # [H*Bb, Tq, dk]
        k = split_heads(k2, Tk).astype(jnp.bfloat16)   # [H*Bb, Tk, dk]
        v = split_heads(v2, Tk).astype(jnp.bfloat16)   # [H*Bb, Tk, dk]

        # Scores for all (head, batch-row) pairs: single-batch-dim 3-D einsum.
        s = jnp.einsum('nqd,nkd->nqk', q, k,
                       preferred_element_type=jnp.float32)        # [H*Bb,Tq,Tk]
        s = (s.reshape(heads, Bb, Tq, Tk) + bias3[None]
             ).reshape(heads * Bb, Tq, Tk)

        m = jnp.max(s, axis=-1, keepdims=True)
        e = jnp.exp(s - m)
        denom = jnp.sum(e, axis=-1, keepdims=True)

        # PV matmul on the *unnormalized* exp; normalize afterwards on the
        # (Tk/dk)x smaller [n, Tq, dk] tensor (review item).
        ctx = jnp.einsum('nqk,nkd->nqd', e.astype(jnp.bfloat16), v,
                         preferred_element_type=jnp.float32)      # [H*Bb,Tq,dk]
        ctx = ctx * pl.reciprocal(denom, approx=True)
        return merge_heads(ctx, Tq)                               # [Bb*Tq, D]

    def kernel(inp_ref, mem_ref, tgt_pad_ref, src_pad_ref,
               ln1_g_ref, ln1_b_ref, ln2_g_ref, ln2_b_ref,
               s_qkv_w_ref, s_qkv_b_ref, s_o_w_ref, s_o_b_ref,
               c_q_w_ref, c_q_b_ref, c_kv_w_ref, c_kv_b_ref,
               c_o_w_ref, c_o_b_ref,
               lnf_g_ref, lnf_b_ref, w1_ref, b1_ref, w2_ref, b2_ref,
               out_ref, allin_ref):
        # Flatten the batch block into the matmul row dim (M = Bb*T rows).
        x2d = inp_ref[...].reshape(Bb * T, D)
        mem2d = mem_ref[...].reshape(Bb * S, D)

        # Additive masks built in-kernel (no [B,T,T] HBM traffic).
        row = jax.lax.broadcasted_iota(jnp.int32, (T, T), 0)
        col = jax.lax.broadcasted_iota(jnp.int32, (T, T), 1)
        dec_masked = jnp.logical_or((col > row)[None], tgt_pad_ref[...] > 0)
        dec_bias = jnp.where(dec_masked, -1e18, 0.0)              # [Bb, T, T]
        src_bias = jnp.where(src_pad_ref[...] > 0, -1e18, 0.0)    # [Bb, 1, S]

        # ---- LN1 + self-attention + residual --------------------------------
        input_norm = layer_norm(x2d, ln1_g_ref[...], ln1_b_ref[...])

        # One fused lane-dense QKV projection: [Bb*T, D] @ [D, 3D].
        qkv = jnp.dot(input_norm.astype(jnp.bfloat16), s_qkv_w_ref[...],
                      preferred_element_type=jnp.float32) + s_qkv_b_ref[...]
        self_ctx = attn_core(qkv[:, :D], qkv[:, D:2 * D], qkv[:, 2 * D:],
                             dec_bias, T, T)
        # Output projection fused over heads: K = H*dk = D.
        self_out = jnp.dot(self_ctx.astype(jnp.bfloat16), s_o_w_ref[...],
                           preferred_element_type=jnp.float32) + s_o_b_ref[...]
        query = self_out + x2d                     # drop(query) + inputs

        # ---- LN2 + context attention ----------------------------------------
        query_norm = layer_norm(query, ln2_g_ref[...], ln2_b_ref[...])
        cq = jnp.dot(query_norm.astype(jnp.bfloat16), c_q_w_ref[...],
                     preferred_element_type=jnp.float32) + c_q_b_ref[...]
        # Fused K|V projection of the memory bank: [Bb*S, D] @ [D, 2D].
        ckv = jnp.dot(mem2d.astype(jnp.bfloat16), c_kv_w_ref[...],
                      preferred_element_type=jnp.float32) + c_kv_b_ref[...]
        ctx_ctx = attn_core(cq, ckv[:, :D], ckv[:, D:], src_bias, T, S)
        mid = jnp.dot(ctx_ctx.astype(jnp.bfloat16), c_o_w_ref[...],
                      preferred_element_type=jnp.float32) + c_o_b_ref[...]

        # ---- PositionwiseFeedForward (with residual) -------------------------
        ff_in = mid + query
        xn = layer_norm(ff_in, lnf_g_ref[...], lnf_b_ref[...])
        inter = jnp.maximum(
            jnp.dot(xn.astype(jnp.bfloat16), w1_ref[...],
                    preferred_element_type=jnp.float32) + b1_ref[...], 0.0)
        ff_out = jnp.dot(inter.astype(jnp.bfloat16), w2_ref[...],
                         preferred_element_type=jnp.float32) + b2_ref[...]

        out_ref[...] = (ff_out + ff_in).reshape(Bb, T, D).astype(out_ref.dtype)
        allin_ref[...] = input_norm.reshape(Bb, T, D).astype(allin_ref.dtype)

    return kernel


# --------------------------------------------------------------------------
# One-time weight preparation (hoisted out of the forward call)
# --------------------------------------------------------------------------
def prepare_params(params, heads):
    D = params["sq_w"].shape[0]
    dk = D // heads
    scale = jnp.float32(1.0 / math.sqrt(dk))
    bf16, f32 = jnp.bfloat16, jnp.float32

    def cat(ws):
        return jnp.concatenate(ws, axis=1)

    return {
        "ln1_g": params["ln1_g"].astype(f32), "ln1_b": params["ln1_b"].astype(f32),
        "ln2_g": params["ln2_g"].astype(f32), "ln2_b": params["ln2_b"].astype(f32),
        "lnf_g": params["lnf_g"].astype(f32), "lnf_b": params["lnf_b"].astype(f32),
        # self-attention: q-scale folded into W_q / b_q, Q|K|V fused along lanes
        "s_qkv_w": cat([params["sq_w"] * scale, params["sk_w"], params["sv_w"]]).astype(bf16),
        "s_qkv_b": cat([params["sq_b"] * scale, params["sk_b"], params["sv_b"]]).astype(f32),
        "s_o_w": params["so_w"].astype(bf16), "s_o_b": params["so_b"].astype(f32),
        # context attention: Q separate (query input), K|V fused (memory input)
        "c_q_w": (params["cq_w"] * scale).astype(bf16),
        "c_q_b": (params["cq_b"] * scale).astype(f32),
        "c_kv_w": cat([params["ck_w"], params["cv_w"]]).astype(bf16),
        "c_kv_b": cat([params["ck_b"], params["cv_b"]]).astype(f32),
        "c_o_w": params["co_w"].astype(bf16), "c_o_b": params["co_b"].astype(f32),
        # feed-forward
        "w1": params["w1"].astype(bf16), "b1": params["b1"].astype(f32),
        "w2": params["w2"].astype(bf16), "b2": params["b2"].astype(f32),
    }


WEIGHT_ORDER = [
    "ln1_g", "ln1_b", "ln2_g", "ln2_b",
    "s_qkv_w", "s_qkv_b", "s_o_w", "s_o_b",
    "c_q_w", "c_q_b", "c_kv_w", "c_kv_b", "c_o_w", "c_o_b",
    "lnf_g", "lnf_b", "w1", "b1", "w2", "b2",
]


def _pick_batch_block(B, T):
    # Batch several rows per grid step so the T=1 (decode) case does not run
    # M=1 matmuls and weight DMAs are amortized across Bb rows.
    bb = max(1, min(B, 256 // max(T, 1)))
    while B % bb:
        bb -= 1
    return bb


def _pick_vmem_limit():
    try:
        cap = int(pltpu.get_tpu_info().vmem_capacity_bytes)
    except Exception:
        cap = 128 * 1024 * 1024
    # ~3/4 of physical VMEM, capped: ≈96 MiB on v5e/v6e, ≈48 MiB on v7x.
    return max(32 * 1024 * 1024, min(cap * 3 // 4, 100 * 1024 * 1024))


# --------------------------------------------------------------------------
# Wrapper
# --------------------------------------------------------------------------
def transformer_decoder_layer(inputs, memory_bank, src_pad_mask, tgt_pad_mask,
                              prepared, heads):
    B, T, D = inputs.shape
    S = memory_bank.shape[1]
    Bb = _pick_batch_block(B, T)

    kernel = make_decoder_layer_kernel(heads, D, Bb, T, S)
    weight_args = [prepared[k] for k in WEIGHT_ORDER]

    def weight_spec(shape):
        nd = len(shape)
        # Block index never changes across the (batch) grid -> single buffer.
        return pl.BlockSpec(shape, lambda b: (0,) * nd,
                            pipeline_mode=pl.Buffered(1))

    in_specs = [
        pl.BlockSpec((Bb, T, D), lambda b: (b, 0, 0)),    # inputs
        pl.BlockSpec((Bb, S, D), lambda b: (b, 0, 0)),    # memory_bank
        pl.BlockSpec((Bb, 1, T), lambda b: (b, 0, 0)),    # tgt_pad_mask
        pl.BlockSpec((Bb, 1, S), lambda b: (b, 0, 0)),    # src_pad_mask
    ] + [weight_spec(w.shape) for w in weight_args]

    out_specs = (
        pl.BlockSpec((Bb, T, D), lambda b: (b, 0, 0)),    # output
        pl.BlockSpec((Bb, T, D), lambda b: (b, 0, 0)),    # all_input
    )
    out_shape = (
        jax.ShapeDtypeStruct((B, T, D), jnp.float32),
        jax.ShapeDtypeStruct((B, T, D), jnp.float32),
    )

    call = pl.pallas_call(
        kernel,
        out_shape=out_shape,
        grid_spec=pltpu.PrefetchScalarGridSpec(
            num_scalar_prefetch=0,
            grid=(B // Bb,),
            in_specs=in_specs,
            out_specs=out_specs,
        ),
        compiler_params=pltpu.CompilerParams(
            dimension_semantics=("parallel",),
            vmem_limit_bytes=_pick_vmem_limit()),
    )
    return call(inputs, memory_bank,
                tgt_pad_mask.astype(jnp.float32),
                src_pad_mask.astype(jnp.float32),
                *weight_args)


# --------------------------------------------------------------------------
# Pure-JAX reference (f32, original parameter layout, for correctness check)
# --------------------------------------------------------------------------
def reference(inputs, memory_bank, src_pad_mask, tgt_pad_mask, p, heads):
    B, T, D = inputs.shape
    dk = D // heads

    def ln(x, g, b):
        mu = x.mean(-1, keepdims=True)
        var = ((x - mu) ** 2).mean(-1, keepdims=True)
        return (x - mu) / jnp.sqrt(var + 1e-6) * g + b

    def mha(q_in, kv_in, mask, wq, bq, wk, bk, wv, bv, wo, bo):
        Tq, Tk = q_in.shape[1], kv_in.shape[1]
        q = (q_in @ wq + bq).reshape(B, Tq, heads, dk).transpose(0, 2, 1, 3) / math.sqrt(dk)
        k = (kv_in @ wk + bk).reshape(B, Tk, heads, dk).transpose(0, 2, 1, 3)
        v = (kv_in @ wv + bv).reshape(B, Tk, heads, dk).transpose(0, 2, 1, 3)
        scores = q @ k.transpose(0, 1, 3, 2)
        scores = jnp.where(mask[:, None, :, :] > 0, -1e18, scores)
        attn = jax.nn.softmax(scores, axis=-1)
        ctx = (attn @ v).transpose(0, 2, 1, 3).reshape(B, Tq, D)
        return ctx @ wo + bo

    sub_mask = jnp.triu(jnp.ones((1, T, T), dtype=jnp.float32), k=1)
    dec_mask = ((tgt_pad_mask.astype(jnp.float32) + sub_mask) > 0).astype(jnp.float32)
    dec_mask = jnp.broadcast_to(dec_mask, (B, T, T))

    input_norm = ln(inputs, p["ln1_g"], p["ln1_b"])
    self_out = mha(input_norm, input_norm, dec_mask,
                   p["sq_w"], p["sq_b"], p["sk_w"], p["sk_b"],
                   p["sv_w"], p["sv_b"], p["so_w"], p["so_b"])
    query = self_out + inputs
    query_norm = ln(query, p["ln2_g"], p["ln2_b"])
    mid = mha(query_norm, memory_bank, src_pad_mask.astype(jnp.float32),
              p["cq_w"], p["cq_b"], p["ck_w"], p["ck_b"],
              p["cv_w"], p["cv_b"], p["co_w"], p["co_b"])
    ff_in = mid + query
    xn = ln(ff_in, p["lnf_g"], p["lnf_b"])
    inter = jnp.maximum(xn @ p["w1"] + p["b1"], 0.0)
    output = inter @ p["w2"] + p["b2"] + ff_in
    return output, input_norm


# --------------------------------------------------------------------------
# Main
# --------------------------------------------------------------------------
if __name__ == "__main__":
    B, T, S = 2, 1, 8          # inputs: [B x 1 x d_model] as in the docstring
    D, HEADS, FF = 32, 4, 64

    key = jax.random.PRNGKey(0)
    keys = jax.random.split(key, 32)
    ki = iter(keys)

    def w(shape, scale=0.1):
        return (scale * jax.random.normal(next(ki), shape)).astype(jnp.float32)

    params = {
        "ln1_g": 1.0 + w((1, D)), "ln1_b": w((1, D)),
        "ln2_g": 1.0 + w((1, D)), "ln2_b": w((1, D)),
        "sq_w": w((D, D)), "sq_b": w((1, D)),
        "sk_w": w((D, D)), "sk_b": w((1, D)),
        "sv_w": w((D, D)), "sv_b": w((1, D)),
        "so_w": w((D, D)), "so_b": w((1, D)),
        "cq_w": w((D, D)), "cq_b": w((1, D)),
        "ck_w": w((D, D)), "ck_b": w((1, D)),
        "cv_w": w((D, D)), "cv_b": w((1, D)),
        "co_w": w((D, D)), "co_b": w((1, D)),
        "lnf_g": 1.0 + w((1, D)), "lnf_b": w((1, D)),
        "w1": w((D, FF)), "b1": w((1, FF)),
        "w2": w((FF, D)), "b2": w((1, D)),
    }

    inputs = jax.random.normal(next(ki), (B, T, D), dtype=jnp.float32)
    memory_bank = jax.random.normal(next(ki), (B, S, D), dtype=jnp.float32)
    # src_pad_mask: last 2 source positions are padding (1 == masked)
    src_pad_mask = jnp.concatenate(
        [jnp.zeros((B, 1, S - 2)), jnp.ones((B, 1, 2))], axis=-1).astype(jnp.float32)
    tgt_pad_mask = jnp.zeros((B, 1, T), dtype=jnp.float32)

    # One-time weight preparation (hoisted out of the per-step forward call).
    prepared = prepare_params(params, HEADS)

    out, all_input = transformer_decoder_layer(
        inputs, memory_bank, src_pad_mask, tgt_pad_mask, prepared, HEADS)
    jax.block_until_ready((out, all_input))

    ref_out, ref_all = reference(inputs, memory_bank, src_pad_mask, tgt_pad_mask,
                                 params, HEADS)
    assert out.shape == (B, T, D) and all_input.shape == (B, T, D)
    # bf16 matmuls + approx reciprocal => compare against f32 reference loosely
    assert jnp.allclose(out, ref_out, atol=5e-2, rtol=5e-2), "output mismatch"
    assert jnp.allclose(all_input, ref_all, atol=1e-4, rtol=1e-4), "all_input mismatch"

    print("KERNEL_OK")
</pallas_src>

<mosaic_0001>
module attributes {stable_mosaic.version = 11 : i64} {
  func.func @kernel(%arg0: i32, %arg1: memref<2x1x32xf32, #tpu.memory_space<vmem>>, %arg2: memref<2x8x32xf32, #tpu.memory_space<vmem>>, %arg3: memref<2x1x1xf32, #tpu.memory_space<vmem>>, %arg4: memref<2x1x8xf32, #tpu.memory_space<vmem>>, %arg5: memref<1x32xf32, #tpu.memory_space<vmem>>, %arg6: memref<1x32xf32, #tpu.memory_space<vmem>>, %arg7: memref<1x32xf32, #tpu.memory_space<vmem>>, %arg8: memref<1x32xf32, #tpu.memory_space<vmem>>, %arg9: memref<32x96xbf16, #tpu.memory_space<vmem>>, %arg10: memref<1x96xf32, #tpu.memory_space<vmem>>, %arg11: memref<32x32xbf16, #tpu.memory_space<vmem>>, %arg12: memref<1x32xf32, #tpu.memory_space<vmem>>, %arg13: memref<32x32xbf16, #tpu.memory_space<vmem>>, %arg14: memref<1x32xf32, #tpu.memory_space<vmem>>, %arg15: memref<32x64xbf16, #tpu.memory_space<vmem>>, %arg16: memref<1x64xf32, #tpu.memory_space<vmem>>, %arg17: memref<32x32xbf16, #tpu.memory_space<vmem>>, %arg18: memref<1x32xf32, #tpu.memory_space<vmem>>, %arg19: memref<1x32xf32, #tpu.memory_space<vmem>>, %arg20: memref<1x32xf32, #tpu.memory_space<vmem>>, %arg21: memref<32x64xbf16, #tpu.memory_space<vmem>>, %arg22: memref<1x64xf32, #tpu.memory_space<vmem>>, %arg23: memref<64x32xbf16, #tpu.memory_space<vmem>>, %arg24: memref<1x32xf32, #tpu.memory_space<vmem>>, %arg25: memref<2x1x32xf32, #tpu.memory_space<vmem>>, %arg26: memref<2x1x32xf32, #tpu.memory_space<vmem>>) attributes {dimension_semantics = [#tpu.dimension_semantics<parallel>], iteration_bounds = array<i64: 1>, scalar_prefetch = 0 : i64, scratch_operands = 0 : i64, tpu.core_type = #tpu.core_type<tc>, window_params = [{transform_indices = @transform_0, window_bounds = array<i64: 2, 1, 32>}, {transform_indices = @transform_1, window_bounds = array<i64: 2, 8, 32>}, {transform_indices = @transform_2, window_bounds = array<i64: 2, 1, 1>}, {transform_indices = @transform_3, window_bounds = array<i64: 2, 1, 8>}, {pipeline_mode = #tpu.pipeline_mode<synchronous>, transform_indices = @transform_4, window_bounds = array<i64: 1, 32>}, {pipeline_mode = #tpu.pipeline_mode<synchronous>, transform_indices = @transform_5, window_bounds = array<i64: 1, 32>}, {pipeline_mode = #tpu.pipeline_mode<synchronous>, transform_indices = @transform_6, window_bounds = array<i64: 1, 32>}, {pipeline_mode = #tpu.pipeline_mode<synchronous>, transform_indices = @transform_7, window_bounds = array<i64: 1, 32>}, {pipeline_mode = #tpu.pipeline_mode<synchronous>, transform_indices = @transform_8, window_bounds = array<i64: 32, 96>}, {pipeline_mode = #tpu.pipeline_mode<synchronous>, transform_indices = @transform_9, window_bounds = array<i64: 1, 96>}, {pipeline_mode = #tpu.pipeline_mode<synchronous>, transform_indices = @transform_10, window_bounds = array<i64: 32, 32>}, {pipeline_mode = #tpu.pipeline_mode<synchronous>, transform_indices = @transform_11, window_bounds = array<i64: 1, 32>}, {pipeline_mode = #tpu.pipeline_mode<synchronous>, transform_indices = @transform_12, window_bounds = array<i64: 32, 32>}, {pipeline_mode = #tpu.pipeline_mode<synchronous>, transform_indices = @transform_13, window_bounds = array<i64: 1, 32>}, {pipeline_mode = #tpu.pipeline_mode<synchronous>, transform_indices = @transform_14, window_bounds = array<i64: 32, 64>}, {pipeline_mode = #tpu.pipeline_mode<synchronous>, transform_indices = @transform_15, window_bounds = array<i64: 1, 64>}, {pipeline_mode = #tpu.pipeline_mode<synchronous>, transform_indices = @transform_16, window_bounds = array<i64: 32, 32>}, {pipeline_mode = #tpu.pipeline_mode<synchronous>, transform_indices = @transform_17, window_bounds = array<i64: 1, 32>}, {pipeline_mode = #tpu.pipeline_mode<synchronous>, transform_indices = @transform_18, window_bounds = array<i64: 1, 32>}, {pipeline_mode = #tpu.pipeline_mode<synchronous>, transform_indices = @transform_19, window_bounds = array<i64: 1, 32>}, {pipeline_mode = #tpu.pipeline_mode<synchronous>, transform_indices = @transform_20, window_bounds = array<i64: 32, 64>}, {pipeline_mode = #tpu.pipeline_mode<synchronous>, transform_indices = @transform_21, window_bounds = array<i64: 1, 64>}, {pipeline_mode = #tpu.pipeline_mode<synchronous>, transform_indices = @transform_22, window_bounds = array<i64: 64, 32>}, {pipeline_mode = #tpu.pipeline_mode<synchronous>, transform_indices = @transform_23, window_bounds = array<i64: 1, 32>}, {transform_indices = @transform_24, window_bounds = array<i64: 2, 1, 32>}, {transform_indices = @transform_25, window_bounds = array<i64: 2, 1, 32>}]} {
    %c0 = arith.constant 0 : index
    %c0_0 = arith.constant 0 : index
    %c0_1 = arith.constant 0 : index
    %0 = vector.load %arg1[%c0, %c0_0, %c0_1] : memref<2x1x32xf32, #tpu.memory_space<vmem>>, vector<2x1x32xf32>
    %1 = vector.shape_cast %0 : vector<2x1x32xf32> to vector<2x32xf32>
    %c0_2 = arith.constant 0 : index
    %c0_3 = arith.constant 0 : index
    %c0_4 = arith.constant 0 : index
    %2 = vector.load %arg2[%c0_2, %c0_3, %c0_4] : memref<2x8x32xf32, #tpu.memory_space<vmem>>, vector<2x8x32xf32>
    %3 = vector.shape_cast %2 : vector<2x8x32xf32> to vector<16x32xf32>
    %4 = tpu.iota {dimensions = array<i32: 0>} : vector<1x1xi32>
    %5 = tpu.iota {dimensions = array<i32: 1>} : vector<1x1xi32>
    %6 = arith.cmpi sgt, %5, %4 : vector<1x1xi32>
    %7 = vector.shape_cast %6 : vector<1x1xi1> to vector<1x1x1xi1>
    %c0_5 = arith.constant 0 : index
    %c0_6 = arith.constant 0 : index
    %c0_7 = arith.constant 0 : index
    %8 = vector.load %arg3[%c0_5, %c0_6, %c0_7] : memref<2x1x1xf32, #tpu.memory_space<vmem>>, vector<2x1x1xf32>
    %cst = arith.constant 0.000000e+00 : f32
    %9 = vector.broadcast %cst : f32 to vector<2x1x1xf32>
    %10 = arith.cmpf ogt, %8, %9 : vector<2x1x1xf32>
    %11 = vector.broadcast %7 : vector<1x1x1xi1> to vector<2x1x1xi1>
    %12 = arith.ori %11, %10 : vector<2x1x1xi1>
    %cst_8 = arith.constant -9.99999984E+17 : f32
    %cst_9 = arith.constant 0.000000e+00 : f32
    %13 = vector.broadcast %cst_8 : f32 to vector<2x1x1xf32>
    %14 = vector.broadcast %cst_9 : f32 to vector<2x1x1xf32>
    %15 = arith.select %12, %13, %14 : vector<2x1x1xi1>, vector<2x1x1xf32>
    %c0_10 = arith.constant 0 : index
    %c0_11 = arith.constant 0 : index
    %c0_12 = arith.constant 0 : index
    %16 = vector.load %arg4[%c0_10, %c0_11, %c0_12] : memref<2x1x8xf32, #tpu.memory_space<vmem>>, vector<2x1x8xf32>
    %cst_13 = arith.constant 0.000000e+00 : f32
    %17 = vector.broadcast %cst_13 : f32 to vector<2x1x8xf32>
    %18 = arith.cmpf ogt, %16, %17 : vector<2x1x8xf32>
    %cst_14 = arith.constant -9.99999984E+17 : f32
    %cst_15 = arith.constant 0.000000e+00 : f32
    %19 = vector.broadcast %cst_14 : f32 to vector<2x1x8xf32>
    %20 = vector.broadcast %cst_15 : f32 to vector<2x1x8xf32>
    %21 = arith.select %18, %19, %20 : vector<2x1x8xi1>, vector<2x1x8xf32>
    %c0_16 = arith.constant 0 : index
    %c0_17 = arith.constant 0 : index
    %22 = vector.load %arg5[%c0_16, %c0_17] : memref<1x32xf32, #tpu.memory_space<vmem>>, vector<1x32xf32>
    %c0_18 = arith.constant 0 : index
    %c0_19 = arith.constant 0 : index
    %23 = vector.load %arg6[%c0_18, %c0_19] : memref<1x32xf32, #tpu.memory_space<vmem>>, vector<1x32xf32>
    %cst_20 = arith.constant dense<0.000000e+00> : vector<2xf32>
    %24 = vector.multi_reduction <add>, %1, %cst_20 [1] : vector<2x32xf32> to vector<2xf32>
    %25 = vector.shape_cast %24 : vector<2xf32> to vector<2x1xf32>
    %cst_21 = arith.constant 3.200000e+01 : f32
    %26 = vector.broadcast %cst_21 : f32 to vector<2x1xf32>
    %27 = arith.divf %25, %26 : vector<2x1xf32>
    %28 = vector.broadcast %27 : vector<2x1xf32> to vector<2x32xf32>
    %29 = arith.subf %1, %28 : vector<2x32xf32>
    %30 = arith.mulf %29, %29 : vector<2x32xf32>
    %cst_22 = arith.constant dense<0.000000e+00> : vector<2xf32>
    %31 = vector.multi_reduction <add>, %30, %cst_22 [1] : vector<2x32xf32> to vector<2xf32>
    %32 = vector.shape_cast %31 : vector<2xf32> to vector<2x1xf32>
    %cst_23 = arith.constant 3.200000e+01 : f32
    %33 = vector.broadcast %cst_23 : f32 to vector<2x1xf32>
    %34 = arith.divf %32, %33 : vector<2x1xf32>
    %35 = vector.broadcast %27 : vector<2x1xf32> to vector<2x32xf32>
    %36 = arith.subf %1, %35 : vector<2x32xf32>
    %cst_24 = arith.constant 9.99999997E-7 : f32
    %37 = vector.broadcast %cst_24 : f32 to vector<2x1xf32>
    %38 = arith.addf %34, %37 : vector<2x1xf32>
    %39 = math.rsqrt %38 : vector<2x1xf32>
    %40 = vector.broadcast %39 : vector<2x1xf32> to vector<2x32xf32>
    %41 = arith.mulf %36, %40 : vector<2x32xf32>
    %42 = vector.broadcast %22 : vector<1x32xf32> to vector<2x32xf32>
    %43 = arith.mulf %41, %42 : vector<2x32xf32>
    %44 = vector.broadcast %23 : vector<1x32xf32> to vector<2x32xf32>
    %45 = arith.addf %43, %44 : vector<2x32xf32>
    %46 = arith.truncf %45 : vector<2x32xf32> to vector<2x32xbf16>
    %c0_25 = arith.constant 0 : index
    %c0_26 = arith.constant 0 : index
    %47 = vector.load %arg9[%c0_25, %c0_26] : memref<32x96xbf16, #tpu.memory_space<vmem>>, vector<32x96xbf16>
    %cst_27 = arith.constant dense<0.000000e+00> : vector<2x96xf32>
    %48 = tpu.matmul %46, %47, %cst_27 {dimension_numbers = #tpu.dot_dimension_numbers<[1], [0], [0], [1], [0, 0, 1, 1], [], []>} : vector<2x32xbf16>, vector<32x96xbf16>, vector<2x96xf32> -> vector<2x96xf32>
    %c0_28 = arith.constant 0 : index
    %c0_29 = arith.constant 0 : index
    %49 = vector.load %arg10[%c0_28, %c0_29] : memref<1x96xf32, #tpu.memory_space<vmem>>, vector<1x96xf32>
    %50 = vector.broadcast %49 : vector<1x96xf32> to vector<2x96xf32>
    %51 = arith.addf %48, %50 : vector<2x96xf32>
    %52 = vector.extract_strided_slice %51 {offsets = [0, 0], sizes = [2, 32], strides = [1, 1]} : vector<2x96xf32> to vector<2x32xf32>
    %53 = vector.extract_strided_slice %51 {offsets = [0, 32], sizes = [2, 32], strides = [1, 1]} : vector<2x96xf32> to vector<2x32xf32>
    %54 = vector.extract_strided_slice %51 {offsets = [0, 64], sizes = [2, 32], strides = [1, 1]} : vector<2x96xf32> to vector<2x32xf32>
    %55 = vector.shape_cast %52 : vector<2x32xf32> to vector<2x1x32xf32>
    %56 = vector.extract_strided_slice %55 {offsets = [0, 0, 0], sizes = [2, 1, 8], strides = [1, 1, 1]} : vector<2x1x32xf32> to vector<2x1x8xf32>
    %57 = vector.extract_strided_slice %55 {offsets = [0, 0, 8], sizes = [2, 1, 8], strides = [1, 1, 1]} : vector<2x1x32xf32> to vector<2x1x8xf32>
    %58 = vector.extract_strided_slice %55 {offsets = [0, 0, 16], sizes = [2, 1, 8], strides = [1, 1, 1]} : vector<2x1x32xf32> to vector<2x1x8xf32>
    %59 = vector.extract_strided_slice %55 {offsets = [0, 0, 24], sizes = [2, 1, 8], strides = [1, 1, 1]} : vector<2x1x32xf32> to vector<2x1x8xf32>
    %60 = tpu.concatenate %56, %57, %58, %59 in 0 : vector<2x1x8xf32>, vector<2x1x8xf32>, vector<2x1x8xf32>, vector<2x1x8xf32> -> vector<8x1x8xf32>
    %61 = arith.truncf %60 : vector<8x1x8xf32> to vector<8x1x8xbf16>
    %62 = vector.shape_cast %53 : vector<2x32xf32> to vector<2x1x32xf32>
    %63 = vector.extract_strided_slice %62 {offsets = [0, 0, 0], sizes = [2, 1, 8], strides = [1, 1, 1]} : vector<2x1x32xf32> to vector<2x1x8xf32>
    %64 = vector.extract_strided_slice %62 {offsets = [0, 0, 8], sizes = [2, 1, 8], strides = [1, 1, 1]} : vector<2x1x32xf32> to vector<2x1x8xf32>
    %65 = vector.extract_strided_slice %62 {offsets = [0, 0, 16], sizes = [2, 1, 8], strides = [1, 1, 1]} : vector<2x1x32xf32> to vector<2x1x8xf32>
    %66 = vector.extract_strided_slice %62 {offsets = [0, 0, 24], sizes = [2, 1, 8], strides = [1, 1, 1]} : vector<2x1x32xf32> to vector<2x1x8xf32>
    %67 = tpu.concatenate %63, %64, %65, %66 in 0 : vector<2x1x8xf32>, vector<2x1x8xf32>, vector<2x1x8xf32>, vector<2x1x8xf32> -> vector<8x1x8xf32>
    %68 = arith.truncf %67 : vector<8x1x8xf32> to vector<8x1x8xbf16>
    %69 = vector.shape_cast %54 : vector<2x32xf32> to vector<2x1x32xf32>
    %70 = vector.extract_strided_slice %69 {offsets = [0, 0, 0], sizes = [2, 1, 8], strides = [1, 1, 1]} : vector<2x1x32xf32> to vector<2x1x8xf32>
    %71 = vector.extract_strided_slice %69 {offsets = [0, 0, 8], sizes = [2, 1, 8], strides = [1, 1, 1]} : vector<2x1x32xf32> to vector<2x1x8xf32>
    %72 = vector.extract_strided_slice %69 {offsets = [0, 0, 16], sizes = [2, 1, 8], strides = [1, 1, 1]} : vector<2x1x32xf32> to vector<2x1x8xf32>
    %73 = vector.extract_strided_slice %69 {offsets = [0, 0, 24], sizes = [2, 1, 8], strides = [1, 1, 1]} : vector<2x1x32xf32> to vector<2x1x8xf32>
    %74 = tpu.concatenate %70, %71, %72, %73 in 0 : vector<2x1x8xf32>, vector<2x1x8xf32>, vector<2x1x8xf32>, vector<2x1x8xf32> -> vector<8x1x8xf32>
    %75 = arith.truncf %74 : vector<8x1x8xf32> to vector<8x1x8xbf16>
    "tpu.trace_start"() <{level = 10 : i32, message = "nqd,nkd->nqk"}> : () -> ()
    %cst_30 = arith.constant dense<0.000000e+00> : vector<8x1x1xf32>
    %76 = tpu.matmul %61, %68, %cst_30 {dimension_numbers = #tpu.dot_dimension_numbers<[2], [2], [1], [1], [0, 0, 0, 1, 1, 1], [0], [0]>} : vector<8x1x8xbf16>, vector<8x1x8xbf16>, vector<8x1x1xf32> -> vector<8x1x1xf32>
    "tpu.trace_stop"() : () -> ()
    %77 = vector.shape_cast %76 : vector<8x1x1xf32> to vector<4x2x1x1xf32>
    %78 = vector.shape_cast %15 : vector<2x1x1xf32> to vector<1x2x1x1xf32>
    %79 = vector.broadcast %78 : vector<1x2x1x1xf32> to vector<4x2x1x1xf32>
    %80 = arith.addf %77, %79 : vector<4x2x1x1xf32>
    %81 = vector.shape_cast %80 : vector<4x2x1x1xf32> to vector<8x1x1xf32>
    %cst_31 = arith.constant dense<0xFF800000> : vector<8x1xf32>
    %82 = vector.multi_reduction <maximumf>, %81, %cst_31 [2] : vector<8x1x1xf32> to vector<8x1xf32>
    %83 = vector.shape_cast %82 : vector<8x1xf32> to vector<8x1x1xf32>
    %84 = arith.subf %81, %83 : vector<8x1x1xf32>
    %85 = math.exp %84 : vector<8x1x1xf32>
    %cst_32 = arith.constant dense<0.000000e+00> : vector<8x1xf32>
    %86 = vector.multi_reduction <add>, %85, %cst_32 [2] : vector<8x1x1xf32> to vector<8x1xf32>
    %87 = vector.shape_cast %86 : vector<8x1xf32> to vector<8x1x1xf32>
    %88 = arith.truncf %85 : vector<8x1x1xf32> to vector<8x1x1xbf16>
    "tpu.trace_start"() <{level = 10 : i32, message = "nqk,nkd->nqd"}> : () -> ()
    %cst_33 = arith.constant dense<0.000000e+00> : vector<8x1x8xf32>
    %89 = tpu.matmul %88, %75, %cst_33 {dimension_numbers = #tpu.dot_dimension_numbers<[2], [1], [1], [2], [0, 0, 0, 1, 1, 2], [0], [0]>} : vector<8x1x1xbf16>, vector<8x1x8xbf16>, vector<8x1x8xf32> -> vector<8x1x8xf32>
    "tpu.trace_stop"() : () -> ()
    %90 = tpu.reciprocal %87 {approx = true} : vector<8x1x1xf32> -> vector<8x1x1xf32>
    %91 = vector.broadcast %90 : vector<8x1x1xf32> to vector<8x1x8xf32>
    %92 = arith.mulf %89, %91 : vector<8x1x8xf32>
    %93 = vector.extract_strided_slice %92 {offsets = [0, 0, 0], sizes = [2, 1, 8], strides = [1, 1, 1]} : vector<8x1x8xf32> to vector<2x1x8xf32>
    %94 = vector.extract_strided_slice %92 {offsets = [2, 0, 0], sizes = [2, 1, 8], strides = [1, 1, 1]} : vector<8x1x8xf32> to vector<2x1x8xf32>
    %95 = vector.extract_strided_slice %92 {offsets = [4, 0, 0], sizes = [2, 1, 8], strides = [1, 1, 1]} : vector<8x1x8xf32> to vector<2x1x8xf32>
    %96 = vector.extract_strided_slice %92 {offsets = [6, 0, 0], sizes = [2, 1, 8], strides = [1, 1, 1]} : vector<8x1x8xf32> to vector<2x1x8xf32>
    %97 = tpu.concatenate %93, %94, %95, %96 in 2 : vector<2x1x8xf32>, vector<2x1x8xf32>, vector<2x1x8xf32>, vector<2x1x8xf32> -> vector<2x1x32xf32>
    %98 = vector.shape_cast %97 : vector<2x1x32xf32> to vector<2x32xf32>
    %99 = arith.truncf %98 : vector<2x32xf32> to vector<2x32xbf16>
    %c0_34 = arith.constant 0 : index
    %c0_35 = arith.constant 0 : index
    %100 = vector.load %arg11[%c0_34, %c0_35] : memref<32x32xbf16, #tpu.memory_space<vmem>>, vector<32x32xbf16>
    %cst_36 = arith.constant dense<0.000000e+00> : vector<2x32xf32>
    %101 = tpu.matmul %99, %100, %cst_36 {dimension_numbers = #tpu.dot_dimension_numbers<[1], [0], [0], [1], [0, 0, 1, 1], [], []>} : vector<2x32xbf16>, vector<32x32xbf16>, vector<2x32xf32> -> vector<2x32xf32>
    %c0_37 = arith.constant 0 : index
    %c0_38 = arith.constant 0 : index
    %102 = vector.load %arg12[%c0_37, %c0_38] : memref<1x32xf32, #tpu.memory_space<vmem>>, vector<1x32xf32>
    %103 = vector.broadcast %102 : vector<1x32xf32> to vector<2x32xf32>
    %104 = arith.addf %101, %103 : vector<2x32xf32>
    %105 = arith.addf %104, %1 : vector<2x32xf32>
    %c0_39 = arith.constant 0 : index
    %c0_40 = arith.constant 0 : index
    %106 = vector.load %arg7[%c0_39, %c0_40] : memref<1x32xf32, #tpu.memory_space<vmem>>, vector<1x32xf32>
    %c0_41 = arith.constant 0 : index
    %c0_42 = arith.constant 0 : index
    %107 = vector.load %arg8[%c0_41, %c0_42] : memref<1x32xf32, #tpu.memory_space<vmem>>, vector<1x32xf32>
    %cst_43 = arith.constant dense<0.000000e+00> : vector<2xf32>
    %108 = vector.multi_reduction <add>, %105, %cst_43 [1] : vector<2x32xf32> to vector<2xf32>
    %109 = vector.shape_cast %108 : vector<2xf32> to vector<2x1xf32>
    %cst_44 = arith.constant 3.200000e+01 : f32
    %110 = vector.broadcast %cst_44 : f32 to vector<2x1xf32>
    %111 = arith.divf %109, %110 : vector<2x1xf32>
    %112 = vector.broadcast %111 : vector<2x1xf32> to vector<2x32xf32>
    %113 = arith.subf %105, %112 : vector<2x32xf32>
    %114 = arith.mulf %113, %113 : vector<2x32xf32>
    %cst_45 = arith.constant dense<0.000000e+00> : vector<2xf32>
    %115 = vector.multi_reduction <add>, %114, %cst_45 [1] : vector<2x32xf32> to vector<2xf32>
    %116 = vector.shape_cast %115 : vector<2xf32> to vector<2x1xf32>
    %cst_46 = arith.constant 3.200000e+01 : f32
    %117 = vector.broadcast %cst_46 : f32 to vector<2x1xf32>
    %118 = arith.divf %116, %117 : vector<2x1xf32>
    %119 = vector.broadcast %111 : vector<2x1xf32> to vector<2x32xf32>
    %120 = arith.subf %105, %119 : vector<2x32xf32>
    %cst_47 = arith.constant 9.99999997E-7 : f32
    %121 = vector.broadcast %cst_47 : f32 to vector<2x1xf32>
    %122 = arith.addf %118, %121 : vector<2x1xf32>
    %123 = math.rsqrt %122 : vector<2x1xf32>
    %124 = vector.broadcast %123 : vector<2x1xf32> to vector<2x32xf32>
    %125 = arith.mulf %120, %124 : vector<2x32xf32>
    %126 = vector.broadcast %106 : vector<1x32xf32> to vector<2x32xf32>
    %127 = arith.mulf %125, %126 : vector<2x32xf32>
    %128 = vector.broadcast %107 : vector<1x32xf32> to vector<2x32xf32>
    %129 = arith.addf %127, %128 : vector<2x32xf32>
    %130 = arith.truncf %129 : vector<2x32xf32> to vector<2x32xbf16>
    %c0_48 = arith.constant 0 : index
    %c0_49 = arith.constant 0 : index
    %131 = vector.load %arg13[%c0_48, %c0_49] : memref<32x32xbf16, #tpu.memory_space<vmem>>, vector<32x32xbf16>
    %cst_50 = arith.constant dense<0.000000e+00> : vector<2x32xf32>
    %132 = tpu.matmul %130, %131, %cst_50 {dimension_numbers = #tpu.dot_dimension_numbers<[1], [0], [0], [1], [0, 0, 1, 1], [], []>} : vector<2x32xbf16>, vector<32x32xbf16>, vector<2x32xf32> -> vector<2x32xf32>
    %c0_51 = arith.constant 0 : index
    %c0_52 = arith.constant 0 : index
    %133 = vector.load %arg14[%c0_51, %c0_52] : memref<1x32xf32, #tpu.memory_space<vmem>>, vector<1x32xf32>
    %134 = vector.broadcast %133 : vector<1x32xf32> to vector<2x32xf32>
    %135 = arith.addf %132, %134 : vector<2x32xf32>
    %136 = arith.truncf %3 : vector<16x32xf32> to vector<16x32xbf16>
    %c0_53 = arith.constant 0 : index
    %c0_54 = arith.constant 0 : index
    %137 = vector.load %arg15[%c0_53, %c0_54] : memref<32x64xbf16, #tpu.memory_space<vmem>>, vector<32x64xbf16>
    %cst_55 = arith.constant dense<0.000000e+00> : vector<16x64xf32>
    %138 = tpu.matmul %136, %137, %cst_55 {dimension_numbers = #tpu.dot_dimension_numbers<[1], [0], [0], [1], [0, 0, 1, 1], [], []>} : vector<16x32xbf16>, vector<32x64xbf16>, vector<16x64xf32> -> vector<16x64xf32>
    %c0_56 = arith.constant 0 : index
    %c0_57 = arith.constant 0 : index
    %139 = vector.load %arg16[%c0_56, %c0_57] : memref<1x64xf32, #tpu.memory_space<vmem>>, vector<1x64xf32>
    %140 = vector.broadcast %139 : vector<1x64xf32> to vector<16x64xf32>
    %141 = arith.addf %138, %140 : vector<16x64xf32>
    %142 = vector.extract_strided_slice %141 {offsets = [0, 0], sizes = [16, 32], strides = [1, 1]} : vector<16x64xf32> to vector<16x32xf32>
    %143 = vector.extract_strided_slice %141 {offsets = [0, 32], sizes = [16, 32], strides = [1, 1]} : vector<16x64xf32> to vector<16x32xf32>
    %144 = vector.shape_cast %135 : vector<2x32xf32> to vector<2x1x32xf32>
    %145 = vector.extract_strided_slice %144 {offsets = [0, 0, 0], sizes = [2, 1, 8], strides = [1, 1, 1]} : vector<2x1x32xf32> to vector<2x1x8xf32>
    %146 = vector.extract_strided_slice %144 {offsets = [0, 0, 8], sizes = [2, 1, 8], strides = [1, 1, 1]} : vector<2x1x32xf32> to vector<2x1x8xf32>
    %147 = vector.extract_strided_slice %144 {offsets = [0, 0, 16], sizes = [2, 1, 8], strides = [1, 1, 1]} : vector<2x1x32xf32> to vector<2x1x8xf32>
    %148 = vector.extract_strided_slice %144 {offsets = [0, 0, 24], sizes = [2, 1, 8], strides = [1, 1, 1]} : vector<2x1x32xf32> to vector<2x1x8xf32>
    %149 = tpu.concatenate %145, %146, %147, %148 in 0 : vector<2x1x8xf32>, vector<2x1x8xf32>, vector<2x1x8xf32>, vector<2x1x8xf32> -> vector<8x1x8xf32>
    %150 = arith.truncf %149 : vector<8x1x8xf32> to vector<8x1x8xbf16>
    %151 = vector.shape_cast %142 : vector<16x32xf32> to vector<2x8x32xf32>
    %152 = vector.extract_strided_slice %151 {offsets = [0, 0, 0], sizes = [2, 8, 8], strides = [1, 1, 1]} : vector<2x8x32xf32> to vector<2x8x8xf32>
    %153 = vector.extract_strided_slice %151 {offsets = [0, 0, 8], sizes = [2, 8, 8], strides = [1, 1, 1]} : vector<2x8x32xf32> to vector<2x8x8xf32>
    %154 = vector.extract_strided_slice %151 {offsets = [0, 0, 16], sizes = [2, 8, 8], strides = [1, 1, 1]} : vector<2x8x32xf32> to vector<2x8x8xf32>
    %155 = vector.extract_strided_slice %151 {offsets = [0, 0, 24], sizes = [2, 8, 8], strides = [1, 1, 1]} : vector<2x8x32xf32> to vector<2x8x8xf32>
    %156 = tpu.concatenate %152, %153, %154, %155 in 0 : vector<2x8x8xf32>, vector<2x8x8xf32>, vector<2x8x8xf32>, vector<2x8x8xf32> -> vector<8x8x8xf32>
    %157 = arith.truncf %156 : vector<8x8x8xf32> to vector<8x8x8xbf16>
    %158 = vector.shape_cast %143 : vector<16x32xf32> to vector<2x8x32xf32>
    %159 = vector.extract_strided_slice %158 {offsets = [0, 0, 0], sizes = [2, 8, 8], strides = [1, 1, 1]} : vector<2x8x32xf32> to vector<2x8x8xf32>
    %160 = vector.extract_strided_slice %158 {offsets = [0, 0, 8], sizes = [2, 8, 8], strides = [1, 1, 1]} : vector<2x8x32xf32> to vector<2x8x8xf32>
    %161 = vector.extract_strided_slice %158 {offsets = [0, 0, 16], sizes = [2, 8, 8], strides = [1, 1, 1]} : vector<2x8x32xf32> to vector<2x8x8xf32>
    %162 = vector.extract_strided_slice %158 {offsets = [0, 0, 24], sizes = [2, 8, 8], strides = [1, 1, 1]} : vector<2x8x32xf32> to vector<2x8x8xf32>
    %163 = tpu.concatenate %159, %160, %161, %162 in 0 : vector<2x8x8xf32>, vector<2x8x8xf32>, vector<2x8x8xf32>, vector<2x8x8xf32> -> vector<8x8x8xf32>
    %164 = arith.truncf %163 : vector<8x8x8xf32> to vector<8x8x8xbf16>
    "tpu.trace_start"() <{level = 10 : i32, message = "nqd,nkd->nqk"}> : () -> ()
    %cst_58 = arith.constant dense<0.000000e+00> : vector<8x1x8xf32>
    %165 = tpu.matmul %150, %157, %cst_58 {dimension_numbers = #tpu.dot_dimension_numbers<[2], [2], [1], [1], [0, 0, 0, 1, 1, 1], [0], [0]>} : vector<8x1x8xbf16>, vector<8x8x8xbf16>, vector<8x1x8xf32> -> vector<8x1x8xf32>
    "tpu.trace_stop"() : () -> ()
    %166 = vector.shape_cast %165 : vector<8x1x8xf32> to vector<4x2x1x8xf32>
    %167 = vector.shape_cast %21 : vector<2x1x8xf32> to vector<1x2x1x8xf32>
    %168 = vector.broadcast %167 : vector<1x2x1x8xf32> to vector<4x2x1x8xf32>
    %169 = arith.addf %166, %168 : vector<4x2x1x8xf32>
    %170 = vector.shape_cast %169 : vector<4x2x1x8xf32> to vector<8x1x8xf32>
    %cst_59 = arith.constant dense<0xFF800000> : vector<8x1xf32>
    %171 = vector.multi_reduction <maximumf>, %170, %cst_59 [2] : vector<8x1x8xf32> to vector<8x1xf32>
    %172 = vector.shape_cast %171 : vector<8x1xf32> to vector<8x1x1xf32>
    %173 = vector.broadcast %172 : vector<8x1x1xf32> to vector<8x1x8xf32>
    %174 = arith.subf %170, %173 : vector<8x1x8xf32>
    %175 = math.exp %174 : vector<8x1x8xf32>
    %cst_60 = arith.constant dense<0.000000e+00> : vector<8x1xf32>
    %176 = vector.multi_reduction <add>, %175, %cst_60 [2] : vector<8x1x8xf32> to vector<8x1xf32>
    %177 = vector.shape_cast %176 : vector<8x1xf32> to vector<8x1x1xf32>
    %178 = arith.truncf %175 : vector<8x1x8xf32> to vector<8x1x8xbf16>
    "tpu.trace_start"() <{level = 10 : i32, message = "nqk,nkd->nqd"}> : () -> ()
    %cst_61 = arith.constant dense<0.000000e+00> : vector<8x1x8xf32>
    %179 = tpu.matmul %178, %164, %cst_61 {dimension_numbers = #tpu.dot_dimension_numbers<[2], [1], [1], [2], [0, 0, 0, 1, 1, 2], [0], [0]>} : vector<8x1x8xbf16>, vector<8x8x8xbf16>, vector<8x1x8xf32> -> vector<8x1x8xf32>
    "tpu.trace_stop"() : () -> ()
    %180 = tpu.reciprocal %177 {approx = true} : vector<8x1x1xf32> -> vector<8x1x1xf32>
    %181 = vector.broadcast %180 : vector<8x1x1xf32> to vector<8x1x8xf32>
    %182 = arith.mulf %179, %181 : vector<8x1x8xf32>
    %183 = vector.extract_strided_slice %182 {offsets = [0, 0, 0], sizes = [2, 1, 8], strides = [1, 1, 1]} : vector<8x1x8xf32> to vector<2x1x8xf32>
    %184 = vector.extract_strided_slice %182 {offsets = [2, 0, 0], sizes = [2, 1, 8], strides = [1, 1, 1]} : vector<8x1x8xf32> to vector<2x1x8xf32>
    %185 = vector.extract_strided_slice %182 {offsets = [4, 0, 0], sizes = [2, 1, 8], strides = [1, 1, 1]} : vector<8x1x8xf32> to vector<2x1x8xf32>
    %186 = vector.extract_strided_slice %182 {offsets = [6, 0, 0], sizes = [2, 1, 8], strides = [1, 1, 1]} : vector<8x1x8xf32> to vector<2x1x8xf32>
    %187 = tpu.concatenate %183, %184, %185, %186 in 2 : vector<2x1x8xf32>, vector<2x1x8xf32>, vector<2x1x8xf32>, vector<2x1x8xf32> -> vector<2x1x32xf32>
    %188 = vector.shape_cast %187 : vector<2x1x32xf32> to vector<2x32xf32>
    %189 = arith.truncf %188 : vector<2x32xf32> to vector<2x32xbf16>
    %c0_62 = arith.constant 0 : index
    %c0_63 = arith.constant 0 : index
    %190 = vector.load %arg17[%c0_62, %c0_63] : memref<32x32xbf16, #tpu.memory_space<vmem>>, vector<32x32xbf16>
    %cst_64 = arith.constant dense<0.000000e+00> : vector<2x32xf32>
    %191 = tpu.matmul %189, %190, %cst_64 {dimension_numbers = #tpu.dot_dimension_numbers<[1], [0], [0], [1], [0, 0, 1, 1], [], []>} : vector<2x32xbf16>, vector<32x32xbf16>, vector<2x32xf32> -> vector<2x32xf32>
    %c0_65 = arith.constant 0 : index
    %c0_66 = arith.constant 0 : index
    %192 = vector.load %arg18[%c0_65, %c0_66] : memref<1x32xf32, #tpu.memory_space<vmem>>, vector<1x32xf32>
    %193 = vector.broadcast %192 : vector<1x32xf32> to vector<2x32xf32>
    %194 = arith.addf %191, %193 : vector<2x32xf32>
    %195 = arith.addf %194, %105 : vector<2x32xf32>
    %c0_67 = arith.constant 0 : index
    %c0_68 = arith.constant 0 : index
    %196 = vector.load %arg19[%c0_67, %c0_68] : memref<1x32xf32, #tpu.memory_space<vmem>>, vector<1x32xf32>
    %c0_69 = arith.constant 0 : index
    %c0_70 = arith.constant 0 : index
    %197 = vector.load %arg20[%c0_69, %c0_70] : memref<1x32xf32, #tpu.memory_space<vmem>>, vector<1x32xf32>
    %cst_71 = arith.constant dense<0.000000e+00> : vector<2xf32>
    %198 = vector.multi_reduction <add>, %195, %cst_71 [1] : vector<2x32xf32> to vector<2xf32>
    %199 = vector.shape_cast %198 : vector<2xf32> to vector<2x1xf32>
    %cst_72 = arith.constant 3.200000e+01 : f32
    %200 = vector.broadcast %cst_72 : f32 to vector<2x1xf32>
    %201 = arith.divf %199, %200 : vector<2x1xf32>
    %202 = vector.broadcast %201 : vector<2x1xf32> to vector<2x32xf32>
    %203 = arith.subf %195, %202 : vector<2x32xf32>
    %204 = arith.mulf %203, %203 : vector<2x32xf32>
    %cst_73 = arith.constant dense<0.000000e+00> : vector<2xf32>
    %205 = vector.multi_reduction <add>, %204, %cst_73 [1] : vector<2x32xf32> to vector<2xf32>
    %206 = vector.shape_cast %205 : vector<2xf32> to vector<2x1xf32>
    %cst_74 = arith.constant 3.200000e+01 : f32
    %207 = vector.broadcast %cst_74 : f32 to vector<2x1xf32>
    %208 = arith.divf %206, %207 : vector<2x1xf32>
    %209 = vector.broadcast %201 : vector<2x1xf32> to vector<2x32xf32>
    %210 = arith.subf %195, %209 : vector<2x32xf32>
    %cst_75 = arith.constant 9.99999997E-7 : f32
    %211 = vector.broadcast %cst_75 : f32 to vector<2x1xf32>
    %212 = arith.addf %208, %211 : vector<2x1xf32>
    %213 = math.rsqrt %212 : vector<2x1xf32>
    %214 = vector.broadcast %213 : vector<2x1xf32> to vector<2x32xf32>
    %215 = arith.mulf %210, %214 : vector<2x32xf32>
    %216 = vector.broadcast %196 : vector<1x32xf32> to vector<2x32xf32>
    %217 = arith.mulf %215, %216 : vector<2x32xf32>
    %218 = vector.broadcast %197 : vector<1x32xf32> to vector<2x32xf32>
    %219 = arith.addf %217, %218 : vector<2x32xf32>
    %220 = arith.truncf %219 : vector<2x32xf32> to vector<2x32xbf16>
    %c0_76 = arith.constant 0 : index
    %c0_77 = arith.constant 0 : index
    %221 = vector.load %arg21[%c0_76, %c0_77] : memref<32x64xbf16, #tpu.memory_space<vmem>>, vector<32x64xbf16>
    %cst_78 = arith.constant dense<0.000000e+00> : vector<2x64xf32>
    %222 = tpu.matmul %220, %221, %cst_78 {dimension_numbers = #tpu.dot_dimension_numbers<[1], [0], [0], [1], [0, 0, 1, 1], [], []>} : vector<2x32xbf16>, vector<32x64xbf16>, vector<2x64xf32> -> vector<2x64xf32>
    %c0_79 = arith.constant 0 : index
    %c0_80 = arith.constant 0 : index
    %223 = vector.load %arg22[%c0_79, %c0_80] : memref<1x64xf32, #tpu.memory_space<vmem>>, vector<1x64xf32>
    %224 = vector.broadcast %223 : vector<1x64xf32> to vector<2x64xf32>
    %225 = arith.addf %222, %224 : vector<2x64xf32>
    %cst_81 = arith.constant 0.000000e+00 : f32
    %226 = vector.broadcast %cst_81 : f32 to vector<2x64xf32>
    %227 = arith.maximumf %225, %226 : vector<2x64xf32>
    %228 = arith.truncf %227 : vector<2x64xf32> to vector<2x64xbf16>
    %c0_82 = arith.constant 0 : index
    %c0_83 = arith.constant 0 : index
    %229 = vector.load %arg23[%c0_82, %c0_83] : memref<64x32xbf16, #tpu.memory_space<vmem>>, vector<64x32xbf16>
    %cst_84 = arith.constant dense<0.000000e+00> : vector<2x32xf32>
    %230 = tpu.matmul %228, %229, %cst_84 {dimension_numbers = #tpu.dot_dimension_numbers<[1], [0], [0], [1], [0, 0, 1, 1], [], []>} : vector<2x64xbf16>, vector<64x32xbf16>, vector<2x32xf32> -> vector<2x32xf32>
    %c0_85 = arith.constant 0 : index
    %c0_86 = arith.constant 0 : index
    %231 = vector.load %arg24[%c0_85, %c0_86] : memref<1x32xf32, #tpu.memory_space<vmem>>, vector<1x32xf32>
    %232 = vector.broadcast %231 : vector<1x32xf32> to vector<2x32xf32>
    %233 = arith.addf %230, %232 : vector<2x32xf32>
    %234 = arith.addf %233, %195 : vector<2x32xf32>
    %235 = vector.shape_cast %234 : vector<2x32xf32> to vector<2x1x32xf32>
    %c0_87 = arith.constant 0 : index
    %c0_88 = arith.constant 0 : index
    %c0_89 = arith.constant 0 : index
    %236 = vector.load %arg25[%c0_87, %c0_88, %c0_89] : memref<2x1x32xf32, #tpu.memory_space<vmem>>, vector<2x1x32xf32>
    tpu.vector_store %arg25[%c0_87, %c0_88, %c0_89], %235 {strides = array<i32>} : memref<2x1x32xf32, #tpu.memory_space<vmem>>, vector<2x1x32xf32>,
    %237 = vector.shape_cast %45 : vector<2x32xf32> to vector<2x1x32xf32>
    %c0_90 = arith.constant 0 : index
    %c0_91 = arith.constant 0 : index
    %c0_92 = arith.constant 0 : index
    %238 = vector.load %arg26[%c0_90, %c0_91, %c0_92] : memref<2x1x32xf32, #tpu.memory_space<vmem>>, vector<2x1x32xf32>
    tpu.vector_store %arg26[%c0_90, %c0_91, %c0_92], %237 {strides = array<i32>} : memref<2x1x32xf32, #tpu.memory_space<vmem>>, vector<2x1x32xf32>,
    return
  }
  func.func @transform_0(%arg0: i32) -> (i32, i32, i32) {
    %c0_i32 = arith.constant 0 : i32
    %c0_i32_0 = arith.constant 0 : i32
    %c0_i32_1 = arith.constant 0 : i32
    return %arg0, %c0_i32, %c0_i32_0 : i32, i32, i32
  }
  func.func @transform_1(%arg0: i32) -> (i32, i32, i32) {
    %c0_i32 = arith.constant 0 : i32
    %c0_i32_0 = arith.constant 0 : i32
    %c0_i32_1 = arith.constant 0 : i32
    return %arg0, %c0_i32, %c0_i32_0 : i32, i32, i32
  }
  func.func @transform_2(%arg0: i32) -> (i32, i32, i32) {
    %c0_i32 = arith.constant 0 : i32
    %c0_i32_0 = arith.constant 0 : i32
    %c0_i32_1 = arith.constant 0 : i32
    return %arg0, %c0_i32, %c0_i32_0 : i32, i32, i32
  }
  func.func @transform_3(%arg0: i32) -> (i32, i32, i32) {
    %c0_i32 = arith.constant 0 : i32
    %c0_i32_0 = arith.constant 0 : i32
    %c0_i32_1 = arith.constant 0 : i32
    return %arg0, %c0_i32, %c0_i32_0 : i32, i32, i32
  }
  func.func @transform_4(%arg0: i32) -> (i32, i32) {
    %c0_i32 = arith.constant 0 : i32
    %c0_i32_0 = arith.constant 0 : i32
    %c0_i32_1 = arith.constant 0 : i32
    return %c0_i32, %c0_i32_0 : i32, i32
  }
  func.func @transform_5(%arg0: i32) -> (i32, i32) {
    %c0_i32 = arith.constant 0 : i32
    %c0_i32_0 = arith.constant 0 : i32
    %c0_i32_1 = arith.constant 0 : i32
    return %c0_i32, %c0_i32_0 : i32, i32
  }
  func.func @transform_6(%arg0: i32) -> (i32, i32) {
    %c0_i32 = arith.constant 0 : i32
    %c0_i32_0 = arith.constant 0 : i32
    %c0_i32_1 = arith.constant 0 : i32
    return %c0_i32, %c0_i32_0 : i32, i32
  }
  func.func @transform_7(%arg0: i32) -> (i32, i32) {
    %c0_i32 = arith.constant 0 : i32
    %c0_i32_0 = arith.constant 0 : i32
    %c0_i32_1 = arith.constant 0 : i32
    return %c0_i32, %c0_i32_0 : i32, i32
  }
  func.func @transform_8(%arg0: i32) -> (i32, i32) {
    %c0_i32 = arith.constant 0 : i32
    %c0_i32_0 = arith.constant 0 : i32
    %c0_i32_1 = arith.constant 0 : i32
    return %c0_i32, %c0_i32_0 : i32, i32
  }
  func.func @transform_9(%arg0: i32) -> (i32, i32) {
    %c0_i32 = arith.constant 0 : i32
    %c0_i32_0 = arith.constant 0 : i32
    %c0_i32_1 = arith.constant 0 : i32
    return %c0_i32, %c0_i32_0 : i32, i32
  }
  func.func @transform_10(%arg0: i32) -> (i32, i32) {
    %c0_i32 = arith.constant 0 : i32
    %c0_i32_0 = arith.constant 0 : i32
    %c0_i32_1 = arith.constant 0 : i32
    return %c0_i32, %c0_i32_0 : i32, i32
  }
  func.func @transform_11(%arg0: i32) -> (i32, i32) {
    %c0_i32 = arith.constant 0 : i32
    %c0_i32_0 = arith.constant 0 : i32
    %c0_i32_1 = arith.constant 0 : i32
    return %c0_i32, %c0_i32_0 : i32, i32
  }
  func.func @transform_12(%arg0: i32) -> (i32, i32) {
    %c0_i32 = arith.constant 0 : i32
    %c0_i32_0 = arith.constant 0 : i32
    %c0_i32_1 = arith.constant 0 : i32
    return %c0_i32, %c0_i32_0 : i32, i32
  }
  func.func @transform_13(%arg0: i32) -> (i32, i32) {
    %c0_i32 = arith.constant 0 : i32
    %c0_i32_0 = arith.constant 0 : i32
    %c0_i32_1 = arith.constant 0 : i32
    return %c0_i32, %c0_i32_0 : i32, i32
  }
  func.func @transform_14(%arg0: i32) -> (i32, i32) {
    %c0_i32 = arith.constant 0 : i32
    %c0_i32_0 = arith.constant 0 : i32
    %c0_i32_1 = arith.constant 0 : i32
    return %c0_i32, %c0_i32_0 : i32, i32
  }
  func.func @transform_15(%arg0: i32) -> (i32, i32) {
    %c0_i32 = arith.constant 0 : i32
    %c0_i32_0 = arith.constant 0 : i32
    %c0_i32_1 = arith.constant 0 : i32
    return %c0_i32, %c0_i32_0 : i32, i32
  }
  func.func @transform_16(%arg0: i32) -> (i32, i32) {
    %c0_i32 = arith.constant 0 : i32
    %c0_i32_0 = arith.constant 0 : i32
    %c0_i32_1 = arith.constant 0 : i32
    return %c0_i32, %c0_i32_0 : i32, i32
  }
  func.func @transform_17(%arg0: i32) -> (i32, i32) {
    %c0_i32 = arith.constant 0 : i32
    %c0_i32_0 = arith.constant 0 : i32
    %c0_i32_1 = arith.constant 0 : i32
    return %c0_i32, %c0_i32_0 : i32, i32
  }
  func.func @transform_18(%arg0: i32) -> (i32, i32) {
    %c0_i32 = arith.constant 0 : i32
    %c0_i32_0 = arith.constant 0 : i32
    %c0_i32_1 = arith.constant 0 : i32
    return %c0_i32, %c0_i32_0 : i32, i32
  }
  func.func @transform_19(%arg0: i32) -> (i32, i32) {
    %c0_i32 = arith.constant 0 : i32
    %c0_i32_0 = arith.constant 0 : i32
    %c0_i32_1 = arith.constant 0 : i32
    return %c0_i32, %c0_i32_0 : i32, i32
  }
  func.func @transform_20(%arg0: i32) -> (i32, i32) {
    %c0_i32 = arith.constant 0 : i32
    %c0_i32_0 = arith.constant 0 : i32
    %c0_i32_1 = arith.constant 0 : i32
    return %c0_i32, %c0_i32_0 : i32, i32
  }
  func.func @transform_21(%arg0: i32) -> (i32, i32) {
    %c0_i32 = arith.constant 0 : i32
    %c0_i32_0 = arith.constant 0 : i32
    %c0_i32_1 = arith.constant 0 : i32
    return %c0_i32, %c0_i32_0 : i32, i32
  }
  func.func @transform_22(%arg0: i32) -> (i32, i32) {
    %c0_i32 = arith.constant 0 : i32
    %c0_i32_0 = arith.constant 0 : i32
    %c0_i32_1 = arith.constant 0 : i32
    return %c0_i32, %c0_i32_0 : i32, i32
  }
  func.func @transform_23(%arg0: i32) -> (i32, i32) {
    %c0_i32 = arith.constant 0 : i32
    %c0_i32_0 = arith.constant 0 : i32
    %c0_i32_1 = arith.constant 0 : i32
    return %c0_i32, %c0_i32_0 : i32, i32
  }
  func.func @transform_24(%arg0: i32) -> (i32, i32, i32) {
    %c0_i32 = arith.constant 0 : i32
    %c0_i32_0 = arith.constant 0 : i32
    %c0_i32_1 = arith.constant 0 : i32
    return %arg0, %c0_i32, %c0_i32_0 : i32, i32, i32
  }
  func.func @transform_25(%arg0: i32) -> (i32, i32, i32) {
    %c0_i32 = arith.constant 0 : i32
    %c0_i32_0 = arith.constant 0 : i32
    %c0_i32_1 = arith.constant 0 : i32
    return %arg0, %c0_i32, %c0_i32_0 : i32, i32, i32
  }
}

</mosaic_0001>

<bundles_post_ra>
// kernel: tpu_custom_call.1
= control target key start
LH: loop header
LB: loop body
LE: loop exit
PB: predicated region body
PF: predicated region fallthrough
CT: control target
= control target key end

     0   :  { %s5274_s0 = inlined_call_operand.hbm [shape: f32[2,1,32], index: 0, kind: input, shape index: {}]   ;;  %s5275_s1 = inlined_call_operand.hbm [shape: f32[2,8,32], index: 1, kind: input, shape index: {}]   ;;  %s5276_s2 = inlined_call_operand.hbm [shape: f32[2,1,1], index: 2, kind: input, shape index: {}]   ;;  %s5277_s3 = inlined_call_operand.hbm [shape: f32[2,1,8], index: 3, kind: input, shape index: {}]   ;;  %s5278_s4 = inlined_call_operand.hbm [shape: f32[1,32], index: 4, kind: input, shape index: {}]   ;;  %s5279_s5 = inlined_call_operand.hbm [shape: f32[1,32], index: 5, kind: input, shape index: {}]   ;;  %s5280_s6 = inlined_call_operand.hbm [shape: f32[1,32], index: 6, kind: input, shape index: {}]   ;;  %s5281_s7 = inlined_call_operand.hbm [shape: f32[1,32], index: 7, kind: input, shape index: {}]   ;;  %s5282_s8 = inlined_call_operand.hbm [shape: bf16[32,96], index: 8, kind: input, shape index: {}]   ;;  %s5283_s9 = inlined_call_operand.hbm [shape: f32[1,96], index: 9, kind: input, shape index: {}]   ;;  %s5284_s10 = inlined_call_operand.hbm [shape: bf16[32,32], index: 10, kind: input, shape index: {}]   ;;  %s5285_s11 = inlined_call_operand.hbm [shape: f32[1,32], index: 11, kind: input, shape index: {}]   ;;  %s5286_s12 = inlined_call_operand.hbm [shape: bf16[32,32], index: 12, kind: input, shape index: {}]   ;;  %s5287_s13 = inlined_call_operand.hbm [shape: f32[1,32], index: 13, kind: input, shape index: {}]   ;;  %s5288_s14 = inlined_call_operand.hbm [shape: bf16[32,64], index: 14, kind: input, shape index: {}]   ;;  %s5289_s15 = inlined_call_operand.hbm [shape: f32[1,64], index: 15, kind: input, shape index: {}]   ;;  %s5290_s16 = inlined_call_operand.hbm [shape: bf16[32,32], index: 16, kind: input, shape index: {}]   ;;  %s5291_s17 = inlined_call_operand.hbm [shape: f32[1,32], index: 17, kind: input, shape index: {}]   ;;  %s5292_s18 = inlined_call_operand.hbm [shape: f32[1,32], index: 18, kind: input, shape index: {}]   ;;  %s5293_s19 = inlined_call_operand.hbm [shape: f32[1,32], index: 19, kind: input, shape index: {}]   ;;  %s5294_s20 = inlined_call_operand.hbm [shape: bf16[32,64], index: 20, kind: input, shape index: {}]   ;;  %s5295_s21 = inlined_call_operand.hbm [shape: f32[1,64], index: 21, kind: input, shape index: {}]   ;;  %s5296_s22 = inlined_call_operand.hbm [shape: bf16[64,32], index: 22, kind: input, shape index: {}]   ;;  %s5297_s23 = inlined_call_operand.hbm [shape: f32[1,32], index: 23, kind: input, shape index: {}]   ;;  %s5298_s24 = inlined_call_operand.hbm [shape: f32[2,1,32], index: 24, kind: output, shape index: {0}]   ;;  %s5299_s25 = inlined_call_operand.hbm [shape: f32[2,1,32], index: 25, kind: output, shape index: {1}]  }
   0x1   :  { %5315 = sst [smem:[#allocation58_spill]] %s5274_s0 }
   0x2   :  { %5316 = sst [smem:[#allocation59_spill]] %s5275_s1 }
   0x3   :  { %5317 = sst [smem:[#allocation60_spill]] %s5276_s2 }
   0x4   :  { %5318 = sst [smem:[#allocation61_spill]] %s5277_s3 }
   0x5   :  { %5319 = sst [smem:[#allocation62_spill]] %s5278_s4 }
   0x6   :  { %5320 = sst [smem:[#allocation63_spill]] %s5279_s5 }
   0x7   :  { %5321 = sst [smem:[#allocation64_spill]] %s5280_s6 }
   0x8   :  { %5322 = sst [smem:[#allocation65_spill]] %s5281_s7 }
   0x9   :  { %5323 = sst [smem:[#allocation66_spill]] %s5282_s8 }
   0xa   :  { %5324 = sst [smem:[#allocation67_spill]] %s5283_s9 }
   0xb   :  { %5325 = sst [smem:[#allocation68_spill]] %s5297_s23 }
   0xc   :  { %5326 = sst [smem:[#allocation69_spill]] %s5298_s24 }
   0xd   :  { %5327 = sst [smem:[#allocation70_spill]] %s5299_s25 }
   0xe   :  { %31 = vsyncpa [#allocation3], 0 }
   0xf   :  { %32 = vsyncpa [#allocation6], 0 }
  0x10   :  { %33 = vsyncpa [#allocation9], 0 }
  0x11   :  { %34 = vsyncpa [#allocation12], 0 }
  0x12   :  { %35 = vsyncpa [#allocation15], 0 }
  0x13   :  { %36 = vsyncpa [#allocation18], 0 }
  0x14   :  { %37 = vsyncpa [#allocation21], 0 }
  0x15   :  { %38 = vsyncpa [#allocation24], 0 }
  0x16   :  { %39 = vsyncpa [#allocation27], 0 }
  0x17   :  { %40 = vsyncpa [#allocation30], 0 }
  0x18   :  { %41 = vsyncpa [#allocation33], 0 }
  0x19   :  { %42 = vsyncpa [#allocation36], 0 }
  0x1a   :  { %43 = vsyncpa [#allocation39], 0 }
  0x1b   :  { %44 = vsyncpa [#allocation4], 0 }
  0x1c   :  { %45 = vsyncpa [#allocation42], 0  ;;  %s4307_s29 = smov [#allocation5]   ;;  %s5328_s7 = sld [smem:[#allocation59_spill]] }
  0x1d   :  { %s63_s2 = sshll.u32 %s4307_s29, 4  ;;  %s64_s2 = int_to_ptr.vmem [resolvable:$true] %s63_s2 }
  0x22   :  { %s3705_s3 = scalar_lea.hbm %s5328_s7, 256 }
  0x23   :  { %p3706_p0 = scmp.ne.s32.totalorder %s5328_s7, %s3705_s3  ;;  %p3709_p1 = scmp.lt.u32.totalorder %s3705_s3, %s5328_s7 }
  0x25   :  { %p3711_p2 = pnand %p3709_p1, %p3706_p0 }
  0x27   :  { %3714 = shalt.err (!%p3711_p2)
}
  0x28   :  { %s3715_s4 = scalar_lea.vmem %s64_s2, 256  ;;  %p3720_p4 = scmp.lt.s32.totalorder %s64_s2, %s64_s2 }
  0x29   :  { %p3716_p3 = scmp.ne.s32.totalorder %s64_s2, %s3715_s4  ;;  %p3721_p5 = scmp.lt.s32.totalorder %s3715_s4, %s3715_s4 }
  0x2b   :  { %p3722_p6 = por %p3721_p5, %p3720_p4 }
  0x2d   :  { %p3723_p7 = pnand %p3722_p6, %p3716_p3 }
  0x2f   :  { %3726 = shalt.err (!%p3723_p7)
}
  0x30   :  { %s4308_s28 = smov 128   ;;  %s5313_s9 = smov 8  }
  0x31   :  { %69 = dma.hbm_to_vmem [thread:$0]  %s5328_s7, 256, %s64_s2, [#allocation6], %s4308_s28, %s4308_s28, %s5313_s9  }
  0x32   :  { %s4310_s29 = smov [#allocation8]   ;;  %s4311_s30 = smov [#allocation11]  }
  0x33   :  { %s87_s6 = sshll.u32 %s4310_s29, 4  ;;  %s110_s3 = sshll.u32 %s4311_s30, 4  ;;  %s88_s6 = int_to_ptr.vmem [resolvable:$true] %s87_s6  ;;  %s111_s3 = int_to_ptr.vmem [resolvable:$true] %s110_s3 }
  0x34   :  { %s5329_s8 = sld [smem:[#allocation61_spill]] }
  0x3a   :  { %s3727_s27 = scalar_lea.hbm %s5329_s8, 32 }
  0x3b   :  { %p3728_p8 = scmp.ne.s32.totalorder %s5329_s8, %s3727_s27  ;;  %p3731_p9 = scmp.lt.u32.totalorder %s3727_s27, %s5329_s8 }
  0x3d   :  { %p3733_p10 = pnand %p3731_p9, %p3728_p8 }
  0x3f   :  { %3736 = shalt.err (!%p3733_p10)
}
  0x40   :  { %s3737_s2 = scalar_lea.vmem %s88_s6, 32  ;;  %p3742_p12 = scmp.lt.s32.totalorder %s88_s6, %s88_s6 }
  0x41   :  { %p3738_p11 = scmp.ne.s32.totalorder %s88_s6, %s3737_s2  ;;  %p3743_p13 = scmp.lt.s32.totalorder %s3737_s2, %s3737_s2 }
  0x43   :  { %p3744_p0 = por %p3743_p13, %p3742_p12 }
  0x45   :  { %p3745_p1 = pnand %p3744_p0, %p3738_p11 }
  0x47   :  { %3748 = shalt.err (!%p3745_p1)
}
  0x48   :  { %s4312_s7 = smov 16   ;;  %s4313_s28 = smov 1  }
  0x49   :  { %93 = dma.hbm_to_vmem [thread:$0]  %s5329_s8, 32, %s88_s6, [#allocation9], %s4312_s7, %s4312_s7, %s4313_s28  }
  0x4a   :  { %s5330_s0 = sld [smem:[#allocation63_spill]] }
  0x50   :  { %s3749_s29 = scalar_lea.hbm %s5330_s0, 16 }
  0x51   :  { %p3750_p2 = scmp.ne.s32.totalorder %s5330_s0, %s3749_s29  ;;  %p3753_p3 = scmp.lt.u32.totalorder %s3749_s29, %s5330_s0 }
  0x53   :  { %p3755_p4 = pnand %p3753_p3, %p3750_p2 }
  0x55   :  { %3758 = shalt.err (!%p3755_p4)
}
  0x56   :  { %s3759_s4 = scalar_lea.vmem %s111_s3, 16  ;;  %s3763_s2 = scalar_lea.vmem %s111_s3, 32 }
  0x57   :  { %p3760_p5 = scmp.ne.s32.totalorder %s111_s3, %s3759_s4  ;;  %p3764_p6 = scmp.lt.s32.totalorder %s111_s3, %s111_s3 }
  0x58   :  { %p3765_p7 = scmp.lt.s32.totalorder %s3763_s2, %s3759_s4 }
  0x5a   :  { %p3766_p8 = por %p3765_p7, %p3764_p6 }
  0x5c   :  { %p3767_p9 = pnand %p3766_p8, %p3760_p5 }
  0x5e   :  { %3770 = shalt.err (!%p3767_p9)
}
  0x5f   :  { %113 = dma.hbm_to_vmem [thread:$0]  %s5330_s0, 16, %s111_s3, [#allocation12]  }
  0x60   :  { %s4314_s24 = smov [#allocation14]   ;;  %s4315_s23 = smov [#allocation17]  }
  0x61   :  { %s130_s5 = sshll.u32 %s4314_s24, 4  ;;  %s152_s25 = sshll.u32 %s4315_s23, 4  ;;  %s131_s5 = int_to_ptr.vmem [resolvable:$true] %s130_s5  ;;  %s153_s25 = int_to_ptr.vmem [resolvable:$true] %s152_s25 }
  0x62   :  { %s5331_s26 = sld [smem:[#allocation65_spill]] }
  0x68   :  { %s3771_s1 = scalar_lea.hbm %s5331_s26, 16 }
  0x69   :  { %p3772_p10 = scmp.ne.s32.totalorder %s5331_s26, %s3771_s1  ;;  %p3775_p11 = scmp.lt.u32.totalorder %s3771_s1, %s5331_s26 }
  0x6b   :  { %p3777_p12 = pnand %p3775_p11, %p3772_p10 }
  0x6d   :  { %3780 = shalt.err (!%p3777_p12)
}
  0x6e   :  { %s3781_s3 = scalar_lea.vmem %s131_s5, 16  ;;  %s3785_s0 = scalar_lea.vmem %s131_s5, 32 }
  0x6f   :  { %p3782_p13 = scmp.ne.s32.totalorder %s131_s5, %s3781_s3  ;;  %p3786_p0 = scmp.lt.s32.totalorder %s131_s5, %s131_s5 }
  0x70   :  { %p3787_p1 = scmp.lt.s32.totalorder %s3785_s0, %s3781_s3 }
  0x72   :  { %p3788_p2 = por %p3787_p1, %p3786_p0 }
  0x74   :  { %p3789_p3 = pnand %p3788_p2, %p3782_p13 }
  0x76   :  { %3792 = shalt.err (!%p3789_p3)
}
  0x77   :  { %133 = dma.hbm_to_vmem [thread:$0]  %s5331_s26, 16, %s131_s5, [#allocation15]  }
  0x78   :  { %s5332_s23 = sld [smem:[#allocation67_spill]] }
  0x7e   :  { %s3793_s29 = scalar_lea.hbm %s5332_s23, 16 }
  0x7f   :  { %p3794_p4 = scmp.ne.s32.totalorder %s5332_s23, %s3793_s29  ;;  %p3797_p5 = scmp.lt.u32.totalorder %s3793_s29, %s5332_s23 }
  0x81   :  { %p3799_p6 = pnand %p3797_p5, %p3794_p4 }
  0x83   :  { %3802 = shalt.err (!%p3799_p6)
}
  0x84   :  { %s3803_s2 = scalar_lea.vmem %s153_s25, 16  ;;  %s3807_s3 = scalar_lea.vmem %s153_s25, 32 }
  0x85   :  { %p3804_p7 = scmp.ne.s32.totalorder %s153_s25, %s3803_s2  ;;  %p3808_p8 = scmp.lt.s32.totalorder %s153_s25, %s153_s25 }
  0x86   :  { %p3809_p9 = scmp.lt.s32.totalorder %s3807_s3, %s3803_s2 }
  0x88   :  { %p3810_p10 = por %p3809_p9, %p3808_p8 }
  0x8a   :  { %p3811_p11 = pnand %p3810_p10, %p3804_p7 }
  0x8c   :  { %3814 = shalt.err (!%p3811_p11)
}
  0x8d   :  { %155 = dma.hbm_to_vmem [thread:$0]  %s5332_s23, 16, %s153_s25, [#allocation18]  }
  0x8e   :  { %s4316_s0 = smov [#allocation20]   ;;  %s4317_s8 = smov [#allocation23]  }
  0x8f   :  { %s174_s6 = sshll.u32 %s4316_s0, 4  ;;  %s196_s9 = sshll.u32 %s4317_s8, 4  ;;  %s175_s6 = int_to_ptr.vmem [resolvable:$true] %s174_s6  ;;  %s197_s9 = int_to_ptr.vmem [resolvable:$true] %s196_s9 }
  0x90   :  { %s3815_s30 = scalar_lea.hbm %s5285_s11, 16 }
  0x91   :  { %p3816_p12 = scmp.ne.s32.totalorder %s5285_s11, %s3815_s30  ;;  %p3819_p13 = scmp.lt.u32.totalorder %s3815_s30, %s5285_s11 }
  0x93   :  { %p3821_p0 = pnand %p3819_p13, %p3816_p12 }
  0x95   :  { %3824 = shalt.err (!%p3821_p0)
}
  0x96   :  { %s3825_s25 = scalar_lea.vmem %s175_s6, 16  ;;  %s3829_s23 = scalar_lea.vmem %s175_s6, 32 }
  0x97   :  { %p3826_p1 = scmp.ne.s32.totalorder %s175_s6, %s3825_s25  ;;  %p3830_p2 = scmp.lt.s32.totalorder %s175_s6, %s175_s6 }
  0x98   :  { %p3831_p3 = scmp.lt.s32.totalorder %s3829_s23, %s3825_s25 }
  0x9a   :  { %p3832_p4 = por %p3831_p3, %p3830_p2 }
  0x9c   :  { %p3833_p5 = pnand %p3832_p4, %p3826_p1 }
  0x9e   :  { %3836 = shalt.err (!%p3833_p5)
}
  0x9f   :  { %177 = dma.hbm_to_vmem [thread:$0]  %s5285_s11, 16, %s175_s6, [#allocation21]  }
  0xa0   :  { %s3837_s8 = scalar_lea.hbm %s5287_s13, 16 }
  0xa1   :  { %p3838_p6 = scmp.ne.s32.totalorder %s5287_s13, %s3837_s8  ;;  %p3841_p7 = scmp.lt.u32.totalorder %s3837_s8, %s5287_s13 }
  0xa3   :  { %p3843_p8 = pnand %p3841_p7, %p3838_p6 }
  0xa5   :  { %3846 = shalt.err (!%p3843_p8)
}
  0xa6   :  { %s3847_s27 = scalar_lea.vmem %s197_s9, 16  ;;  %s3851_s4 = scalar_lea.vmem %s197_s9, 32 }
  0xa7   :  { %p3848_p9 = scmp.ne.s32.totalorder %s197_s9, %s3847_s27  ;;  %p3852_p10 = scmp.lt.s32.totalorder %s197_s9, %s197_s9 }
  0xa8   :  { %p3853_p11 = scmp.lt.s32.totalorder %s3851_s4, %s3847_s27 }
  0xaa   :  { %p3854_p12 = por %p3853_p11, %p3852_p10 }
  0xac   :  { %p3855_p13 = pnand %p3854_p12, %p3848_p9 }
  0xae   :  { %3858 = shalt.err (!%p3855_p13)
}
  0xaf   :  { %199 = dma.hbm_to_vmem [thread:$0]  %s5287_s13, 16, %s197_s9, [#allocation24]  }
  0xb0   :  { %s4318_s2 = smov [#allocation26]   ;;  %s4319_s23 = smov [#allocation29]  }
  0xb1   :  { %s218_s25 = sshll.u32 %s4318_s2, 4  ;;  %s240_s3 = sshll.u32 %s4319_s23, 4  ;;  %s219_s25 = int_to_ptr.vmem [resolvable:$true] %s218_s25  ;;  %s241_s3 = int_to_ptr.vmem [resolvable:$true] %s240_s3 }
  0xb2   :  { %s3859_s0 = scalar_lea.hbm %s5289_s15, 16 }
  0xb3   :  { %p3860_p0 = scmp.ne.s32.totalorder %s5289_s15, %s3859_s0  ;;  %p3863_p1 = scmp.lt.u32.totalorder %s3859_s0, %s5289_s15 }
  0xb5   :  { %p3865_p2 = pnand %p3863_p1, %p3860_p0 }
  0xb7   :  { %3868 = shalt.err (!%p3865_p2)
}
  0xb8   :  { %s3869_s13 = scalar_lea.vmem %s219_s25, 16  ;;  %s3873_s9 = scalar_lea.vmem %s219_s25, 32 }
  0xb9   :  { %p3870_p3 = scmp.ne.s32.totalorder %s219_s25, %s3869_s13  ;;  %p3874_p4 = scmp.lt.s32.totalorder %s219_s25, %s219_s25 }
  0xba   :  { %p3875_p5 = scmp.lt.s32.totalorder %s3873_s9, %s3869_s13 }
  0xbc   :  { %p3876_p6 = por %p3875_p5, %p3874_p4 }
  0xbe   :  { %p3877_p7 = pnand %p3876_p6, %p3870_p3 }
  0xc0   :  { %3880 = shalt.err (!%p3877_p7)
}
  0xc1   :  { %221 = dma.hbm_to_vmem [thread:$0]  %s5289_s15, 16, %s219_s25, [#allocation27]  }
  0xc2   :  { %s3881_s6 = scalar_lea.hbm %s5291_s17, 16 }
  0xc3   :  { %p3882_p8 = scmp.ne.s32.totalorder %s5291_s17, %s3881_s6  ;;  %p3885_p9 = scmp.lt.u32.totalorder %s3881_s6, %s5291_s17 }
  0xc5   :  { %p3887_p10 = pnand %p3885_p9, %p3882_p8 }
  0xc7   :  { %3890 = shalt.err (!%p3887_p10)
}
  0xc8   :  { %s3891_s0 = scalar_lea.vmem %s241_s3, 16  ;;  %s3895_s8 = scalar_lea.vmem %s241_s3, 32 }
  0xc9   :  { %p3892_p11 = scmp.ne.s32.totalorder %s241_s3, %s3891_s0  ;;  %p3896_p12 = scmp.lt.s32.totalorder %s241_s3, %s241_s3 }
  0xca   :  { %p3897_p13 = scmp.lt.s32.totalorder %s3895_s8, %s3891_s0 }
  0xcc   :  { %p3898_p0 = por %p3897_p13, %p3896_p12 }
  0xce   :  { %p3899_p1 = pnand %p3898_p0, %p3892_p11 }
  0xd0   :  { %3902 = shalt.err (!%p3899_p1)
}
  0xd1   :  { %243 = dma.hbm_to_vmem [thread:$0]  %s5291_s17, 16, %s241_s3, [#allocation30]  }
  0xd2   :  { %s4320_s24 = smov [#allocation32]   ;;  %s4321_s30 = smov [#allocation35]  }
  0xd3   :  { %s260_s29 = sshll.u32 %s4320_s24, 4  ;;  %s282_s13 = sshll.u32 %s4321_s30, 4  ;;  %s261_s29 = int_to_ptr.vmem [resolvable:$true] %s260_s29  ;;  %s283_s13 = int_to_ptr.vmem [resolvable:$true] %s282_s13 }
  0xd4   :  { %s3903_s27 = scalar_lea.hbm %s5293_s19, 16 }
  0xd5   :  { %p3904_p2 = scmp.ne.s32.totalorder %s5293_s19, %s3903_s27  ;;  %p3907_p3 = scmp.lt.u32.totalorder %s3903_s27, %s5293_s19 }
  0xd7   :  { %p3909_p4 = pnand %p3907_p3, %p3904_p2 }
  0xd9   :  { %3912 = shalt.err (!%p3909_p4)
}
  0xda   :  { %s3913_s17 = scalar_lea.vmem %s261_s29, 16  ;;  %s3917_s3 = scalar_lea.vmem %s261_s29, 32 }
  0xdb   :  { %p3914_p5 = scmp.ne.s32.totalorder %s261_s29, %s3913_s17  ;;  %p3918_p6 = scmp.lt.s32.totalorder %s261_s29, %s261_s29 }
  0xdc   :  { %p3919_p7 = scmp.lt.s32.totalorder %s3917_s3, %s3913_s17 }
  0xde   :  { %p3920_p8 = por %p3919_p7, %p3918_p6 }
  0xe0   :  { %p3921_p9 = pnand %p3920_p8, %p3914_p5 }
  0xe2   :  { %3924 = shalt.err (!%p3921_p9)
}
  0xe3   :  { %263 = dma.hbm_to_vmem [thread:$0]  %s5293_s19, 16, %s261_s29, [#allocation33]  }
  0xe4   :  { %s3925_s8 = scalar_lea.hbm %s5295_s21, 16 }
  0xe5   :  { %p3926_p10 = scmp.ne.s32.totalorder %s5295_s21, %s3925_s8  ;;  %p3929_p11 = scmp.lt.u32.totalorder %s3925_s8, %s5295_s21 }
  0xe7   :  { %p3931_p12 = pnand %p3929_p11, %p3926_p10 }
  0xe9   :  { %3934 = shalt.err (!%p3931_p12)
}
  0xea   :  { %s3935_s9 = scalar_lea.vmem %s283_s13, 16  ;;  %s3939_s1 = scalar_lea.vmem %s283_s13, 32 }
  0xeb   :  { %p3936_p13 = scmp.ne.s32.totalorder %s283_s13, %s3935_s9  ;;  %p3940_p0 = scmp.lt.s32.totalorder %s283_s13, %s283_s13 }
  0xec   :  { %p3941_p1 = scmp.lt.s32.totalorder %s3939_s1, %s3935_s9 }
  0xee   :  { %p3942_p2 = por %p3941_p1, %p3940_p0 }
  0xf0   :  { %p3943_p3 = pnand %p3942_p2, %p3936_p13 }
  0xf2   :  { %3946 = shalt.err (!%p3943_p3)
}
  0xf3   :  { %285 = dma.hbm_to_vmem [thread:$0]  %s5295_s21, 16, %s283_s13, [#allocation36]  }
  0xf4   :  { %s4322_s27 = smov [#allocation2]   ;;  %s4323_s11 = smov [#allocation7]  }
  0xf5   :  { %s51_s4 = sshll.u32 %s4322_s27, 4  ;;  %s75_s6 = sshll.u32 %s4323_s11, 4  ;;  %s52_s4 = int_to_ptr.vmem [resolvable:$true] %s51_s4  ;;  %s76_s6 = int_to_ptr.vmem [resolvable:$true] %s75_s6 }
  0xf6   :  { %s5333_s3 = sld [smem:[#allocation58_spill]] }
  0xfc   :  { %s3947_s23 = scalar_lea.hbm %s5333_s3, 32 }
  0xfd   :  { %p3948_p4 = scmp.ne.s32.totalorder %s5333_s3, %s3947_s23  ;;  %p3951_p5 = scmp.lt.u32.totalorder %s3947_s23, %s5333_s3 }
  0xff   :  { %p3953_p6 = pnand %p3951_p5, %p3948_p4 }
 0x101   :  { %3956 = shalt.err (!%p3953_p6)
}
 0x102   :  { %s3957_s21 = scalar_lea.vmem %s52_s4, 32  ;;  %p3962_p8 = scmp.lt.s32.totalorder %s52_s4, %s52_s4 }
 0x103   :  { %p3958_p7 = scmp.ne.s32.totalorder %s52_s4, %s3957_s21  ;;  %p3963_p9 = scmp.lt.s32.totalorder %s3957_s21, %s3957_s21 }
 0x105   :  { %p3964_p10 = por %p3963_p9, %p3962_p8 }
 0x107   :  { %p3965_p11 = pnand %p3964_p10, %p3958_p7 }
 0x109   :  { %3968 = shalt.err (!%p3965_p11)
}
 0x10a   :  { %57 = dma.hbm_to_vmem [thread:$0]  %s5333_s3, 32, %s52_s4, [#allocation3], %s4312_s7, %s4312_s7, %s4313_s28  }
 0x10b   :  { %s5334_s30 = sld [smem:[#allocation60_spill]] }
 0x111   :  { %s3969_s9 = scalar_lea.hbm %s5334_s30, 32 }
 0x112   :  { %p3970_p12 = scmp.ne.s32.totalorder %s5334_s30, %s3969_s9  ;;  %p3973_p13 = scmp.lt.u32.totalorder %s3969_s9, %s5334_s30 }
 0x114   :  { %p3975_p0 = pnand %p3973_p13, %p3970_p12 }
 0x116   :  { %3978 = shalt.err (!%p3975_p0)
}
 0x117   :  { %s3979_s11 = scalar_lea.vmem %s76_s6, 32  ;;  %p3984_p2 = scmp.lt.s32.totalorder %s76_s6, %s76_s6 }
 0x118   :  { %p3980_p1 = scmp.ne.s32.totalorder %s76_s6, %s3979_s11  ;;  %p3985_p3 = scmp.lt.s32.totalorder %s3979_s11, %s3979_s11 }
 0x11a   :  { %p3986_p4 = por %p3985_p3, %p3984_p2 }
 0x11c   :  { %p3987_p5 = pnand %p3986_p4, %p3980_p1 }
 0x11e   :  { %3990 = shalt.err (!%p3987_p5)
}
 0x11f   :  { %81 = dma.hbm_to_vmem [thread:$0]  %s5334_s30, 32, %s76_s6, [#allocation6], %s4312_s7, %s4312_s7, %s4313_s28  }
 0x120   :  { %s4324_s17 = smov [#allocation10]   ;;  %s4325_s23 = smov [#allocation13]  }
 0x121   :  { %s100_s3 = sshll.u32 %s4324_s17, 4  ;;  %s120_s5 = sshll.u32 %s4325_s23, 4  ;;  %s101_s3 = int_to_ptr.vmem [resolvable:$true] %s100_s3  ;;  %s121_s5 = int_to_ptr.vmem [resolvable:$true] %s120_s5 }
 0x122   :  { %s5335_s8 = sld [smem:[#allocation62_spill]] }
 0x128   :  { %s3991_s21 = scalar_lea.hbm %s5335_s8, 16 }
 0x129   :  { %p3992_p6 = scmp.ne.s32.totalorder %s5335_s8, %s3991_s21  ;;  %p3995_p7 = scmp.lt.u32.totalorder %s3991_s21, %s5335_s8 }
 0x12b   :  { %p3997_p8 = pnand %p3995_p7, %p3992_p6 }
 0x12d   :  { %4000 = shalt.err (!%p3997_p8)
}
 0x12e   :  { %s4001_s6 = scalar_lea.vmem %s101_s3, 16  ;;  %s4005_s30 = scalar_lea.vmem %s101_s3, 32 }
 0x12f   :  { %p4002_p9 = scmp.ne.s32.totalorder %s101_s3, %s4001_s6  ;;  %p4006_p10 = scmp.lt.s32.totalorder %s101_s3, %s101_s3 }
 0x130   :  { %p4007_p11 = scmp.lt.s32.totalorder %s4005_s30, %s4001_s6 }
 0x132   :  { %p4008_p12 = por %p4007_p11, %p4006_p10 }
 0x134   :  { %p4009_p13 = pnand %p4008_p12, %p4002_p9 }
 0x136   :  { %4012 = shalt.err (!%p4009_p13)
}
 0x137   :  { %103 = dma.hbm_to_vmem [thread:$0]  %s5335_s8, 16, %s101_s3, [#allocation9]  }
 0x138   :  { %s5336_s27 = sld [smem:[#allocation64_spill]] }
 0x13e   :  { %s4013_s11 = scalar_lea.hbm %s5336_s27, 16 }
 0x13f   :  { %p4014_p0 = scmp.ne.s32.totalorder %s5336_s27, %s4013_s11  ;;  %p4017_p1 = scmp.lt.u32.totalorder %s4013_s11, %s5336_s27 }
 0x141   :  { %p4019_p2 = pnand %p4017_p1, %p4014_p0 }
 0x143   :  { %4022 = shalt.err (!%p4019_p2)
}
 0x144   :  { %s4023_s26 = scalar_lea.vmem %s121_s5, 16  ;;  %s4027_s0 = scalar_lea.vmem %s121_s5, 32 }
 0x145   :  { %p4024_p3 = scmp.ne.s32.totalorder %s121_s5, %s4023_s26  ;;  %p4028_p4 = scmp.lt.s32.totalorder %s121_s5, %s121_s5 }
 0x146   :  { %p4029_p5 = scmp.lt.s32.totalorder %s4027_s0, %s4023_s26 }
 0x148   :  { %p4030_p6 = por %p4029_p5, %p4028_p4 }
 0x14a   :  { %p4031_p7 = pnand %p4030_p6, %p4024_p3 }
 0x14c   :  { %4034 = shalt.err (!%p4031_p7)
}
 0x14d   :  { %123 = dma.hbm_to_vmem [thread:$0]  %s5336_s27, 16, %s121_s5, [#allocation12]  }
 0x14e   :  { %s4326_s21 = smov [#allocation16]   ;;  %s5337_s24 = sld [smem:[#allocation66_spill]] }
 0x14f   :  { %s139_s13 = sshll.u32 %s4326_s21, 4  ;;  %s140_s13 = int_to_ptr.vmem [resolvable:$true] %s139_s13 }
 0x154   :  { %s4035_s6 = scalar_lea.hbm %s5337_s24, 256 }
 0x155   :  { %p4036_p8 = scmp.ne.s32.totalorder %s5337_s24, %s4035_s6  ;;  %p4039_p9 = scmp.lt.u32.totalorder %s4035_s6, %s5337_s24 }
 0x157   :  { %p4041_p10 = pnand %p4039_p9, %p4036_p8 }
 0x159   :  { %4044 = shalt.err (!%p4041_p10)
}
 0x15a   :  { %s4045_s29 = scalar_lea.vmem %s140_s13, 256  ;;  %p4050_p12 = scmp.lt.s32.totalorder %s140_s13, %s140_s13 }
 0x15b   :  { %p4046_p11 = scmp.ne.s32.totalorder %s140_s13, %s4045_s29  ;;  %p4051_p13 = scmp.lt.s32.totalorder %s4045_s29, %s4045_s29 }
 0x15d   :  { %p4052_p0 = por %p4051_p13, %p4050_p12 }
 0x15f   :  { %p4053_p1 = pnand %p4052_p0, %p4046_p11 }
 0x161   :  { %4056 = shalt.err (!%p4053_p1)
}
 0x162   :  { %s4327_s5 = smov 64   ;;  %s4328_s27 = smov 4  }
 0x163   :  { %145 = dma.hbm_to_vmem [thread:$0]  %s5337_s24, 256, %s140_s13, [#allocation15], %s4327_s5, %s4327_s5, %s4328_s27  }
 0x164   :  { %s4329_s2 = smov [#allocation19]   ;;  %s4330_s23 = smov [#allocation22]  }
 0x165   :  { %s161_s17 = sshll.u32 %s4329_s2, 4  ;;  %s183_s26 = sshll.u32 %s4330_s23, 4  ;;  %s162_s17 = int_to_ptr.vmem [resolvable:$true] %s161_s17  ;;  %s4683_s26 = int_to_ptr.vmem [resolvable:$true] %s183_s26 }
 0x166   :  { %s4057_s8 = scalar_lea.hbm %s5284_s10, 256 }
 0x167   :  { %p4058_p2 = scmp.ne.s32.totalorder %s5284_s10, %s4057_s8  ;;  %p4061_p3 = scmp.lt.u32.totalorder %s4057_s8, %s5284_s10 }
 0x169   :  { %p4063_p4 = pnand %p4061_p3, %p4058_p2 }
 0x16b   :  { %4066 = shalt.err (!%p4063_p4)
}
 0x16c   :  { %s4067_s13 = scalar_lea.vmem %s162_s17, 256  ;;  %p4072_p6 = scmp.lt.s32.totalorder %s162_s17, %s162_s17 }
 0x16d   :  { %p4068_p5 = scmp.ne.s32.totalorder %s162_s17, %s4067_s13  ;;  %p4073_p7 = scmp.lt.s32.totalorder %s4067_s13, %s4067_s13 }
 0x16f   :  { %p4074_p8 = por %p4073_p7, %p4072_p6 }
 0x171   :  { %p4075_p9 = pnand %p4074_p8, %p4068_p5 }
 0x173   :  { %4078 = shalt.err (!%p4075_p9)
}
 0x174   :  { %167 = dma.hbm_to_vmem [thread:$0]  %s5284_s10, 256, %s162_s17, [#allocation18], %s4327_s5, %s4327_s5, %s4328_s27  }
 0x175   :  { %s4079_s19 = scalar_lea.hbm %s5286_s12, 256 }
 0x176   :  { %p4080_p10 = scmp.ne.s32.totalorder %s5286_s12, %s4079_s19  ;;  %p4083_p11 = scmp.lt.u32.totalorder %s4079_s19, %s5286_s12 }
 0x178   :  { %p4085_p12 = pnand %p4083_p11, %p4080_p10 }
 0x17a   :  { %4088 = shalt.err (!%p4085_p12)
}
 0x17b   :  { %s4089_s23 = scalar_lea.vmem %s4683_s26, 256  ;;  %p4094_p0 = scmp.lt.s32.totalorder %s4683_s26, %s4683_s26 }
 0x17c   :  { %p4090_p13 = scmp.ne.s32.totalorder %s4683_s26, %s4089_s23  ;;  %p4095_p1 = scmp.lt.s32.totalorder %s4089_s23, %s4089_s23 }
 0x17e   :  { %p4096_p2 = por %p4095_p1, %p4094_p0 }
 0x180   :  { %p4097_p3 = pnand %p4096_p2, %p4090_p13 }
 0x182   :  { %4100 = shalt.err (!%p4097_p3)
}
 0x183   :  { %189 = dma.hbm_to_vmem [thread:$0]  %s5286_s12, 256, %s4683_s26, [#allocation21], %s4327_s5, %s4327_s5, %s4328_s27  }
 0x184   :  { %s4331_s0 = smov [#allocation25]   ;;  %s4332_s8 = smov [#allocation28]  }
 0x185   :  { %s205_s3 = sshll.u32 %s4331_s0, 4  ;;  %s227_s21 = sshll.u32 %s4332_s8, 4  ;;  %s206_s3 = int_to_ptr.vmem [resolvable:$true] %s205_s3  ;;  %s4720_s21 = int_to_ptr.vmem [resolvable:$true] %s227_s21 }
 0x186   :  { %s4101_s6 = scalar_lea.hbm %s5288_s14, 256 }
 0x187   :  { %p4102_p4 = scmp.ne.s32.totalorder %s5288_s14, %s4101_s6  ;;  %p4105_p5 = scmp.lt.u32.totalorder %s4101_s6, %s5288_s14 }
 0x189   :  { %p4107_p6 = pnand %p4105_p5, %p4102_p4 }
 0x18b   :  { %4110 = shalt.err (!%p4107_p6)
}
 0x18c   :  { %s4111_s12 = scalar_lea.vmem %s206_s3, 256  ;;  %p4116_p8 = scmp.lt.s32.totalorder %s206_s3, %s206_s3 }
 0x18d   :  { %p4112_p7 = scmp.ne.s32.totalorder %s206_s3, %s4111_s12  ;;  %p4117_p9 = scmp.lt.s32.totalorder %s4111_s12, %s4111_s12 }
 0x18f   :  { %p4118_p10 = por %p4117_p9, %p4116_p8 }
 0x191   :  { %p4119_p11 = pnand %p4118_p10, %p4112_p7 }
 0x193   :  { %4122 = shalt.err (!%p4119_p11)
}
 0x194   :  { %211 = dma.hbm_to_vmem [thread:$0]  %s5288_s14, 256, %s206_s3, [#allocation24], %s4327_s5, %s4327_s5, %s4328_s27  }
 0x195   :  { %s4123_s11 = scalar_lea.hbm %s5290_s16, 256 }
 0x196   :  { %p4124_p12 = scmp.ne.s32.totalorder %s5290_s16, %s4123_s11  ;;  %p4127_p13 = scmp.lt.u32.totalorder %s4123_s11, %s5290_s16 }
 0x198   :  { %p4129_p0 = pnand %p4127_p13, %p4124_p12 }
 0x19a   :  { %4132 = shalt.err (!%p4129_p0)
}
 0x19b   :  { %s4133_s17 = scalar_lea.vmem %s4720_s21, 256  ;;  %p4138_p2 = scmp.lt.s32.totalorder %s4720_s21, %s4720_s21 }
 0x19c   :  { %p4134_p1 = scmp.ne.s32.totalorder %s4720_s21, %s4133_s17  ;;  %p4139_p3 = scmp.lt.s32.totalorder %s4133_s17, %s4133_s17 }
 0x19e   :  { %p4140_p4 = por %p4139_p3, %p4138_p2 }
 0x1a0   :  { %p4141_p5 = pnand %p4140_p4, %p4134_p1 }
 0x1a2   :  { %4144 = shalt.err (!%p4141_p5)
}
 0x1a3   :  { %233 = dma.hbm_to_vmem [thread:$0]  %s5290_s16, 256, %s4720_s21, [#allocation27], %s4327_s5, %s4327_s5, %s4328_s27  }
 0x1a4   :  { %s4333_s3 = smov [#allocation31]   ;;  %s4334_s15 = smov [#allocation34]  }
 0x1a5   :  { %s250_s8 = sshll.u32 %s4333_s3, 4  ;;  %s269_s25 = sshll.u32 %s4334_s15, 4  ;;  %s251_s8 = int_to_ptr.vmem [resolvable:$true] %s250_s8  ;;  %s4757_s25 = int_to_ptr.vmem [resolvable:$true] %s269_s25 }
 0x1a6   :  { %s4145_s24 = scalar_lea.hbm %s5292_s18, 16 }
 0x1a7   :  { %p4146_p6 = scmp.ne.s32.totalorder %s5292_s18, %s4145_s24  ;;  %p4149_p7 = scmp.lt.u32.totalorder %s4145_s24, %s5292_s18 }
 0x1a9   :  { %p4151_p8 = pnand %p4149_p7, %p4146_p6 }
 0x1ab   :  { %4154 = shalt.err (!%p4151_p8)
}
 0x1ac   :  { %s4155_s16 = scalar_lea.vmem %s251_s8, 16  ;;  %s4159_s21 = scalar_lea.vmem %s251_s8, 32 }
 0x1ad   :  { %p4156_p9 = scmp.ne.s32.totalorder %s251_s8, %s4155_s16  ;;  %p4160_p10 = scmp.lt.s32.totalorder %s251_s8, %s251_s8 }
 0x1ae   :  { %p4161_p11 = scmp.lt.s32.totalorder %s4159_s21, %s4155_s16 }
 0x1b0   :  { %p4162_p12 = por %p4161_p11, %p4160_p10 }
 0x1b2   :  { %p4163_p13 = pnand %p4162_p12, %p4156_p9 }
 0x1b4   :  { %4166 = shalt.err (!%p4163_p13)
}
 0x1b5   :  { %253 = dma.hbm_to_vmem [thread:$0]  %s5292_s18, 16, %s251_s8, [#allocation30]  }
 0x1b6   :  { %s4167_s4 = scalar_lea.hbm %s5294_s20, 256 }
 0x1b7   :  { %p4168_p0 = scmp.ne.s32.totalorder %s5294_s20, %s4167_s4  ;;  %p4171_p1 = scmp.lt.u32.totalorder %s4167_s4, %s5294_s20 }
 0x1b9   :  { %p4173_p2 = pnand %p4171_p1, %p4168_p0 }
 0x1bb   :  { %4176 = shalt.err (!%p4173_p2)
}
 0x1bc   :  { %s4177_s14 = scalar_lea.vmem %s4757_s25, 256  ;;  %p4182_p4 = scmp.lt.s32.totalorder %s4757_s25, %s4757_s25 }
 0x1bd   :  { %p4178_p3 = scmp.ne.s32.totalorder %s4757_s25, %s4177_s14  ;;  %p4183_p5 = scmp.lt.s32.totalorder %s4177_s14, %s4177_s14 }
 0x1bf   :  { %p4184_p6 = por %p4183_p5, %p4182_p4 }
 0x1c1   :  { %p4185_p7 = pnand %p4184_p6, %p4178_p3 }
 0x1c3   :  { %4188 = shalt.err (!%p4185_p7)
}
 0x1c4   :  { %275 = dma.hbm_to_vmem [thread:$0]  %s5294_s20, 256, %s4757_s25, [#allocation33], %s4327_s5, %s4327_s5, %s4328_s27  }
 0x1c5   :  { %s4335_s3 = smov [#allocation37]   ;;  %s4336_s15 = smov [#allocation38]  }
 0x1c6   :  { %s291_s8 = sshll.u32 %s4335_s3, 4  ;;  %s304_s6 = sshll.u32 %s4336_s15, 4  ;;  %s292_s8 = int_to_ptr.vmem [resolvable:$true] %s291_s8  ;;  %s305_s6 = int_to_ptr.vmem [resolvable:$true] %s304_s6 }
 0x1c7   :  { %s4189_s30 = scalar_lea.hbm %s5296_s22, 512 }
 0x1c8   :  { %p4190_p8 = scmp.ne.s32.totalorder %s5296_s22, %s4189_s30  ;;  %p4193_p9 = scmp.lt.u32.totalorder %s4189_s30, %s5296_s22 }
 0x1ca   :  { %p4195_p10 = pnand %p4193_p9, %p4190_p8 }
 0x1cc   :  { %4198 = shalt.err (!%p4195_p10)
}
 0x1cd   :  { %s4199_s20 = scalar_lea.vmem %s292_s8, 512  ;;  %p4204_p12 = scmp.lt.s32.totalorder %s292_s8, %s292_s8 }
 0x1ce   :  { %p4200_p11 = scmp.ne.s32.totalorder %s292_s8, %s4199_s20  ;;  %p4205_p13 = scmp.lt.s32.totalorder %s4199_s20, %s4199_s20 }
 0x1d0   :  { %p4206_p0 = por %p4205_p13, %p4204_p12 }
 0x1d2   :  { %p4207_p1 = pnand %p4206_p0, %p4200_p11 }
 0x1d4   :  { %4210 = shalt.err (!%p4207_p1)
}
 0x1d5   :  { %297 = dma.hbm_to_vmem [thread:$0]  %s5296_s22, 512, %s292_s8, [#allocation36], %s4327_s5, %s4327_s5, %s4328_s27  }
 0x1d6   :  { %s5338_s29 = sld [smem:[#allocation68_spill]] }
 0x1dc   :  { %s4211_s11 = scalar_lea.hbm %s5338_s29, 16 }
 0x1dd   :  { %p4212_p2 = scmp.ne.s32.totalorder %s5338_s29, %s4211_s11  ;;  %p4215_p3 = scmp.lt.u32.totalorder %s4211_s11, %s5338_s29 }
 0x1df   :  { %p4217_p4 = pnand %p4215_p3, %p4212_p2 }
 0x1e1   :  { %4220 = shalt.err (!%p4217_p4)
}
 0x1e2   :  { %s4221_s17 = scalar_lea.vmem %s305_s6, 16  ;;  %s4225_s14 = scalar_lea.vmem %s305_s6, 32 }
 0x1e3   :  { %p4222_p5 = scmp.ne.s32.totalorder %s305_s6, %s4221_s17  ;;  %p4226_p6 = scmp.lt.s32.totalorder %s305_s6, %s305_s6 }
 0x1e4   :  { %p4227_p7 = scmp.lt.s32.totalorder %s4225_s14, %s4221_s17 }
 0x1e6   :  { %p4228_p8 = por %p4227_p7, %p4226_p6 }
 0x1e8   :  { %p4229_p9 = pnand %p4228_p8, %p4222_p5 }
 0x1ea   :  { %4232 = shalt.err (!%p4229_p9)
}
 0x1eb   :  { %307 = dma.hbm_to_vmem [thread:$0]  %s5338_s29, 16, %s305_s6, [#allocation39]  }
 0x1ec   :  { %4277 = dma.done.wait [#allocation3], 32  }
 0x1ed   :  { %4278 = vsyncadd [#allocation3], 4294967264 }
 0x1ee   :  { %4279 = dma.done.wait [#allocation6], 288  }
 0x1ef   :  { %4280 = vsyncadd [#allocation6], 4294967008 }
 0x1f0   :  { %4281 = dma.done.wait [#allocation9], 48  }
 0x1f1   :  { %4282 = vsyncadd [#allocation9], 4294967248 }
 0x1f2   :  { %4283 = dma.done.wait [#allocation12], 32  }
 0x1f3   :  { %4284 = vsyncadd [#allocation12], 4294967264 }
 0x1f4   :  { %4285 = dma.done.wait [#allocation15], 272  }
 0x1f5   :  { %4286 = vsyncadd [#allocation15], 4294967024 }
 0x1f6   :  { %4287 = dma.done.wait [#allocation18], 272  }
 0x1f7   :  { %4288 = vsyncadd [#allocation18], 4294967024 }
 0x1f8   :  { %4289 = dma.done.wait [#allocation21], 272  }
 0x1f9   :  { %4290 = vsyncadd [#allocation21], 4294967024 }
 0x1fa   :  { %4291 = dma.done.wait [#allocation24], 272  }
 0x1fb   :  { %4292 = vsyncadd [#allocation24], 4294967024 }
 0x1fc   :  { %4293 = dma.done.wait [#allocation27], 272  }
 0x1fd   :  { %4294 = vsyncadd [#allocation27], 4294967024 }
 0x1fe   :  { %4295 = dma.done.wait [#allocation30], 32  }
 0x1ff   :  { %4296 = vsyncadd [#allocation30], 4294967264 }
 0x200   :  { %4297 = dma.done.wait [#allocation33], 272  }
 0x201   :  { %4298 = vsyncadd [#allocation33], 4294967024 }
 0x202   :  { %4299 = dma.done.wait [#allocation36], 528  }
 0x203   :  { %4300 = vsyncadd [#allocation36], 4294966768 }
 0x204   :  { %4301 = dma.done.wait [#allocation39], 16  }
 0x205   :  { %4302 = vsyncadd [#allocation39], 4294967280  ;;  %v385_v0 = vlaneseq  ;;  %v4337_v1 = vmov 1966171168   ;;  %vm426_vm0 = vcmask 254976   ;;  %v3619_v26 = vld [vmem:[#allocation16] sm:$0xff]  }
 0x206   :  { %v412_v2 = vunpack.c.l.s4 %v4337_v1  ;;  %v381_v6 = vld [vmem:[#allocation2] sm:$0x1]  ;;  %v382_v7 = vld [vmem:[#allocation2 + $0x1] sm:$0x1]  ;;  %v4338_v27 = vmov 0.0   ;;  %vm4339_vm1 = vmmov 0  }
 0x207   :  { %v4819_v3 = vshrl.u32 %v385_v0, 7  ;;  %v410_v8 = vcombine.low %v381_v6, %v382_v7  ;;  %3294 = vmatprep.subr.bf16.mxu1 %v4338_v27  ;;  %3298 = vmatprep.mubr.msk.bf16.mxu1 %vm4339_vm1, %v4338_v27  ;;  %v3620_v28 = vld [vmem:[#allocation16 + $0x8] sm:$0xff]   ;;  %v3139_v32 = vld [vmem:[#allocation10] ss:$0 sm:$0xff]  ;;  %v3140_v33 = vld [vmem:[#allocation11] ss:$0 sm:$0xff] }
 0x208   :  { %v413_v4 = vunpack.c.0.s8 %v412_v2  ;;  %3295 = vmatpush3.bf16.msra.mxu1 %v3619_v26  ;;  %3308 = vmatprep.subr.bf16.mxu0 %v4338_v27  ;;  %vm3089_vm2 = vcmask 253952   ;;  %vm564_vm3 = vcmask 1041409   ;;  %vm579_vm4 = vcmask 261120   ;;  %v3141_v58 = vld [vmem:[#allocation17] ss:$0 sm:$0xff]  ;;  %s4340_s18 = smov 112  }
 0x209   :  { %v435_v12 = vsub.s32 0, %v4819_v3  ;;  %v439_v13 = vsub.s32 1, %v4819_v3  ;;  %3296 = vmatprep.subr.bf16.mxu1 %v4338_v27  ;;  %3310 = vmatprep.mubr.msk.bf16.mxu0 %vm4339_vm1, %v4338_v27  ;;  %s4341_s0 = smov 120   ;;  %s4342_s3 = smov 104   ;;  %vm677_vm5 = vcmask 64512   ;;  %vm1121_vm6 = vcmask 1040384  }
 0x20a   :  { %v4822_v5 = vsub.s32 %v413_v4, %v4819_v3  ;;  %s4343_s8 = smov 96   ;;  %vm1117_vm12 = vcmask 7168   ;;  %s4345_s15 = smov 24   ;;  %vm1585_vm13 = vcmask 130048   ;;  %vm1588_vm14 = vcmask 195584  }
 0x20b   :  { %vm2373_vm15 = vcmask 1043456   ;;  %s4346_s6 = smov [#allocation41]  }
 0x20c   :  { %v417_v9 = vrot.slane %v410_v8, %v4822_v5  ;;  %3297 = vmatpush3.bf16.msra.mxu1 %v3620_v28  ;;  %v495_v34 = vrot.slane %v3139_v32, %v4822_v5  ;;  %v526_v35 = vrot.slane %v3140_v33, %v4822_v5  ;;  %s3111_s13 = sshll.u32 %s4346_s6, 4  ;;  %s3112_s13 = int_to_ptr.vmem [resolvable:$true] %s3111_s13 }
 0x20d   :  { %3302 = vmatprep.subr.bf16.mxu1 %v4338_v27  ;;  %s4233_s24 = scalar_lea.vmem %s3112_s13, 32  ;;  %p4238_p11 = scmp.lt.s32.totalorder %s3112_s13, %s3112_s13 }
 0x20e   :  { %v4826_v10 = vrot.slane %v417_v9, %v4822_v5  ;;  %v496_v36 = vcombine.high %v495_v34, %v495_v34  ;;  %v527_v37 = vcombine.high %v526_v35, %v526_v35  ;;  %v503_v39 = vrot.slane %v495_v34, %v4822_v5  ;;  %p4234_p10 = scmp.ne.s32.totalorder %s3112_s13, %s4233_s24  ;;  %p4239_p12 = scmp.lt.s32.totalorder %s4233_s24, %s4233_s24 }
 0x20f   :  { %v534_v45 = vrot.slane %v526_v35, %v4822_v5 }
 0x210   :  { %v427_v11 = vsel %vm426_vm0, %v4826_v10, 0.0  ;;  %v510_v40 = vrot.slane %v496_v36, %v4822_v5  ;;  %v541_v46 = vrot.slane %v527_v37, %v4822_v5  ;;  %p4240_p13 = por %p4239_p12, %p4238_p11 }
 0x211   :  { %428 = vadd.xlane.f32.xlu0 %v427_v11 }
 0x212   :  { %p4241_p0 = pnand %p4240_p13, %p4234_p10 }
 0x29e   :  { %v429_v14 = vpop.xlane.xlu0 %428 }
 0x29f   :  { %v431_v15 = vmul.f32 0.03125, %v429_v14 }
 0x2a1   :  { %v436_v16 = vrot.slane %v431_v15, %v435_v12  ;;  %v440_v17 = vrot.slane %v431_v15, %v439_v13 }
 0x2a3   :  { %v443_v18 = vsub.f32 %v381_v6, %v436_v16  ;;  %v444_v19 = vsub.f32 %v382_v7, %v440_v17  ;;  %v4344_v16 = vmov 0  }
 0x2a4   :  { %3587 = vset.pattern.permute.xlu1 %v4344_v16  ;;  %3588 = vset.pattern.permute.xlu0 %v4344_v16 }
 0x2a5   :  { %v445_v20 = vmul.f32 %v443_v18, %v443_v18  ;;  %v446_v21 = vmul.f32 %v444_v19, %v444_v19 }
 0x2a7   :  { %v449_v22 = vcombine.low %v445_v20, %v446_v21 }
 0x2a9   :  { %v456_v23 = vrot.slane %v449_v22, %v4822_v5 }
 0x2ab   :  { %v463_v24 = vrot.slane %v456_v23, %v4822_v5 }
 0x2ad   :  { %v465_v25 = vsel %vm426_vm0, %v463_v24, 0.0 }
 0x2ae   :  { %466 = vadd.xlane.f32.xlu0 %v465_v25 }
 0x33b   :  { %v467_v29 = vpop.xlane.xlu0 %466 }
 0x33c   :  { %v468_v30 = vmul.f32 0.03125, %v467_v29 }
 0x33e   :  { %v469_v31 = vadd.f32 1e-06, %v468_v30 }
 0x340   :  { %3635 = vrsqrt.f32 %v469_v31 }
 0x34a   :  { %v3636_v38 = vpop.eup %3635 }
 0x34b   :  { %v475_v41 = vrot.slane %v3636_v38, %v435_v12  ;;  %v479_v42 = vrot.slane %v3636_v38, %v439_v13 }
 0x34d   :  { %v482_v43 = vmul.f32 %v475_v41, %v443_v18  ;;  %v483_v44 = vmul.f32 %v479_v42, %v444_v19 }
 0x34f   :  { %v513_v47 = vmul.f32 %v503_v39, %v482_v43  ;;  %v514_v48 = vmul.f32 %v510_v40, %v483_v44  ;;  %v4921_v40 = vsel %vm1121_vm6, 65535, %v4344_v16 }
 0x351   :  { %v544_v49 = vadd.f32 %v534_v45, %v513_v47  ;;  %v545_v50 = vadd.f32 %v541_v46, %v514_v48  ;;  %v388_v45 = vand.u32 127, %v385_v0  ;;  %v391_v46 = vld [vmem:[#allocation7 + $0x1] sm:$0x1]  ;;  %v390_v47 = vld [vmem:[#allocation7] sm:$0x1] }
 0x352   :  { %vm393_vm8 = vcmp.gt.f32.partialorder %v391_v46, 0.0  ;;  %vm392_vm10 = vcmp.gt.f32.partialorder %v390_v47, 0.0 }
 0x353   :  { %v546_v51 = vpack.c.bf16 %v544_v49, %v544_v49  ;;  %v547_v52 = vpack.c.bf16 %v545_v50, %v545_v50  ;;  %3092 = vst.msk [vmem:[#allocation41] sm:$0x1] %vm3089_vm2, %v544_v49  ;;  %3093 = vst.msk [vmem:[#allocation41 + $0x1] sm:$0x1] %vm3089_vm2, %v545_v50  ;;  %vm389_vm7 = vcmp.gt.s32.totalorder %v388_v45, %v4819_v3 }
 0x354   :  { %vm397_vm9 = vmor %vm389_vm7, %vm393_vm8  ;;  %vm2286_vm8 = vcmask 57344  }
 0x355   :  { %v562_v53 = vunpack.c.l.b16 %v547_v52  ;;  %v561_v54 = vunpack.c.l.b16 %v546_v51  ;;  %v4942_v48 = vsel %vm397_vm9, -1e+18, %v4338_v27  ;;  %vm396_vm11 = vmor %vm389_vm7, %vm392_vm10 }
 0x357   :  { %v563_v55 = vrot.slane %v562_v53, 7  ;;  %v4946_v53 = vsel %vm396_vm11, -1e+18, %v4338_v27 }
 0x359   :  { %v565_v56 = vsel %vm564_vm3, %v563_v55, %v561_v54 }
 0x35a   :  { %v566_v57 = vpack.c.b16 %v565_v56, %v565_v56 }
 0x35c   :  { %3299 = vmatmul.mubr.msk.bf16.vlgmr.msra.gmra.mrb[0].mxu1 %vm579_vm4, %v566_v57 }
 0x35d   :  { %3304 = vmatprep.mubr.msk.bf16.mxu1 %vm4339_vm1, %v4338_v27 }
 0x42f   :  { %v617_v59 = vpop.f32.mrb[0].mxu1 }
 0x430   :  { %v618_v60 = vadd.f32 %v3141_v58, %v617_v59  ;;  %v3300_v61 = vpop.f32.mrb[1].mxu1 }
 0x431   :  { %v620_v62 = vpop.f32.mrb[2].mxu1 }
 0x432   :  { %v630_v63 = vrot.slane %v618_v60, %v4822_v5  ;;  %v3301_v1 = vpop.f32.mrb[3].mxu1 }
 0x434   :  { %v631_v2 = vcombine.high %v630_v63, %v630_v63  ;;  %v638_v6 = vrot.slane %v630_v63, %v4822_v5 }
 0x436   :  { %v645_v4 = vrot.slane %v631_v2, %v4822_v5  ;;  %v666_v8 = vpack.c.bf16 %v638_v6, %v638_v6 }
 0x438   :  { %656 = vrot.lane.b32.xlu0 %v645_v4, %s4340_s18  ;;  %650 = vrot.lane.b32.xlu1 %v645_v4, %s4341_s0  ;;  %v667_v7 = vpack.c.bf16 %v645_v4, %v645_v4 }
 0x43c   :  { %648 = vrot.lane.b32.xlu1 %v638_v6, %s4341_s0 }
 0x440   :  { %654 = vrot.lane.b32.xlu1 %v638_v6, %s4340_s18 }
 0x444   :  { %662 = vrot.lane.b32.xlu1 %v645_v4, %s4342_s3 }
 0x448   :  { %660 = vrot.lane.b32.xlu1 %v638_v6, %s4342_s3 }
 0x44c   :  { %725 = vrot.lane.b32.xlu1 %v667_v7, %s4343_s8 }
 0x450   :  { %675 = vrot.lane.b32.xlu1 %v666_v8, %s4343_s8 }
 0x4aa   :  { %v651_v9 = vpop.permute.xlu1 %650  ;;  %v657_v12 = vpop.permute.xlu0 %656 }
 0x4ab   :  { %v669_v11 = vpack.c.bf16 %v651_v9, %v651_v9  ;;  %v671_v14 = vpack.c.bf16 %v657_v12, %v657_v12 }
 0x4ad   :  { %823 = vrot.lane.b32.xlu1 %v669_v11, %s4343_s8 }
 0x4ae   :  { %v649_v13 = vpop.permute.xlu1 %648 }
 0x4af   :  { %v668_v15 = vpack.c.bf16 %v649_v13, %v649_v13 }
 0x4b1   :  { %774 = vrot.lane.b32.xlu0 %v668_v15, %s4343_s8  ;;  %921 = vrot.lane.b32.xlu1 %v671_v14, %s4343_s8 }
 0x4b2   :  { %v655_v17 = vpop.permute.xlu1 %654 }
 0x4b3   :  { %v670_v18 = vpack.c.bf16 %v655_v17, %v655_v17 }
 0x4b5   :  { %872 = vrot.lane.b32.xlu0 %v670_v18, %s4343_s8 }
 0x4b6   :  { %v663_v19 = vpop.permute.xlu1 %662 }
 0x4b7   :  { %v4872_v20 = vpack.c.bf16 %v663_v19, %v663_v19 }
 0x4b9   :  { %1019 = vrot.lane.b32.xlu1 %v4872_v20, %s4343_s8 }
 0x4ba   :  { %v661_v21 = vpop.permute.xlu1 %660 }
 0x4bb   :  { %v4876_v22 = vpack.c.bf16 %v661_v21, %v661_v21 }
 0x4bd   :  { %970 = vrot.lane.b32.xlu0 %v4876_v22, %s4343_s8  ;;  %1167 = vrot.lane.b32.xlu1 %v667_v7, %s4327_s5 }
 0x4be   :  { %v726_v23 = vpop.permute.xlu1 %725 }
 0x4bf   :  { %v731_v24 = vsel %vm677_vm5, %v726_v23, 0 }
 0x4c0   :  { %3309 = vmatpush3.bf16.xpose.msra.mxu0 %v731_v24 }
 0x4c1   :  { %1115 = vrot.lane.b32.xlu0 %v666_v8, %s4327_s5  ;;  %1263 = vrot.lane.b32.xlu1 %v669_v11, %s4327_s5 }
 0x4c2   :  { %v676_v25 = vpop.permute.xlu1 %675  ;;  %3320 = vmatprep.subr.bf16.mxu0 %v4338_v27 }
 0x4c3   :  { %v682_v26 = vsel %vm677_vm5, %v676_v25, 0 }
 0x4c4   :  { %3303 = vmatpush3.bf16.xpose.msra.mxu1 %v682_v26 }
 0x4c5   :  { %1215 = vrot.lane.b32.xlu0 %v668_v15, %s4327_s5  ;;  %1359 = vrot.lane.b32.xlu1 %v671_v14, %s4327_s5 }
 0x4c6   :  { %3314 = vmatprep.subr.bf16.mxu1 %v4338_v27 }
 0x4c7   :  { %3311 = vmatmul.mubr.msk.bf16.vlgmr.msra.gmra.mrb[0].mxu0 %vm677_vm5, %v667_v7 }
 0x4c8   :  { %3322 = vmatprep.mubr.msk.bf16.mxu0 %vm4339_vm1, %v4338_v27 }
 0x4c9   :  { %1311 = vrot.lane.b32.xlu0 %v670_v18, %s4327_s5  ;;  %1455 = vrot.lane.b32.xlu1 %v4872_v20, %s4327_s5 }
 0x4cb   :  { %3305 = vmatmul.mubr.msk.bf16.vlgmr.msra.gmra.mrb[4].mxu1 %vm677_vm5, %v666_v8 }
 0x4cc   :  { %3316 = vmatprep.mubr.msk.bf16.mxu1 %vm4339_vm1, %v4338_v27 }
 0x4cd   :  { %1407 = vrot.lane.b32.xlu0 %v4876_v22, %s4327_s5  ;;  %s5339_s5 = smov 8  }
 0x51f   :  { %v824_v28 = vpop.permute.xlu1 %823 }
 0x520   :  { %v829_v29 = vsel %vm677_vm5, %v824_v28, 0 }
 0x521   :  { %3321 = vmatpush3.bf16.xpose.msra.mxu0 %v829_v29 }
 0x522   :  { %3332 = vmatprep.subr.bf16.mxu0 %v4338_v27 }
 0x523   :  { %v775_v30 = vpop.permute.xlu0 %774  ;;  %v922_v32 = vpop.permute.xlu1 %921 }
 0x524   :  { %v780_v31 = vsel %vm677_vm5, %v775_v30, 0  ;;  %v927_v33 = vsel %vm677_vm5, %v922_v32, 0 }
 0x525   :  { %3315 = vmatpush3.bf16.xpose.msra.mxu1 %v780_v31 }
 0x526   :  { %3326 = vmatprep.subr.bf16.mxu1 %v4338_v27 }
 0x527   :  { %v873_v34 = vpop.permute.xlu0 %872 }
 0x528   :  { %3323 = vmatmul.mubr.msk.bf16.vlgmr.msra.gmra.mrb[4].mxu0 %vm677_vm5, %v669_v11  ;;  %v878_v35 = vsel %vm677_vm5, %v873_v34, 0 }
 0x529   :  { %3333 = vmatpush3.bf16.xpose.msra.mxu0 %v927_v33  ;;  %3334 = vmatprep.mubr.msk.bf16.mxu0 %vm4339_vm1, %v4338_v27 }
 0x52a   :  { %3344 = vmatprep.subr.bf16.mxu0 %v4338_v27 }
 0x52b   :  { %v1020_v36 = vpop.permute.xlu1 %1019 }
 0x52c   :  { %3317 = vmatmul.mubr.msk.bf16.vlgmr.msra.gmra.mrb[8].mxu1 %vm677_vm5, %v668_v15  ;;  %v1025_v37 = vsel %vm677_vm5, %v1020_v36, 0 }
 0x52d   :  { %3327 = vmatpush3.bf16.xpose.msra.mxu1 %v878_v35  ;;  %3328 = vmatprep.mubr.msk.bf16.mxu1 %vm4339_vm1, %v4338_v27 }
 0x52e   :  { %3338 = vmatprep.subr.bf16.mxu1 %v4338_v27 }
 0x52f   :  { %v971_v38 = vpop.permute.xlu0 %970  ;;  %v1168_v41 = vpop.permute.xlu1 %1167 }
 0x530   :  { %3335 = vmatmul.mubr.msk.bf16.vlgmr.msra.gmra.mrb[8].mxu0 %vm677_vm5, %v671_v14  ;;  %v976_v39 = vsel %vm677_vm5, %v971_v38, 0  ;;  %v1173_v42 = vand.u32 %v1168_v41, %v4921_v40 }
 0x531   :  { %3345 = vmatpush3.bf16.xpose.msra.mxu0 %v1025_v37  ;;  %3346 = vmatprep.mubr.msk.bf16.mxu0 %vm4339_vm1, %v4338_v27 }
 0x532   :  { %3356 = vmatprep.subr.bf16.mxu0 %v4338_v27 }
 0x533   :  { %v1116_v43 = vpop.permute.xlu0 %1115  ;;  %v1264_v62 = vpop.permute.xlu1 %1263 }
 0x534   :  { %3329 = vmatmul.mubr.msk.bf16.vlgmr.msra.gmra.mrb[12].mxu1 %vm677_vm5, %v670_v18  ;;  %v1125_v44 = vand.u32 %v4921_v40, %v1116_v43  ;;  %v1269_v2 = vand.u32 %v1264_v62, %v4921_v40 }
 0x535   :  { %3339 = vmatpush3.bf16.xpose.msra.mxu1 %v976_v39  ;;  %3340 = vmatprep.mubr.msk.bf16.mxu1 %vm4339_vm1, %v4338_v27 }
 0x536   :  { %3350 = vmatprep.subr.bf16.mxu1 %v4338_v27 }
 0x537   :  { %v1216_v4 = vpop.permute.xlu0 %1215  ;;  %v1360_v38 = vpop.permute.xlu1 %1359 }
 0x538   :  { %3347 = vmatmul.mubr.msk.bf16.vlgmr.msra.gmra.mrb[12].mxu0 %vm677_vm5, %v4872_v20  ;;  %v1221_v8 = vand.u32 %v1216_v4, %v4921_v40  ;;  %v1365_v47 = vand.u32 %v1360_v38, %v4921_v40 }
 0x539   :  { %3357 = vmatpush3.bf16.msra.mxu0 %v1173_v42  ;;  %3358 = vmatprep.mubr.msk.bf16.mxu0 %vm4339_vm1, %v4338_v27 }
 0x53a   :  { %3368 = vmatprep.subr.bf16.mxu0 %v4338_v27 }
 0x53c   :  { %3341 = vmatmul.mubr.msk.bf16.vlgmr.msra.gmra.mrb[16].mxu1 %vm677_vm5, %v4876_v22 }
 0x53d   :  { %3351 = vmatpush3.bf16.msra.mxu1 %v1125_v44  ;;  %3352 = vmatprep.mubr.msk.bf16.mxu1 %vm4339_vm1, %v4338_v27 }
 0x53e   :  { %3362 = vmatprep.subr.bf16.mxu1 %v4338_v27 }
 0x59a   :  { %v767_v49 = vpop.f32.mrb[0].mxu0 }
 0x59b   :  { %v1068_v50 = vadd.f32 %v767_v49, %v4942_v48  ;;  %v3312_v51 = vpop.f32.mrb[1].mxu0 }
 0x59c   :  { %v770_v52 = vpop.f32.mrb[2].mxu0  ;;  %v1312_v51 = vpop.permute.xlu0 %1311 }
 0x59d   :  { %v1076_v0 = vsub.f32 %v1068_v50, %v1068_v50  ;;  %v3313_v54 = vpop.f32.mrb[3].mxu0 }
 0x59e   :  { %v718_v55 = vpop.f32.mrb[4].mxu1 }
 0x59f   :  { %v1085_v3 = vmul.f32 1.442695, %v1076_v0  ;;  %v1067_v56 = vadd.f32 %v718_v55, %v4946_v53  ;;  %v3306_v57 = vpop.f32.mrb[5].mxu1 }
 0x5a0   :  { %v721_v58 = vpop.f32.mrb[6].mxu1  ;;  %v1317_v57 = vand.u32 %v1312_v51, %v4921_v40 }
 0x5a1   :  { %3637 = vpow2.f32 %v1085_v3  ;;  %v1075_v59 = vsub.f32 %v1067_v56, %v1067_v56  ;;  %v3307_v60 = vpop.f32.mrb[7].mxu1 }
 0x5a2   :  { %v1456_v60 = vpop.permute.xlu1 %1455 }
 0x5a3   :  { %v1083_v61 = vmul.f32 1.442695, %v1075_v59 }
 0x5a5   :  { %3639 = vpow2.f32 %v1083_v61 }
 0x5ab   :  { %v4949_v63 = vpop.eup %3637 }
 0x5ac   :  { %v1108_v1 = vpack.c.bf16 %v4949_v63, %v4949_v63 }
 0x5ae   :  { %3359 = vmatmul.mubr.msk.bf16.vlgmr.msra.gmra.mrb[16].mxu0 %vm1117_vm12, %v1108_v1  ;;  %v1461_v1 = vand.u32 %v1456_v60, %v4921_v40 }
 0x5af   :  { %v4955_v6 = vpop.eup %3639  ;;  %3369 = vmatpush3.bf16.msra.mxu0 %v1269_v2  ;;  %3370 = vmatprep.mubr.msk.bf16.mxu0 %vm4339_vm1, %v4338_v27  ;;  %v1408_v2 = vpop.permute.xlu0 %1407 }
 0x5b0   :  { %v1107_v7 = vpack.c.bf16 %v4955_v6, %v4955_v6  ;;  %3380 = vmatprep.subr.bf16.mxu0 %v4338_v27 }
 0x5b2   :  { %3353 = vmatmul.mubr.msk.bf16.vlgmr.msra.gmra.mrb[20].mxu1 %vm1117_vm12, %v1107_v7 }
 0x5b3   :  { %3363 = vmatpush3.bf16.msra.mxu1 %v1221_v8  ;;  %3364 = vmatprep.mubr.msk.bf16.mxu1 %vm4339_vm1, %v4338_v27  ;;  %v1413_v8 = vand.u32 %v1408_v2, %v4921_v40 }
 0x5b4   :  { %3374 = vmatprep.subr.bf16.mxu1 %v4338_v27 }
 0x5fb   :  { %v865_v9 = vpop.f32.mrb[4].mxu0 }
 0x5fc   :  { %v1070_v11 = vadd.f32 %v865_v9, %v4942_v48  ;;  %v3324_v12 = vpop.f32.mrb[5].mxu0 }
 0x5fd   :  { %v868_v13 = vpop.f32.mrb[6].mxu0 }
 0x5fe   :  { %v1078_v14 = vsub.f32 %v1070_v11, %v1070_v11  ;;  %v3325_v15 = vpop.f32.mrb[7].mxu0 }
 0x5ff   :  { %v816_v16 = vpop.f32.mrb[8].mxu1 }
 0x600   :  { %v1089_v17 = vmul.f32 1.442695, %v1078_v14  ;;  %v1069_v18 = vadd.f32 %v816_v16, %v4946_v53  ;;  %v3318_v19 = vpop.f32.mrb[9].mxu1 }
 0x601   :  { %v819_v20 = vpop.f32.mrb[10].mxu1 }
 0x602   :  { %3641 = vpow2.f32 %v1089_v17  ;;  %v1077_v21 = vsub.f32 %v1069_v18, %v1069_v18  ;;  %v3319_v22 = vpop.f32.mrb[11].mxu1 }
 0x603   :  { %v963_v23 = vpop.f32.mrb[8].mxu0 }
 0x604   :  { %v1087_v24 = vmul.f32 1.442695, %v1077_v21  ;;  %v1072_v25 = vadd.f32 %v963_v23, %v4942_v48  ;;  %v3336_v26 = vpop.f32.mrb[9].mxu0 }
 0x605   :  { %v966_v28 = vpop.f32.mrb[10].mxu0 }
 0x606   :  { %3643 = vpow2.f32 %v1087_v24  ;;  %v1080_v29 = vsub.f32 %v1072_v25, %v1072_v25  ;;  %v3337_v30 = vpop.f32.mrb[11].mxu0 }
 0x607   :  { %v914_v31 = vpop.f32.mrb[12].mxu1 }
 0x608   :  { %v1093_v32 = vmul.f32 1.442695, %v1080_v29  ;;  %v1071_v33 = vadd.f32 %v914_v31, %v4946_v53  ;;  %v3330_v34 = vpop.f32.mrb[13].mxu1 }
 0x609   :  { %v917_v35 = vpop.f32.mrb[14].mxu1 }
 0x60a   :  { %3645 = vpow2.f32 %v1093_v32  ;;  %v1079_v36 = vsub.f32 %v1071_v33, %v1071_v33  ;;  %v3331_v37 = vpop.f32.mrb[15].mxu1 }
 0x60b   :  { %v1061_v39 = vpop.f32.mrb[12].mxu0 }
 0x60c   :  { %v3642_v41 = vpop.eup %3641  ;;  %v1091_v42 = vmul.f32 1.442695, %v1079_v36  ;;  %v1074_v43 = vadd.f32 %v1061_v39, %v4942_v48  ;;  %v3348_v44 = vpop.f32.mrb[13].mxu0 }
 0x60d   :  { %v1064_v45 = vpop.f32.mrb[14].mxu0  ;;  %v1110_v46 = vpack.c.bf16 %v3642_v41, %v3642_v41 }
 0x60e   :  { %3647 = vpow2.f32 %v1091_v42  ;;  %v1082_v49 = vsub.f32 %v1074_v43, %v1074_v43  ;;  %v3349_v50 = vpop.f32.mrb[15].mxu0 }
 0x60f   :  { %v1012_v52 = vpop.f32.mrb[16].mxu1  ;;  %3371 = vmatmul.mubr.msk.bf16.vlgmr.msra.gmra.mrb[20].mxu0 %vm1117_vm12, %v1110_v46  ;;  %v3621_v46 = vld [vmem:[#allocation19] sm:$0xff]  }
 0x610   :  { %v3644_v0 = vpop.eup %3643  ;;  %v1097_v54 = vmul.f32 1.442695, %v1082_v49  ;;  %v1073_v55 = vadd.f32 %v1012_v52, %v4946_v53  ;;  %3381 = vmatpush3.bf16.msra.mxu0 %v1365_v47  ;;  %v3342_v3 = vpop.f32.mrb[17].mxu1  ;;  %3382 = vmatprep.mubr.msk.bf16.mxu0 %vm4339_vm1, %v4338_v27 }
 0x611   :  { %3649 = vrcp.f32 %v3644_v0  ;;  %v1015_v48 = vpop.f32.mrb[18].mxu1  ;;  %v1109_v56 = vpack.c.bf16 %v3644_v0, %v3644_v0  ;;  %3392 = vmatprep.subr.bf16.mxu0 %v4338_v27  ;;  %v3622_v3 = vld [vmem:[#allocation19 + $0x8] sm:$0xff]  }
 0x612   :  { %3651 = vpow2.f32 %v1097_v54  ;;  %v1081_v58 = vsub.f32 %v1073_v55, %v1073_v55  ;;  %v3343_v59 = vpop.f32.mrb[19].mxu1 }
 0x613   :  { %3365 = vmatmul.mubr.msk.bf16.vlgmr.msra.gmra.mrb[24].mxu1 %vm1117_vm12, %v1109_v56  ;;  %3653 = vrcp.f32 %v3642_v41 }
 0x614   :  { %v3646_v61 = vpop.eup %3645  ;;  %v1095_v53 = vmul.f32 1.442695, %v1081_v58  ;;  %3375 = vmatpush3.bf16.msra.mxu1 %v1317_v57  ;;  %3376 = vmatprep.mubr.msk.bf16.mxu1 %vm4339_vm1, %v4338_v27 }
 0x615   :  { %3655 = vrcp.f32 %v3646_v61  ;;  %v1112_v62 = vpack.c.bf16 %v3646_v61, %v3646_v61  ;;  %3386 = vmatprep.subr.bf16.mxu1 %v4338_v27 }
 0x616   :  { %3657 = vpow2.f32 %v1095_v53 }
 0x617   :  { %3383 = vmatmul.mubr.msk.bf16.vlgmr.msra.gmra.mrb[24].mxu0 %vm1117_vm12, %v1112_v62 }
 0x618   :  { %v3648_v4 = vpop.eup %3647  ;;  %3393 = vmatpush3.bf16.msra.mxu0 %v1461_v1  ;;  %3394 = vmatprep.mubr.msk.bf16.mxu0 %vm4339_vm1, %v4338_v27 }
 0x619   :  { %3659 = vrcp.f32 %v3648_v4  ;;  %v1111_v7 = vpack.c.bf16 %v3648_v4, %v3648_v4  ;;  %3406 = vmatprep.subr.bf16.mxu0 %v4338_v27 }
 0x61a   :  { %3661 = vrcp.f32 %v4949_v63 }
 0x61b   :  { %v3650_v9 = vpop.eup %3649  ;;  %3377 = vmatmul.mubr.msk.bf16.vlgmr.msra.gmra.mrb[28].mxu1 %vm1117_vm12, %v1111_v7 }
 0x61c   :  { %v3652_v11 = vpop.eup %3651  ;;  %3387 = vmatpush3.bf16.msra.mxu1 %v1413_v8  ;;  %1523 = vperm.xlu1 %3587, %v3650_v9  }
 0x61d   :  { %3663 = vrcp.f32 %v3652_v11  ;;  %v1114_v12 = vpack.c.bf16 %v3652_v11, %v3652_v11  ;;  %3388 = vmatprep.mubr.msk.bf16.mxu1 %vm4339_vm1, %v4338_v27  ;;  %3398 = vmatprep.subr.bf16.mxu1 %v4338_v27  ;;  %v3654_v13 = vpop.eup %3653 }
 0x61f   :  { %v3656_v14 = vpop.eup %3655  ;;  %3395 = vmatmul.mubr.msk.bf16.vlgmr.msra.gmra.mrb[28].mxu0 %vm1117_vm12, %v1114_v12 }
 0x620   :  { %v3658_v40 = vpop.eup %3657  ;;  %1538 = vperm.xlu0 %3588, %v3656_v14   ;;  %1528 = vperm.xlu1 %3587, %v3654_v13  }
 0x621   :  { %3665 = vrcp.f32 %v3658_v40  ;;  %v1113_v15 = vpack.c.bf16 %v3658_v40, %v3658_v40  ;;  %3410 = vmatprep.mubr.msk.bf16.mxu0 %vm4339_vm1, %v4338_v27 }
 0x622   :  { %3667 = vrcp.f32 %v4955_v6 }
 0x623   :  { %v3660_v63 = vpop.eup %3659  ;;  %3389 = vmatmul.mubr.msk.bf16.vlgmr.msra.gmra.mrb[32].mxu1 %vm1117_vm12, %v1113_v15 }
 0x624   :  { %1533 = vperm.xlu0 %3588, %v3660_v63   ;;  %3402 = vmatprep.mubr.msk.bf16.mxu1 %vm4339_vm1, %v4338_v27  ;;  %v3662_v16 = vpop.eup %3661 }
 0x625   :  { %3399 = vmatpush3.bf16.msra.mxu1 %v3621_v46  ;;  %v3623_v46 = vld [vmem:[#allocation25] sm:$0xff]  }
 0x626   :  { %3400 = vmatprep.subr.bf16.mxu1 %v4338_v27 }
 0x627   :  { %v3664_v17 = vpop.eup %3663 }
 0x628   :  { %1548 = vperm.xlu1 %3587, %v3664_v17   ;;  %1518 = vperm.xlu0 %3588, %v3662_v16  }
 0x629   :  { %3401 = vmatpush3.bf16.msra.mxu1 %v3622_v3 }
 0x62a   :  { %3414 = vmatprep.subr.bf16.mxu1 %v4338_v27 }
 0x62b   :  { %v3666_v18 = vpop.eup %3665 }
 0x62c   :  { %1543 = vperm.xlu1 %3587, %v3666_v18   ;;  %v3668_v19 = vpop.eup %3667 }
 0x630   :  { %1513 = vperm.xlu1 %3587, %v3668_v19  }
 0x681   :  { %v1209_v20 = vpop.f32.mrb[16].mxu0 }
 0x682   :  { %v3360_v21 = vpop.f32.mrb[17].mxu0 }
 0x683   :  { %v1212_v22 = vpop.f32.mrb[18].mxu0 }
 0x684   :  { %v3361_v23 = vpop.f32.mrb[19].mxu0 }
 0x685   :  { %v5001_v24 = vpop.f32.mrb[20].mxu1 }
 0x686   :  { %v3354_v25 = vpop.f32.mrb[21].mxu1 }
 0x687   :  { %v1164_v26 = vpop.f32.mrb[22].mxu1 }
 0x688   :  { %v3355_v28 = vpop.f32.mrb[23].mxu1 }
 0x69b   :  { %v1524_v29 = vpop.permute.xlu1 %1523 }
 0x69f   :  { %v1529_v33 = vpop.permute.xlu1 %1528  ;;  %v1539_v38 = vpop.permute.xlu0 %1538 }
 0x6a3   :  { %v1534_v49 = vpop.permute.xlu0 %1533 }
 0x6a7   :  { %v1549_v54 = vpop.permute.xlu1 %1548  ;;  %v1519_v8 = vpop.permute.xlu0 %1518 }
 0x6a8   :  { %v1552_v13 = vmul.f32 %v1519_v8, %v1209_v20 }
 0x6ab   :  { %v1544_v53 = vpop.permute.xlu1 %1543 }
 0x6af   :  { %v1514_v11 = vpop.permute.xlu1 %1513 }
 0x6b0   :  { %v1551_v18 = vmul.f32 %v1514_v11, %v5001_v24  ;;  %v3161_v24 = vld [vmem:[#allocation20] ss:$0 sm:$0xff] }
 0x6e2   :  { %v1305_v30 = vpop.f32.mrb[20].mxu0 }
 0x6e3   :  { %v3372_v6 = vpop.f32.mrb[21].mxu0  ;;  %v1554_v35 = vmul.f32 %v1529_v33, %v1305_v30 }
 0x6e4   :  { %v1308_v31 = vpop.f32.mrb[22].mxu0 }
 0x6e5   :  { %v3373_v32 = vpop.f32.mrb[23].mxu0 }
 0x6e6   :  { %v1257_v34 = vpop.f32.mrb[24].mxu1 }
 0x6e7   :  { %v1553_v36 = vmul.f32 %v1524_v29, %v1257_v34  ;;  %v3366_v37 = vpop.f32.mrb[25].mxu1 }
 0x6e8   :  { %v1260_v39 = vpop.f32.mrb[26].mxu1 }
 0x6e9   :  { %v3367_v41 = vpop.f32.mrb[27].mxu1  ;;  %v3589_v42 = vpack.i.bf16 %v1553_v36, %v1554_v35 }
 0x6ea   :  { %v1401_v43 = vpop.f32.mrb[24].mxu0 }
 0x6eb   :  { %v3384_v44 = vpop.f32.mrb[25].mxu0  ;;  %3590 = vrot.lane.b32.xlu0 %v3589_v42, %s5339_s5  ;;  %v1556_v51 = vmul.f32 %v1539_v38, %v1401_v43 }
 0x6ec   :  { %v1404_v45 = vpop.f32.mrb[26].mxu0 }
 0x6ed   :  { %v3385_v47 = vpop.f32.mrb[27].mxu0 }
 0x6ee   :  { %v1353_v50 = vpop.f32.mrb[28].mxu1  ;;  %v3624_v47 = vld [vmem:[#allocation22] sm:$0xff]  }
 0x6ef   :  { %v1555_v52 = vmul.f32 %v1534_v49, %v1353_v50  ;;  %v3378_v0 = vpop.f32.mrb[29].mxu1  ;;  %v383_v49 = vld [vmem:[#allocation5] sm:$0xff]  ;;  %v384_v50 = vld [vmem:[#allocation5 + $0x8] sm:$0xff]  ;;  %3407 = vmatpush3.bf16.msra.mxu0 %v3624_v47 }
 0x6f0   :  { %v1356_v55 = vpop.f32.mrb[30].mxu1  ;;  %3408 = vmatprep.subr.bf16.mxu0 %v4338_v27 }
 0x6f1   :  { %v3379_v48 = vpop.f32.mrb[31].mxu1  ;;  %v3594_v56 = vpack.i.bf16 %v1555_v52, %v1556_v51  ;;  %v1763_v51 = vpack.c.bf16 %v384_v50, %v383_v49  ;;  %v3626_v52 = vld [vmem:[#allocation22 + $0x8] sm:$0xff]  }
 0x6f2   :  { %v1497_v57 = vpop.f32.mrb[28].mxu0  ;;  %v3165_v48 = vld [vmem:[#allocation13] ss:$0 sm:$0xff] }
 0x6f3   :  { %v1558_v58 = vmul.f32 %v1549_v54, %v1497_v57  ;;  %v3396_v59 = vpop.f32.mrb[29].mxu0  ;;  %3595 = vrot.lane.b32.xlu1 %v3594_v56, %s4312_s7  ;;  %3409 = vmatpush3.bf16.msra.mxu0 %v3626_v52  ;;  %v3166_v57 = vld [vmem:[#allocation14] ss:$0 sm:$0xff] }
 0x6f4   :  { %v1500_v60 = vpop.f32.mrb[30].mxu0  ;;  %3422 = vmatprep.subr.bf16.mxu0 %v4338_v27 }
 0x6f5   :  { %v3397_v61 = vpop.f32.mrb[31].mxu0  ;;  %1579 = vrot.lane.b32.xlu0 %v1558_v58, %s4345_s15 }
 0x6f6   :  { %v1449_v62 = vpop.f32.mrb[32].mxu1  ;;  %v3171_v61 = vld [vmem:[#allocation26] ss:$0 sm:$0xff] }
 0x6f7   :  { %v1557_v1 = vmul.f32 %v1544_v53, %v1449_v62  ;;  %v3390_v2 = vpop.f32.mrb[33].mxu1 }
 0x6f8   :  { %v1452_v4 = vpop.f32.mrb[34].mxu1 }
 0x6f9   :  { %1577 = vrot.lane.b32.xlu1 %v1557_v1, %s4345_s15  ;;  %v3391_v7 = vpop.f32.mrb[35].mxu1 }
 0x75d   :  { %v3591_v9 = vpop.permute.xlu0 %3590 }
 0x75e   :  { %v3592_v12 = vunpack.i.l.bf16 %v3591_v9  ;;  %v3593_v40 = vunpack.i.h.bf16 %v3591_v9 }
 0x760   :  { %v1584_v17 = vsel %vm677_vm5, %v1552_v13, %v3592_v12  ;;  %v1583_v23 = vsel %vm677_vm5, %v1551_v18, %v3593_v40  ;;  %v3167_v13 = vld [vmem:[#allocation23] ss:$0 sm:$0xff] }
 0x765   :  { %v3596_v14 = vpop.permute.xlu1 %3595 }
 0x766   :  { %v3597_v15 = vunpack.i.l.bf16 %v3596_v14  ;;  %v3598_v63 = vunpack.i.h.bf16 %v3596_v14 }
 0x767   :  { %v1580_v16 = vpop.permute.xlu0 %1579 }
 0x768   :  { %v1587_v19 = vsel %vm1585_vm13, %v1584_v17, %v3597_v15  ;;  %v1586_v20 = vsel %vm1585_vm13, %v1583_v23, %v3598_v63 }
 0x769   :  { %v1590_v21 = vsel %vm1588_vm14, %v1587_v19, %v1580_v16 }
 0x76a   :  { %v1592_v22 = vpack.c.bf16 %v1590_v21, %v1590_v21 }
 0x76b   :  { %v1578_v25 = vpop.permute.xlu1 %1577 }
 0x76c   :  { %v1607_v26 = vunpack.c.l.b16 %v1592_v22  ;;  %v1589_v28 = vsel %vm1588_vm14, %v1586_v20, %v1578_v25 }
 0x76d   :  { %v1591_v29 = vpack.c.bf16 %v1589_v28, %v1589_v28 }
 0x76e   :  { %v1608_v30 = vrot.slane %v1607_v26, 7 }
 0x76f   :  { %v1606_v6 = vunpack.c.l.b16 %v1591_v29 }
 0x771   :  { %v1609_v31 = vsel %vm564_vm3, %v1608_v30, %v1606_v6 }
 0x772   :  { %v1610_v32 = vpack.c.b16 %v1609_v31, %v1609_v31 }
 0x774   :  { %3403 = vmatmul.mubr.msk.bf16.vlgmr.msra.gmra.mrb[36].mxu1 %vm579_vm4, %v1610_v32 }
 0x775   :  { %3418 = vmatprep.mubr.msk.bf16.mxu1 %vm4339_vm1, %v4338_v27  ;;  %3415 = vmatpush3.bf16.msra.mxu1 %v3623_v46 }
 0x776   :  { %3416 = vmatprep.subr.bf16.mxu1 %v4338_v27 }
 0x847   :  { %v1660_v33 = vpop.f32.mrb[36].mxu1 }
 0x848   :  { %v1661_v34 = vadd.f32 %v3161_v24, %v1660_v33  ;;  %v3404_v35 = vpop.f32.mrb[37].mxu1 }
 0x849   :  { %v1663_v36 = vpop.f32.mrb[38].mxu1 }
 0x84a   :  { %v5021_v37 = vadd.f32 %v1661_v34, %v4826_v10  ;;  %v3405_v38 = vpop.f32.mrb[39].mxu1  ;;  %v3625_v10 = vld [vmem:[#allocation25 + $0x8] sm:$0xff]  }
 0x84b   :  { %3417 = vmatpush3.bf16.msra.mxu1 %v3625_v10 }
 0x84c   :  { %v1669_v39 = vsel %vm426_vm0, %v5021_v37, 0.0  ;;  %3428 = vmatprep.subr.bf16.mxu1 %v4338_v27 }
 0x84d   :  { %1670 = vadd.xlane.f32.xlu0 %v1669_v39 }
 0x84e   :  { %3419 = vmatmul.mubr.msk.bf16.vlgmr.msra.gmra.mrb[40].mxu1 %vm579_vm4, %v1763_v51 }
 0x84f   :  { %3430 = vmatprep.mubr.msk.bf16.mxu1 %vm4339_vm1, %v4338_v27 }
 0x8da   :  { %v1671_v41 = vpop.xlane.xlu0 %1670 }
 0x8db   :  { %v1672_v42 = vmul.f32 0.03125, %v1671_v41 }
 0x8dd   :  { %v1673_v43 = vsub.f32 %v5021_v37, %v1672_v42 }
 0x8df   :  { %v1674_v44 = vmul.f32 %v1673_v43, %v1673_v43 }
 0x8e1   :  { %v1675_v45 = vsel %vm426_vm0, %v1674_v44, 0.0 }
 0x8e2   :  { %1676 = vadd.xlane.f32.xlu1 %v1675_v45 }
 0x921   :  { %v1824_v53 = vpop.f32.mrb[40].mxu1 }
 0x922   :  { %v1825_v62 = vadd.f32 %v3171_v61, %v1824_v53  ;;  %v3420_v1 = vpop.f32.mrb[41].mxu1 }
 0x923   :  { %v1827_v2 = vpop.f32.mrb[42].mxu1 }
 0x924   :  { %v1828_v4 = vadd.f32 %v3171_v61, %v1827_v2  ;;  %1884 = vrot.lane.b32.xlu1 %v1825_v62, %s4341_s0  ;;  %v3421_v7 = vpop.f32.mrb[43].mxu1  ;;  %v1902_v8 = vpack.c.bf16 %v1825_v62, %v1825_v62  ;;  %v401_v61 = vld [vmem:[#allocation8 + $0x1] sm:$0x1] }
 0x925   :  { %vm403_vm7 = vcmp.gt.f32.partialorder %v401_v61, 0.0 }
 0x926   :  { %1886 = vrot.lane.b32.xlu0 %v1828_v4, %s4341_s0  ;;  %v1914_v9 = vsel %vm677_vm5, %v1902_v8, 0  ;;  %v1903_v11 = vpack.c.bf16 %v1828_v4, %v1828_v4 }
 0x928   :  { %v1960_v12 = vsel %vm677_vm5, %v1903_v11, 0  ;;  %1892 = vrot.lane.b32.xlu1 %v1828_v4, %s4340_s18 }
 0x929   :  { %3429 = vmatpush3.bf16.xpose.msra.mxu1 %v1960_v12 }
 0x92a   :  { %3440 = vmatprep.subr.bf16.mxu1 %v4338_v27 }
 0x96f   :  { %v1677_v0 = vpop.xlane.xlu1 %1676 }
 0x970   :  { %v1678_v54 = vmul.f32 0.03125, %v1677_v0 }
 0x972   :  { %v1679_v55 = vadd.f32 1e-06, %v1678_v54 }
 0x974   :  { %3669 = vrsqrt.f32 %v1679_v55 }
 0x97e   :  { %v3670_v3 = vpop.eup %3669 }
 0x97f   :  { %v1681_v56 = vmul.f32 %v3670_v3, %v1673_v43 }
 0x981   :  { %v1688_v58 = vmul.f32 %v3165_v48, %v1681_v56 }
 0x983   :  { %v1695_v59 = vadd.f32 %v3166_v57, %v1688_v58 }
 0x985   :  { %v1696_v60 = vpack.c.bf16 %v1695_v59, %v1695_v59 }
 0x987   :  { %3411 = vmatmul.mubr.msk.bf16.vlgmr.msra.gmra.mrb[32].mxu0 %vm579_vm4, %v1696_v60  ;;  %v400_v60 = vld [vmem:[#allocation8] sm:$0x1] }
 0x988   :  { %3424 = vmatprep.mubr.msk.bf16.mxu0 %vm4339_vm1, %v4338_v27  ;;  %3423 = vmatpush3.bf16.xpose.msra.mxu0 %v1914_v9  ;;  %vm402_vm6 = vcmp.gt.f32.partialorder %v400_v60, 0.0 }
 0x989   :  { %3434 = vmatprep.subr.bf16.mxu0 %v4338_v27  ;;  %v5111_v53 = vsel %vm402_vm6, -1e+18, %v4338_v27 }
 0x996   :  { %v1885_v16 = vpop.permute.xlu1 %1884 }
 0x997   :  { %v1904_v19 = vpack.c.bf16 %v1885_v16, %v1885_v16 }
 0x998   :  { %v1887_v23 = vpop.permute.xlu0 %1886 }
 0x999   :  { %v2006_v26 = vsel %vm677_vm5, %v1904_v19, 0  ;;  %v1905_v28 = vpack.c.bf16 %v1887_v23, %v1887_v23 }
 0x99a   :  { %v1893_v31 = vpop.permute.xlu1 %1892 }
 0x99b   :  { %v2052_v6 = vsel %vm677_vm5, %v1905_v28, 0  ;;  %v5068_v33 = vpack.c.bf16 %v1893_v31, %v1893_v31 }
 0x99d   :  { %v2144_v41 = vsel %vm677_vm5, %v5068_v33, 0 }
 0xa5a   :  { %v1757_v14 = vpop.f32.mrb[32].mxu0 }
 0xa5b   :  { %v1758_v40 = vadd.f32 %v3167_v13, %v1757_v14  ;;  %v3412_v15 = vpop.f32.mrb[33].mxu0 }
 0xa5c   :  { %v1760_v63 = vpop.f32.mrb[34].mxu0 }
 0xa5d   :  { %v1838_v17 = vrot.slane %v1758_v40, %v4822_v5  ;;  %v3413_v18 = vpop.f32.mrb[35].mxu0 }
 0xa5f   :  { %v1839_v21 = vcombine.high %v1838_v17, %v1838_v17  ;;  %v1846_v22 = vrot.slane %v1838_v17, %v4822_v5 }
 0xa61   :  { %v1853_v20 = vrot.slane %v1839_v21, %v4822_v5  ;;  %v1874_v25 = vpack.c.bf16 %v1846_v22, %v1846_v22 }
 0xa63   :  { %3425 = vmatmul.mubr.msk.bf16.vlgmr.msra.gmra.mrb[36].mxu0 %vm677_vm5, %v1874_v25  ;;  %v3604_v29 = vpack.i.bf16 %v1846_v22, %v1853_v20  ;;  %v1875_v30 = vpack.c.bf16 %v1853_v20, %v1853_v20 }
 0xa64   :  { %3435 = vmatpush3.bf16.xpose.msra.mxu0 %v2006_v26  ;;  %3436 = vmatprep.mubr.msk.bf16.mxu0 %vm4339_vm1, %v4338_v27 }
 0xa65   :  { %3605 = vrot.lane.b32.xlu1 %v3604_v29, %s4340_s18  ;;  %3600 = vrot.lane.b32.xlu0 %v3604_v29, %s4341_s0 }
 0xa66   :  { %3431 = vmatmul.mubr.msk.bf16.vlgmr.msra.gmra.mrb[44].mxu1 %vm677_vm5, %v1875_v30  ;;  %3446 = vmatprep.subr.bf16.mxu0 %v4338_v27 }
 0xa67   :  { %3441 = vmatpush3.bf16.xpose.msra.mxu1 %v2052_v6  ;;  %3442 = vmatprep.mubr.msk.bf16.mxu1 %vm4339_vm1, %v4338_v27 }
 0xa68   :  { %3452 = vmatprep.subr.bf16.mxu1 %v4338_v27 }
 0xa69   :  { %1896 = vrot.lane.b32.xlu1 %v1825_v62, %s4342_s3  ;;  %1890 = vrot.lane.b32.xlu0 %v1825_v62, %s4340_s18 }
 0xa6d   :  { %1868 = vrot.lane.b32.xlu1 %v1846_v22, %s4342_s3  ;;  %1898 = vrot.lane.b32.xlu0 %v1828_v4, %s4342_s3  ;;  %v405_v4 = vsel %vm403_vm7, -1e+18, %v4338_v27 }
 0xa71   :  { %1870 = vrot.lane.b32.xlu0 %v1853_v20, %s4342_s3  ;;  %2418 = vrot.lane.b32.xlu1 %v1903_v11, %s4343_s8 }
 0xa75   :  { %2368 = vrot.lane.b32.xlu0 %v1902_v8, %s4343_s8  ;;  %2516 = vrot.lane.b32.xlu1 %v1905_v28, %s4343_s8 }
 0xa79   :  { %2467 = vrot.lane.b32.xlu1 %v1904_v19, %s4343_s8 }
 0xad7   :  { %v3606_v32 = vpop.permute.xlu1 %3605  ;;  %v3601_v24 = vpop.permute.xlu0 %3600 }
 0xad8   :  { %v3603_v34 = vunpack.i.h.bf16 %v3601_v24  ;;  %v3602_v35 = vunpack.i.l.bf16 %v3601_v24  ;;  %v3607_v44 = vunpack.i.l.bf16 %v3606_v32  ;;  %v3608_v47 = vunpack.i.h.bf16 %v3606_v32 }
 0xada   :  { %v1876_v36 = vpack.c.bf16 %v3603_v34, %v3603_v34  ;;  %v1877_v38 = vpack.c.bf16 %v3602_v35, %v3602_v35  ;;  %v1879_v49 = vpack.c.bf16 %v3607_v44, %v3607_v44  ;;  %v1878_v0 = vpack.c.bf16 %v3608_v47, %v3608_v47 }
 0xadb   :  { %v1891_v39 = vpop.permute.xlu0 %1890  ;;  %v1897_v43 = vpop.permute.xlu1 %1896 }
 0xadc   :  { %v5072_v42 = vpack.c.bf16 %v1891_v39, %v1891_v39  ;;  %3437 = vmatmul.mubr.msk.bf16.vlgmr.msra.gmra.mrb[40].mxu0 %vm677_vm5, %v1876_v36  ;;  %3443 = vmatmul.mubr.msk.bf16.vlgmr.msra.gmra.mrb[48].mxu1 %vm677_vm5, %v1877_v38  ;;  %v5086_v50 = vpack.c.bf16 %v1897_v43, %v1897_v43 }
 0xadd   :  { %3453 = vmatpush3.bf16.xpose.msra.mxu1 %v2144_v41  ;;  %3454 = vmatprep.mubr.msk.bf16.mxu1 %vm4339_vm1, %v4338_v27 }
 0xade   :  { %v2098_v45 = vsel %vm677_vm5, %v5072_v42, 0  ;;  %3464 = vmatprep.subr.bf16.mxu1 %v4338_v27  ;;  %3448 = vmatprep.mubr.msk.bf16.mxu0 %vm4339_vm1, %v4338_v27  ;;  %v2190_v55 = vsel %vm677_vm5, %v5086_v50, 0 }
 0xadf   :  { %v1899_v46 = vpop.permute.xlu0 %1898  ;;  %3447 = vmatpush3.bf16.xpose.msra.mxu0 %v2098_v45  ;;  %v1869_v52 = vpop.permute.xlu1 %1868 }
 0xae0   :  { %v5083_v10 = vpack.c.bf16 %v1899_v46, %v1899_v46  ;;  %3458 = vmatprep.subr.bf16.mxu0 %v4338_v27  ;;  %v1880_v57 = vpack.c.bf16 %v1869_v52, %v1869_v52 }
 0xae2   :  { %v2236_v51 = vsel %vm677_vm5, %v5083_v10, 0 }
 0xae3   :  { %v1871_v54 = vpop.permute.xlu0 %1870  ;;  %v2419_v3 = vpop.permute.xlu1 %2418 }
 0xae4   :  { %3455 = vmatmul.mubr.msk.bf16.vlgmr.msra.gmra.mrb[52].mxu1 %vm677_vm5, %v1879_v49  ;;  %v1881_v48 = vpack.c.bf16 %v1871_v54, %v1871_v54  ;;  %v2424_v58 = vsel %vm2373_vm15, %v2419_v3, 0 }
 0xae5   :  { %3465 = vmatpush3.bf16.xpose.msra.mxu1 %v2236_v51  ;;  %3466 = vmatprep.mubr.msk.bf16.mxu1 %vm4339_vm1, %v4338_v27 }
 0xae6   :  { %3449 = vmatmul.mubr.msk.bf16.vlgmr.msra.gmra.mrb[44].mxu0 %vm677_vm5, %v1878_v0  ;;  %3476 = vmatprep.subr.bf16.mxu1 %v4338_v27 }
 0xae7   :  { %3459 = vmatpush3.bf16.xpose.msra.mxu0 %v2190_v55  ;;  %3460 = vmatprep.mubr.msk.bf16.mxu0 %vm4339_vm1, %v4338_v27  ;;  %v2369_v56 = vpop.permute.xlu0 %2368  ;;  %v2517_v39 = vpop.permute.xlu1 %2516 }
 0xae8   :  { %3470 = vmatprep.subr.bf16.mxu0 %v4338_v27  ;;  %v2375_v59 = vsel %vm2373_vm15, %v2369_v56, 0 }
 0xaeb   :  { %v2468_v51 = vpop.permute.xlu1 %2467 }
 0xaec   :  { %3467 = vmatmul.mubr.msk.bf16.vlgmr.msra.gmra.mrb[56].mxu1 %vm677_vm5, %v1881_v48  ;;  %v2473_v61 = vsel %vm2373_vm15, %v2468_v51, 0 }
 0xaed   :  { %3477 = vmatpush3.bf16.msra.mxu1 %v2424_v58  ;;  %3478 = vmatprep.mubr.msk.bf16.mxu1 %vm4339_vm1, %v4338_v27 }
 0xaee   :  { %3461 = vmatmul.mubr.msk.bf16.vlgmr.msra.gmra.mrb[48].mxu0 %vm677_vm5, %v1880_v57  ;;  %3488 = vmatprep.subr.bf16.mxu1 %v4338_v27 }
 0xaef   :  { %3471 = vmatpush3.bf16.msra.mxu0 %v2375_v59  ;;  %3472 = vmatprep.mubr.msk.bf16.mxu0 %vm4339_vm1, %v4338_v27 }
 0xaf0   :  { %3482 = vmatprep.subr.bf16.mxu0 %v4338_v27 }
 0xb36   :  { %v1950_v62 = vpop.f32.mrb[36].mxu0 }
 0xb37   :  { %v2278_v1 = vadd.f32 %v1950_v62, %v5111_v53  ;;  %v3426_v2 = vpop.f32.mrb[37].mxu0 }
 0xb38   :  { %v1953_v7 = vpop.f32.mrb[38].mxu0 }
 0xb39   :  { %v1996_v8 = vpop.f32.mrb[44].mxu1  ;;  %v3427_v9 = vpop.f32.mrb[39].mxu0  ;;  %v2287_v11 = vsel %vm2286_vm8, %v2278_v1, -inf }
 0xb3a   :  { %v2279_v12 = vadd.f32 %v1996_v8, %v405_v4  ;;  %v3432_v13 = vpop.f32.mrb[45].mxu1  ;;  %2288 = vmax.xlane.f32.xlu1 %v2287_v11 }
 0xb3b   :  { %v1999_v14 = vpop.f32.mrb[46].mxu1 }
 0xb3c   :  { %v3433_v40 = vpop.f32.mrb[47].mxu1  ;;  %v2290_v15 = vsel %vm2286_vm8, %v2279_v12, -inf }
 0xb3d   :  { %2291 = vmax.xlane.f32.xlu0 %v2290_v15 }
 0xb4b   :  { %2565 = vrot.lane.b32.xlu1 %v5072_v42, %s4343_s8 }
 0xbaf   :  { %v2042_v63 = vpop.f32.mrb[40].mxu0  ;;  %v2088_v16 = vpop.f32.mrb[48].mxu1 }
 0xbb0   :  { %v5120_v17 = vadd.f32 %v2042_v63, %v5111_v53  ;;  %v3438_v18 = vpop.f32.mrb[41].mxu0  ;;  %v3444_v19 = vpop.f32.mrb[49].mxu1  ;;  %v5122_v23 = vadd.f32 %v2088_v16, %v405_v4 }
 0xbb1   :  { %v2045_v21 = vpop.f32.mrb[42].mxu0  ;;  %v2091_v22 = vpop.f32.mrb[50].mxu1 }
 0xbb2   :  { %v3439_v20 = vpop.f32.mrb[43].mxu0  ;;  %v3445_v25 = vpop.f32.mrb[51].mxu1  ;;  %v2293_v26 = vsel %vm2286_vm8, %v5120_v17, -inf  ;;  %v2296_v28 = vsel %vm2286_vm8, %v5122_v23, -inf }
 0xbb3   :  { %2294 = vmax.xlane.f32.xlu0 %v2293_v26 }
 0xbb7   :  { %2297 = vmax.xlane.f32.xlu0 %v2296_v28  ;;  %v2180_v29 = vpop.f32.mrb[52].mxu1 }
 0xbb8   :  { %v5128_v30 = vadd.f32 %v2180_v29, %v405_v4  ;;  %v3456_v6 = vpop.f32.mrb[53].mxu1 }
 0xbb9   :  { %v2134_v31 = vpop.f32.mrb[44].mxu0  ;;  %v2183_v32 = vpop.f32.mrb[54].mxu1 }
 0xbba   :  { %v3450_v24 = vpop.f32.mrb[45].mxu0  ;;  %v3457_v34 = vpop.f32.mrb[55].mxu1  ;;  %v2302_v35 = vsel %vm2286_vm8, %v5128_v30, -inf }
 0xbbb   :  { %v2137_v36 = vpop.f32.mrb[46].mxu0  ;;  %2303 = vmax.xlane.f32.xlu1 %v2302_v35 }
 0xbbc   :  { %v3451_v38 = vpop.f32.mrb[47].mxu0 }
 0xbbf   :  { %v2272_v41 = vpop.f32.mrb[56].mxu1 }
 0xbc0   :  { %v5132_v42 = vadd.f32 %v2272_v41, %v405_v4  ;;  %v3468_v43 = vpop.f32.mrb[57].mxu1 }
 0xbc1   :  { %v2226_v44 = vpop.f32.mrb[48].mxu0  ;;  %v2275_v45 = vpop.f32.mrb[58].mxu1 }
 0xbc2   :  { %v3462_v46 = vpop.f32.mrb[49].mxu0  ;;  %v3469_v47 = vpop.f32.mrb[59].mxu1  ;;  %v2308_v49 = vsel %vm2286_vm8, %v5132_v42, -inf }
 0xbc3   :  { %v2229_v52 = vpop.f32.mrb[50].mxu0  ;;  %2309 = vmax.xlane.f32.xlu1 %v2308_v49 }
 0xbc4   :  { %v3463_v0 = vpop.f32.mrb[51].mxu0 }
 0xbc7   :  { %v2289_v54 = vpop.xlane.xlu1 %2288 }
 0xbc8   :  { %v2311_v55 = vsub.f32 %v2278_v1, %v2289_v54  ;;  %v2284_v1 = vadd.f32 %v2226_v44, %v5111_v53 }
 0xbca   :  { %v2319_v3 = vmul.f32 1.442695, %v2311_v55  ;;  %v2292_v48 = vpop.xlane.xlu0 %2291  ;;  %v2305_v4 = vsel %vm2286_vm8, %v2284_v1, -inf }
 0xbcb   :  { %v2312_v56 = vsub.f32 %v2279_v12, %v2292_v48  ;;  %v2566_v11 = vpop.permute.xlu1 %2565 }
 0xbcc   :  { %3671 = vpow2.f32 %v2319_v3  ;;  %v2571_v19 = vsel %vm2373_vm15, %v2566_v11, 0 }
 0xbcd   :  { %v2321_v57 = vmul.f32 1.442695, %v2312_v56  ;;  %2614 = vrot.lane.b32.xlu0 %v5068_v33, %s4343_s8  ;;  %v2522_v33 = vsel %vm2373_vm15, %v2517_v39, 0 }
 0xbcf   :  { %3673 = vpow2.f32 %v2321_v57 }
 0xbd4   :  { %2663 = vrot.lane.b32.xlu1 %v5086_v50, %s4343_s8  ;;  %v2282_v50 = vadd.f32 %v2134_v31, %v5111_v53 }
 0xbd6   :  { %v5140_v58 = vpop.eup %3671  ;;  %v2299_v2 = vsel %vm2286_vm8, %v2282_v50, -inf }
 0xbd7   :  { %v2359_v59 = vpack.c.bf16 %v5140_v58, %v5140_v58  ;;  %v2335_v0 = vsel %vm2286_vm8, %v5140_v58, 0.0 }
 0xbd9   :  { %v5144_v60 = vpop.eup %3673  ;;  %3473 = vmatmul.mubr.msk.bf16.vlgmr.msra.gmra.mrb[52].mxu0 %vm677_vm5, %v2359_v59 }
 0xbda   :  { %3483 = vmatpush3.bf16.msra.mxu0 %v2473_v61  ;;  %v2360_v62 = vpack.c.bf16 %v5144_v60, %v5144_v60  ;;  %3484 = vmatprep.mubr.msk.bf16.mxu0 %vm4339_vm1, %v4338_v27  ;;  %v2338_v51 = vsel %vm2286_vm8, %v5144_v60, 0.0 }
 0xbdb   :  { %3494 = vmatprep.subr.bf16.mxu0 %v4338_v27 }
 0xbdc   :  { %3479 = vmatmul.mubr.msk.bf16.vlgmr.msra.gmra.mrb[60].mxu1 %vm677_vm5, %v2360_v62 }
 0xbdd   :  { %3489 = vmatpush3.bf16.msra.mxu1 %v2522_v33  ;;  %3490 = vmatprep.mubr.msk.bf16.mxu1 %vm4339_vm1, %v4338_v27 }
 0xbde   :  { %3500 = vmatprep.subr.bf16.mxu1 %v4338_v27 }
 0xbec   :  { %2300 = vmax.xlane.f32.xlu0 %v2299_v2 }
 0xbf0   :  { %2306 = vmax.xlane.f32.xlu0 %v2305_v4 }
 0xc06   :  { %2712 = vrot.lane.b32.xlu0 %v5083_v10, %s4343_s8 }
 0xc40   :  { %v2295_v7 = vpop.xlane.xlu0 %2294 }
 0xc41   :  { %v2313_v8 = vsub.f32 %v5120_v17, %v2295_v7 }
 0xc43   :  { %v2323_v9 = vmul.f32 1.442695, %v2313_v8 }
 0xc44   :  { %v2298_v12 = vpop.xlane.xlu0 %2297 }
 0xc45   :  { %3675 = vpow2.f32 %v2323_v9  ;;  %v2314_v13 = vsub.f32 %v5122_v23, %v2298_v12 }
 0xc47   :  { %v2325_v14 = vmul.f32 1.442695, %v2314_v13 }
 0xc48   :  { %v2304_v53 = vpop.xlane.xlu1 %2303  ;;  %v2615_v22 = vpop.permute.xlu0 %2614 }
 0xc49   :  { %3677 = vpow2.f32 %v2325_v14  ;;  %v2316_v40 = vsub.f32 %v5128_v30, %v2304_v53  ;;  %v2620_v26 = vsel %vm2373_vm15, %v2615_v22, 0 }
 0xc4b   :  { %v2329_v15 = vmul.f32 1.442695, %v2316_v40 }
 0xc4d   :  { %3679 = vpow2.f32 %v2329_v15 }
 0xc4f   :  { %v3676_v63 = vpop.eup %3675 }
 0xc50   :  { %v2310_v16 = vpop.xlane.xlu1 %2309  ;;  %v2341_v10 = vsel %vm2286_vm8, %v3676_v63, 0.0  ;;  %v2361_v18 = vpack.c.bf16 %v3676_v63, %v3676_v63 }
 0xc51   :  { %v2318_v17 = vsub.f32 %v5132_v42, %v2310_v16  ;;  %2342 = vadd.xlane.f32.xlu0 %v2341_v10 }
 0xc52   :  { %3485 = vmatmul.mubr.msk.bf16.vlgmr.msra.gmra.mrb[56].mxu0 %vm677_vm5, %v2361_v18 }
 0xc53   :  { %v3678_v21 = vpop.eup %3677  ;;  %v2333_v23 = vmul.f32 1.442695, %v2318_v17  ;;  %3495 = vmatpush3.bf16.msra.mxu0 %v2571_v19  ;;  %3496 = vmatprep.mubr.msk.bf16.mxu0 %vm4339_vm1, %v4338_v27 }
 0xc54   :  { %v2344_v20 = vsel %vm2286_vm8, %v3678_v21, 0.0  ;;  %v2362_v25 = vpack.c.bf16 %v3678_v21, %v3678_v21  ;;  %3506 = vmatprep.subr.bf16.mxu0 %v4338_v27  ;;  %v2664_v44 = vpop.permute.xlu1 %2663 }
 0xc55   :  { %3681 = vpow2.f32 %v2333_v23  ;;  %2345 = vadd.xlane.f32.xlu0 %v2344_v20  ;;  %v2669_v47 = vsel %vm2373_vm15, %v2664_v44, 0 }
 0xc56   :  { %3491 = vmatmul.mubr.msk.bf16.vlgmr.msra.gmra.mrb[64].mxu1 %vm677_vm5, %v2362_v25 }
 0xc57   :  { %v3680_v28 = vpop.eup %3679  ;;  %3501 = vmatpush3.bf16.msra.mxu1 %v2620_v26  ;;  %3502 = vmatprep.mubr.msk.bf16.mxu1 %vm4339_vm1, %v4338_v27 }
 0xc58   :  { %v2350_v29 = vsel %vm2286_vm8, %v3680_v28, 0.0  ;;  %3512 = vmatprep.subr.bf16.mxu1 %v4338_v27  ;;  %v2364_v30 = vpack.c.bf16 %v3680_v28, %v3680_v28 }
 0xc59   :  { %2351 = vadd.xlane.f32.xlu1 %v2350_v29  ;;  %v3627_v29 = vld [vmem:[#allocation28] sm:$0xff]  }
 0xc5e   :  { %3503 = vmatmul.mubr.msk.bf16.vlgmr.msra.gmra.mrb[68].mxu1 %vm677_vm5, %v2364_v30 }
 0xc5f   :  { %v3682_v6 = vpop.eup %3681  ;;  %3514 = vmatprep.mubr.msk.bf16.mxu1 %vm4339_vm1, %v4338_v27 }
 0xc60   :  { %v2356_v31 = vsel %vm2286_vm8, %v3682_v6, 0.0  ;;  %v2366_v42 = vpack.c.bf16 %v3682_v6, %v3682_v6 }
 0xc61   :  { %2357 = vadd.xlane.f32.xlu0 %v2356_v31 }
 0xc79   :  { %v2301_v32 = vpop.xlane.xlu0 %2300 }
 0xc7a   :  { %v2315_v24 = vsub.f32 %v2282_v50, %v2301_v32 }
 0xc7c   :  { %v2327_v34 = vmul.f32 1.442695, %v2315_v24 }
 0xc7d   :  { %v2307_v35 = vpop.xlane.xlu0 %2306 }
 0xc7e   :  { %3683 = vpow2.f32 %v2327_v34  ;;  %v2317_v36 = vsub.f32 %v2284_v1, %v2307_v35 }
 0xc80   :  { %v2331_v38 = vmul.f32 1.442695, %v2317_v36 }
 0xc81   :  { %v2713_v39 = vpop.permute.xlu0 %2712 }
 0xc82   :  { %3685 = vpow2.f32 %v2331_v38  ;;  %v2718_v41 = vsel %vm2373_vm15, %v2713_v39, 0  ;;  %v3628_v38 = vld [vmem:[#allocation28 + $0x8] sm:$0xff]  }
 0xc83   :  { %3513 = vmatpush3.bf16.msra.mxu1 %v2718_v41 }
 0xc84   :  { %3526 = vmatprep.subr.bf16.mxu1 %v4338_v27 }
 0xc86   :  { %3515 = vmatmul.mubr.msk.bf16.vlgmr.msra.gmra.mrb[72].mxu1 %vm677_vm5, %v2366_v42 }
 0xc87   :  { %3530 = vmatprep.mubr.msk.bf16.mxu1 %vm4339_vm1, %v4338_v27 }
 0xc88   :  { %v3684_v43 = vpop.eup %3683 }
 0xc89   :  { %v2347_v45 = vsel %vm2286_vm8, %v3684_v43, 0.0  ;;  %v2363_v46 = vpack.c.bf16 %v3684_v43, %v3684_v43 }
 0xc8a   :  { %2348 = vadd.xlane.f32.xlu1 %v2347_v45 }
 0xc8b   :  { %3497 = vmatmul.mubr.msk.bf16.vlgmr.msra.gmra.mrb[60].mxu0 %vm677_vm5, %v2363_v46 }
 0xc8c   :  { %v3686_v49 = vpop.eup %3685  ;;  %3507 = vmatpush3.bf16.msra.mxu0 %v2669_v47  ;;  %3508 = vmatprep.mubr.msk.bf16.mxu0 %vm4339_vm1, %v4338_v27 }
 0xc8d   :  { %v2353_v52 = vsel %vm2286_vm8, %v3686_v49, 0.0  ;;  %3518 = vmatprep.subr.bf16.mxu0 %v4338_v27  ;;  %v2365_v54 = vpack.c.bf16 %v3686_v49, %v3686_v49 }
 0xc8e   :  { %2339 = vadd.xlane.f32.xlu1 %v2338_v51  ;;  %2354 = vadd.xlane.f32.xlu0 %v2353_v52 }
 0xc92   :  { %2336 = vadd.xlane.f32.xlu0 %v2335_v0 }
 0xc93   :  { %3509 = vmatmul.mubr.msk.bf16.vlgmr.msra.gmra.mrb[64].mxu0 %vm677_vm5, %v2365_v54 }
 0xc94   :  { %3522 = vmatprep.mubr.msk.bf16.mxu0 %vm4339_vm1, %v4338_v27  ;;  %3519 = vmatpush3.bf16.msra.mxu0 %v3627_v29 }
 0xc95   :  { %3520 = vmatprep.subr.bf16.mxu0 %v4338_v27 }
 0xc98   :  { %3521 = vmatpush3.bf16.msra.mxu0 %v3628_v38  ;;  %v3634_v38 = vld [vmem:[#allocation37 + $0x18] sm:$0xff]  }
 0xc99   :  { %3534 = vmatprep.subr.bf16.mxu0 %v4338_v27 }
 0xcac   :  { %v5204_v55 = vpop.f32.mrb[52].mxu0 }
 0xcad   :  { %v3474_v3 = vpop.f32.mrb[53].mxu0 }
 0xcae   :  { %v2414_v48 = vpop.f32.mrb[54].mxu0 }
 0xcaf   :  { %v5206_v56 = vpop.f32.mrb[60].mxu1  ;;  %v3475_v57 = vpop.f32.mrb[55].mxu0 }
 0xcb0   :  { %v3480_v59 = vpop.f32.mrb[61].mxu1 }
 0xcb1   :  { %v2463_v60 = vpop.f32.mrb[62].mxu1 }
 0xcb2   :  { %v3481_v61 = vpop.f32.mrb[63].mxu1 }
 0xcde   :  { %v2343_v62 = vpop.xlane.xlu0 %2342 }
 0xcdf   :  { %3687 = vrcp.f32 %v2343_v62 }
 0xce2   :  { %v2346_v33 = vpop.xlane.xlu0 %2345 }
 0xce3   :  { %3689 = vrcp.f32 %v2346_v33 }
 0xce6   :  { %v2352_v18 = vpop.xlane.xlu1 %2351 }
 0xce9   :  { %v3688_v2 = vpop.eup %3687 }
 0xced   :  { %v3690_v7 = vpop.eup %3689 }
 0xcee   :  { %v2358_v10 = vpop.xlane.xlu0 %2357 }
 0xcef   :  { %3691 = vrcp.f32 %v2358_v10 }
 0xcf0   :  { %3693 = vrcp.f32 %v2352_v18 }
 0xcf9   :  { %v3692_v19 = vpop.eup %3691 }
 0xcfa   :  { %v3694_v28 = vpop.eup %3693 }
 0xd17   :  { %v2349_v17 = vpop.xlane.xlu1 %2348 }
 0xd18   :  { %3695 = vrcp.f32 %v2349_v17 }
 0xd1b   :  { %v2355_v21 = vpop.xlane.xlu0 %2354  ;;  %v2340_v46 = vpop.xlane.xlu1 %2339 }
 0xd1c   :  { %3697 = vrcp.f32 %v2355_v21 }
 0xd1d   :  { %3699 = vrcp.f32 %v2340_v46 }
 0xd1f   :  { %v2337_v47 = vpop.xlane.xlu0 %2336 }
 0xd20   :  { %3701 = vrcp.f32 %v2337_v47 }
 0xd22   :  { %v3696_v30 = vpop.eup %3695 }
 0xd25   :  { %v2509_v58 = vpop.f32.mrb[56].mxu0 }
 0xd26   :  { %v3486_v50 = vpop.f32.mrb[57].mxu0  ;;  %v2770_v9 = vmul.f32 %v3688_v2, %v2509_v58  ;;  %v3698_v39 = vpop.eup %3697 }
 0xd27   :  { %v2512_v1 = vpop.f32.mrb[58].mxu0  ;;  %v3700_v51 = vpop.eup %3699 }
 0xd28   :  { %v3487_v4 = vpop.f32.mrb[59].mxu0  ;;  %v2769_v54 = vmul.f32 %v3700_v51, %v5206_v56 }
 0xd29   :  { %v2558_v8 = vpop.f32.mrb[64].mxu1 }
 0xd2a   :  { %v2771_v11 = vmul.f32 %v3690_v7, %v2558_v8  ;;  %v3492_v12 = vpop.f32.mrb[65].mxu1  ;;  %v3702_v0 = vpop.eup %3701 }
 0xd2b   :  { %v2561_v13 = vpop.f32.mrb[66].mxu1  ;;  %v2768_v33 = vmul.f32 %v3702_v0, %v5204_v55  ;;  %v3191_v55 = vld [vmem:[#allocation29] ss:$0 sm:$0xff] }
 0xd2c   :  { %v3493_v14 = vpop.f32.mrb[67].mxu1  ;;  %v3609_v53 = vpack.i.bf16 %v2770_v9, %v2771_v11 }
 0xd2e   :  { %3610 = vrot.lane.b32.xlu1 %v3609_v53, %s5339_s5 }
 0xd31   :  { %v2656_v40 = vpop.f32.mrb[68].mxu1 }
 0xd32   :  { %v3504_v15 = vpop.f32.mrb[69].mxu1  ;;  %v2773_v31 = vmul.f32 %v3694_v28, %v2656_v40 }
 0xd33   :  { %v2659_v63 = vpop.f32.mrb[70].mxu1 }
 0xd34   :  { %v3505_v16 = vpop.f32.mrb[71].mxu1 }
 0xd59   :  { %v2754_v22 = vpop.f32.mrb[72].mxu1 }
 0xd5a   :  { %v2775_v23 = vmul.f32 %v3692_v19, %v2754_v22  ;;  %v3516_v20 = vpop.f32.mrb[73].mxu1 }
 0xd5b   :  { %v2757_v25 = vpop.f32.mrb[74].mxu1  ;;  %v3630_v20 = vld [vmem:[#allocation34 + $0x8] sm:$0xff]  }
 0xd5c   :  { %2796 = vrot.lane.b32.xlu1 %v2775_v23, %s4345_s15  ;;  %v3517_v26 = vpop.f32.mrb[75].mxu1  ;;  %v3629_v23 = vld [vmem:[#allocation34] sm:$0xff]  }
 0xd5d   :  { %3527 = vmatpush3.bf16.msra.mxu1 %v3629_v23  ;;  %v3632_v25 = vld [vmem:[#allocation37 + $0x8] sm:$0xff]  }
 0xd5e   :  { %v2607_v6 = vpop.f32.mrb[60].mxu0  ;;  %3528 = vmatprep.subr.bf16.mxu1 %v4338_v27 }
 0xd5f   :  { %v2772_v32 = vmul.f32 %v3696_v30, %v2607_v6  ;;  %v3498_v24 = vpop.f32.mrb[61].mxu0  ;;  %v3195_v6 = vld [vmem:[#allocation31] ss:$0 sm:$0xff] }
 0xd60   :  { %v2610_v34 = vpop.f32.mrb[62].mxu0 }
 0xd61   :  { %v3499_v35 = vpop.f32.mrb[63].mxu0  ;;  %v3614_v36 = vpack.i.bf16 %v2772_v32, %v2773_v31  ;;  %3529 = vmatpush3.bf16.msra.mxu1 %v3630_v20  ;;  %v3196_v32 = vld [vmem:[#allocation32] ss:$0 sm:$0xff] }
 0xd63   :  { %3615 = vrot.lane.b32.xlu0 %v3614_v36, %s4312_s7  ;;  %v3633_v36 = vld [vmem:[#allocation37 + $0x10] sm:$0xff]  }
 0xd66   :  { %v2705_v41 = vpop.f32.mrb[64].mxu0 }
 0xd67   :  { %v2774_v42 = vmul.f32 %v3698_v39, %v2705_v41  ;;  %v3510_v43 = vpop.f32.mrb[65].mxu0  ;;  %v3197_v39 = vld [vmem:[#allocation35] ss:$0 sm:$0xff] }
 0xd68   :  { %v2708_v44 = vpop.f32.mrb[66].mxu0 }
 0xd69   :  { %v3511_v45 = vpop.f32.mrb[67].mxu0  ;;  %2794 = vrot.lane.b32.xlu1 %v2774_v42, %s4345_s15 }
 0xda0   :  { %v3611_v49 = vpop.permute.xlu1 %3610 }
 0xda1   :  { %v3612_v52 = vunpack.i.l.bf16 %v3611_v49  ;;  %v3613_v48 = vunpack.i.h.bf16 %v3611_v49 }
 0xda3   :  { %v2801_v59 = vsel %vm677_vm5, %v2769_v54, %v3612_v52  ;;  %v2800_v1 = vsel %vm677_vm5, %v2768_v33, %v3613_v48 }
 0xdce   :  { %v2797_v60 = vpop.permute.xlu1 %2796 }
 0xdd5   :  { %v3616_v3 = vpop.permute.xlu0 %3615 }
 0xdd6   :  { %v3617_v57 = vunpack.i.l.bf16 %v3616_v3  ;;  %v3618_v61 = vunpack.i.h.bf16 %v3616_v3 }
 0xdd8   :  { %v2803_v62 = vsel %vm1585_vm13, %v2801_v59, %v3617_v57  ;;  %v2802_v2 = vsel %vm1585_vm13, %v2800_v1, %v3618_v61 }
 0xdd9   :  { %v2805_v58 = vsel %vm1588_vm14, %v2803_v62, %v2797_v60 }
 0xdda   :  { %v2807_v50 = vpack.c.bf16 %v2805_v58, %v2805_v58 }
 0xddb   :  { %v2795_v4 = vpop.permute.xlu1 %2794 }
 0xddc   :  { %v2822_v56 = vunpack.c.l.b16 %v2807_v50  ;;  %v2804_v7 = vsel %vm1588_vm14, %v2802_v2, %v2795_v4 }
 0xddd   :  { %v2806_v8 = vpack.c.bf16 %v2804_v7, %v2804_v7 }
 0xdde   :  { %v2823_v9 = vrot.slane %v2822_v56, 7 }
 0xddf   :  { %v2821_v11 = vunpack.c.l.b16 %v2806_v8 }
 0xde1   :  { %v2824_v12 = vsel %vm564_vm3, %v2823_v9, %v2821_v11 }
 0xde2   :  { %v2825_v13 = vpack.c.b16 %v2824_v12, %v2824_v12 }
 0xde4   :  { %3523 = vmatmul.mubr.msk.bf16.vlgmr.msra.gmra.mrb[68].mxu0 %vm579_vm4, %v2825_v13 }
 0xde5   :  { %3542 = vmatprep.mubr.msk.bf16.mxu0 %vm4339_vm1, %v4338_v27 }
 0xeb7   :  { %v2875_v14 = vpop.f32.mrb[68].mxu0 }
 0xeb8   :  { %v2876_v53 = vadd.f32 %v3191_v55, %v2875_v14  ;;  %v3524_v40 = vpop.f32.mrb[69].mxu0 }
 0xeb9   :  { %v2878_v15 = vpop.f32.mrb[70].mxu0 }
 0xeba   :  { %v5227_v63 = vadd.f32 %v2876_v53, %v5021_v37  ;;  %v3525_v16 = vpop.f32.mrb[71].mxu0  ;;  %v3631_v37 = vld [vmem:[#allocation37] sm:$0xff]  }
 0xebb   :  { %3535 = vmatpush3.bf16.msra.mxu0 %v3631_v37 }
 0xebc   :  { %v2884_v10 = vsel %vm426_vm0, %v5227_v63, 0.0  ;;  %3536 = vmatprep.subr.bf16.mxu0 %v4338_v27 }
 0xebd   :  { %2885 = vadd.xlane.f32.xlu0 %v2884_v10 }
 0xebf   :  { %3537 = vmatpush3.bf16.msra.mxu0 %v3632_v25 }
 0xec0   :  { %3538 = vmatprep.subr.bf16.mxu0 %v4338_v27 }
 0xec3   :  { %3539 = vmatpush3.bf16.msra.mxu0 %v3633_v36 }
 0xec4   :  { %3540 = vmatprep.subr.bf16.mxu0 %v4338_v27 }
 0xec7   :  { %3541 = vmatpush3.bf16.msra.mxu0 %v3634_v38 }
 0xf4a   :  { %v2886_v18 = vpop.xlane.xlu0 %2885 }
 0xf4b   :  { %v2887_v17 = vmul.f32 0.03125, %v2886_v18 }
 0xf4d   :  { %v2888_v19 = vsub.f32 %v5227_v63, %v2887_v17 }
 0xf4f   :  { %v2889_v21 = vmul.f32 %v2888_v19, %v2888_v19 }
 0xf51   :  { %v2890_v22 = vsel %vm426_vm0, %v2889_v21, 0.0  ;;  %vm3019_vm0 = vcmask 523264  }
 0xf52   :  { %2891 = vadd.xlane.f32.xlu1 %v2890_v22 }
 0xfdf   :  { %v2892_v26 = vpop.xlane.xlu1 %2891 }
 0xfe0   :  { %v2893_v28 = vmul.f32 0.03125, %v2892_v26 }
 0xfe2   :  { %v2894_v29 = vadd.f32 1e-06, %v2893_v28 }
 0xfe4   :  { %3703 = vrsqrt.f32 %v2894_v29 }
 0xfee   :  { %v3704_v30 = vpop.eup %3703 }
 0xfef   :  { %v2896_v31 = vmul.f32 %v3704_v30, %v2888_v19 }
 0xff1   :  { %v2903_v24 = vmul.f32 %v3195_v6, %v2896_v31 }
 0xff3   :  { %v2910_v34 = vadd.f32 %v3196_v32, %v2903_v24 }
 0xff5   :  { %v2911_v35 = vpack.c.bf16 %v2910_v34, %v2910_v34 }
 0xff7   :  { %3531 = vmatmul.mubr.msk.bf16.vlgmr.msra.gmra.mrb[76].mxu1 %vm579_vm4, %v2911_v35 }
0x10ca   :  { %v2972_v41 = vpop.f32.mrb[76].mxu1 }
0x10cb   :  { %v2973_v42 = vadd.f32 %v3197_v39, %v2972_v41  ;;  %v3532_v43 = vpop.f32.mrb[77].mxu1 }
0x10cc   :  { %v2975_v44 = vpop.f32.mrb[78].mxu1 }
0x10cd   :  { %v2978_v45 = vmax.f32 %v2973_v42, 0.0  ;;  %v3533_v46 = vpop.f32.mrb[79].mxu1 }
0x10cf   :  { %v2979_v47 = vpack.c.bf16 %v2978_v45, %v2978_v45 }
0x10d1   :  { %3543 = vmatmul.mubr.msk.bf16.vlgmr.msra.gmra.mrb[72].mxu0 %vm3019_vm0, %v2979_v47 }
0x10d2   :  { %4244 = shalt.err (!%p4241_p0)
}
0x10d3   :  { %s5340_s12 = sld [smem:[#allocation70_spill]] }
0x10d9   :  { %s4245_s26 = scalar_lea.hbm %s5340_s12, 32 }
0x10da   :  { %p4246_p1 = scmp.ne.s32.totalorder %s5340_s12, %s4245_s26  ;;  %p4249_p2 = scmp.lt.u32.totalorder %s4245_s26, %s5340_s12 }
0x10dc   :  { %p4251_p3 = pnand %p4249_p2, %p4246_p1 }
0x10de   :  { %4254 = shalt.err (!%p4251_p3)
}
0x10df   :  { %3117 = dma.vmem_to_hbm [thread:$0]  %s3112_s13, 32, %s5340_s12, [#allocation42], %s4312_s7, %s4312_s7, %s4313_s28   ;;  %v3201_v27 = vld [vmem:[#allocation38] ss:$0 sm:$0xff] }
0x10e0   :  { %s4347_s29 = smov [#allocation40]  }
0x10e1   :  { %s3099_s11 = sshll.u32 %s4347_s29, 4  ;;  %s3100_s11 = int_to_ptr.vmem [resolvable:$true] %s3099_s11 }
0x10e2   :  { %s4255_s4 = scalar_lea.vmem %s3100_s11, 32  ;;  %p4260_p5 = scmp.lt.s32.totalorder %s3100_s11, %s3100_s11 }
0x10e3   :  { %p4256_p4 = scmp.ne.s32.totalorder %s3100_s11, %s4255_s4  ;;  %p4261_p6 = scmp.lt.s32.totalorder %s4255_s4, %s4255_s4 }
0x10e5   :  { %p4262_p7 = por %p4261_p6, %p4260_p5 }
0x10e7   :  { %p4263_p8 = pnand %p4262_p7, %p4256_p4 }
0x11a4   :  { %v3057_v49 = vpop.f32.mrb[72].mxu0 }
0x11a5   :  { %v3058_v51 = vadd.f32 %v3201_v27, %v3057_v49  ;;  %v3544_v52 = vpop.f32.mrb[73].mxu0 }
0x11a6   :  { %v3060_v0 = vpop.f32.mrb[74].mxu0 }
0x11a7   :  { %v3063_v54 = vadd.f32 %v3058_v51, %v5227_v63  ;;  %v3545_v3 = vpop.f32.mrb[75].mxu0 }
0x11a9   :  { %v3071_v48 = vrot.slane %v3063_v54, %v4822_v5 }
0x11ab   :  { %v3072_v57 = vcombine.high %v3071_v48, %v3071_v48  ;;  %v3079_v59 = vrot.slane %v3071_v48, %v4822_v5 }
0x11ad   :  { %v3086_v60 = vrot.slane %v3072_v57, %v4822_v5  ;;  %3090 = vst.msk [vmem:[#allocation40] sm:$0x1] %vm3089_vm2, %v3079_v59 }
0x11af   :  { %3091 = vst.msk [vmem:[#allocation40 + $0x1] sm:$0x1] %vm3089_vm2, %v3086_v60 }
0x11b0   :  { %4266 = shalt.err (!%p4263_p8)
}
0x11b1   :  { %s5341_s10 = sld [smem:[#allocation69_spill]] }
0x11b7   :  { %s4267_s17 = scalar_lea.hbm %s5341_s10, 32 }
0x11b8   :  { %p4268_p9 = scmp.ne.s32.totalorder %s5341_s10, %s4267_s17  ;;  %p4271_p10 = scmp.lt.u32.totalorder %s4267_s17, %s5341_s10 }
0x11ba   :  { %p4273_p11 = pnand %p4271_p10, %p4268_p9 }
0x11bc   :  { %4276 = shalt.err (!%p4273_p11)
}
0x11bd   :  { %3105 = dma.vmem_to_hbm [thread:$0]  %s3100_s11, 32, %s5341_s10, [#allocation4], %s4312_s7, %s4312_s7, %s4313_s28  }
0x11be   :  { %4303 = dma.done.wait [#allocation4], 32  }
0x11bf   :  { %4304 = vsyncadd [#allocation4], 4294967264 }
0x11c0   :  { %4305 = dma.done.wait [#allocation42], 32  }
0x11c1   :  { %4306 = vsyncadd [#allocation42], 4294967264 }
0x11c2   :  { %3124 = vsyncpa [#allocation3], 1 }
0x11c3   :  { %3125 = vsyncpa [#allocation6], 1 }
0x11c4   :  { %3126 = vsyncpa [#allocation9], 1 }
0x11c5   :  { %3127 = vsyncpa [#allocation12], 1 }
0x11c6   :  { %3128 = vsyncpa [#allocation15], 1 }
0x11c7   :  { %3129 = vsyncpa [#allocation18], 1 }
0x11c8   :  { %3130 = vsyncpa [#allocation21], 1 }
0x11c9   :  { %3131 = vsyncpa [#allocation24], 1 }
0x11ca   :  { %3132 = vsyncpa [#allocation27], 1 }
0x11cb   :  { %3133 = vsyncpa [#allocation30], 1 }
0x11cc   :  { %3134 = vsyncpa [#allocation33], 1 }
0x11cd   :  { %3135 = vsyncpa [#allocation36], 1 }
0x11ce   :  { %3136 = vsyncpa [#allocation39], 1 }
0x11cf   :  { %3137 = vsyncpa [#allocation4], 1 }
0x11d0   :  { %3138 = vsyncpa [#allocation42], 1 }

</bundles_post_ra>
